<compile_context>
chip_gen: v7x
topology: tpu7x:2x2x1
jax: 0.10.0
libtpu: 0.0.40
codegen_flags: <defaults>
</compile_context>

<pallas_src>
import functools

import jax
import jax.numpy as jnp
from jax import lax
from jax.experimental import pallas as pl
from jax.experimental.pallas import tpu as pltpu

CFG = dict(hidden=32, heads=4, layers=2, intermediate=64, vocab=256,
           max_pos=16, type_vocab=2, img_out_dim=48, patch=8, in_ch=3)

LN_EPS = 1e-12


# --------------------------- in-kernel helpers -------------------------------


def _ln(v, g, b, eps):
    mu = jnp.mean(v, axis=-1, keepdims=True)
    var = jnp.mean(jnp.square(v - mu), axis=-1, keepdims=True)
    return (v - mu) * lax.rsqrt(var + eps) * g + b


def _mm(a, b):
    # bf16 MXU matmul with f32 accumulation.
    return jnp.dot(a.astype(jnp.bfloat16), b.astype(jnp.bfloat16),
                   preferred_element_type=jnp.float32)


# ------------------- fused BERT encoder (one kernel / call) ------------------


def _encoder_kernel(x_ref, mask_ref, eg_ref, eb_ref,
                    wqkv_ref, bqkv_ref, wao_ref, aob_ref, ag_ref, ab_ref,
                    f1w_ref, f1b_ref, f2w_ref, f2b_ref, fg_ref, fb_ref,
                    pw_ref, pb_ref,
                    seq_ref, pool_ref,
                    *, n_layers, n_heads, eps, normalize_pooled):
    R, S, H = x_ref.shape
    d = H // n_heads
    bf16 = jnp.bfloat16

    # Embedding LayerNorm fused into the encoder kernel (R rows per grid step).
    x = _ln(x_ref[...].astype(jnp.float32), eg_ref[...], eb_ref[...], eps)   # (R,S,H)
    # Attention bias built + broadcast ONCE per call (not per layer / head).
    bias = jnp.broadcast_to(
        (1.0 - mask_ref[...].astype(jnp.float32)) * -10000.0, (R, S, S))

    for l in range(n_layers):
        xf = x.astype(bf16).reshape(R * S, H)
        # Fused lane-dense QKV projection: one (R*S,H)@(H,3H) MXU matmul.
        # 1/sqrt(d) is folded into the Q weight/bias at prepare_params time.
        qkv = (jnp.dot(xf, wqkv_ref[l], preferred_element_type=jnp.float32)
               + bqkv_ref[l]).reshape(R, S, 3 * H).astype(bf16)
        ctx = []
        for h in range(n_heads):
            q = qkv[:, :, h * d:(h + 1) * d]                       # (R,S,d)
            k = qkv[:, :, H + h * d:H + (h + 1) * d]               # (R,S,d)
            v = qkv[:, :, 2 * H + h * d:2 * H + (h + 1) * d]       # (R,S,d)
            s = jnp.einsum('rqd,rkd->rqk', q, k,
                           preferred_element_type=jnp.float32) + bias
            s = s - jnp.max(s, axis=-1, keepdims=True)
            p = jnp.exp(s)
            p = p / jnp.sum(p, axis=-1, keepdims=True)
            ctx.append(jnp.einsum('rqk,rkd->rqd', p.astype(bf16), v,
                                  preferred_element_type=jnp.float32))
        # Concatenate heads along lanes and run ONE (R*S,H)@(H,H) output matmul.
        ctx_all = jnp.concatenate(ctx, axis=-1).astype(bf16).reshape(R * S, H)
        attn = (jnp.dot(ctx_all, wao_ref[l], preferred_element_type=jnp.float32)
                .reshape(R, S, H) + aob_ref[l])
        x = _ln(attn + x, ag_ref[l], ab_ref[l], eps)
        xf = x.astype(bf16).reshape(R * S, H)
        # TODO(synk): HF BERT uses exact erf GELU; the tanh approximation is used here.
        hdn = jax.nn.gelu(jnp.dot(xf, f1w_ref[l], preferred_element_type=jnp.float32)
                          + f1b_ref[l], approximate=True)
        ffo = (jnp.dot(hdn.astype(bf16), f2w_ref[l],
                       preferred_element_type=jnp.float32).reshape(R, S, H)
               + f2b_ref[l])
        x = _ln(ffo + x, fg_ref[l], fb_ref[l], eps)

    seq_ref[...] = x.astype(seq_ref.dtype)
    pooled = jnp.tanh(jnp.dot(x[:, 0, :].astype(bf16), pw_ref[...],
                              preferred_element_type=jnp.float32) + pb_ref[...])  # (R,H)
    if normalize_pooled:
        nrm = jnp.sqrt(jnp.sum(pooled * pooled, axis=-1, keepdims=True))
        pooled = pooled / jnp.maximum(nrm, 1e-12)
    pool_ref[...] = pooled.reshape(R, 1, H).astype(pool_ref.dtype)


def _rows_per_step(batch):
    """Largest divisor of `batch` that still leaves >= 2 grid steps.

    >= 2 steps keeps both v7x TensorCores busy under dimension_semantics
    ("parallel",); bigger per-step blocks amortize the ~0.35us/step overhead
    on single-TC v5e/v6e and fill more sublanes per vreg."""
    if batch <= 1:
        return 1
    best = 1
    for r in range(1, batch + 1):
        if batch % r == 0 and batch // r >= 2:
            best = r
    return best


def _weight_spec(arr):
    nd = arr.ndim
    idx = lambda b, _n=nd: (0,) * _n
    try:
        # Weights are grid-invariant: single-buffer them (skip pointless
        # double-buffering VMEM + prologue DMA descriptors).
        return pl.BlockSpec(arr.shape, idx, pipeline_mode=pl.Buffered(1))
    except TypeError:  # BlockSpec without pipeline_mode support
        return pl.BlockSpec(arr.shape, idx)


def fused_encoder(pk, cfg, x_sum, mask_f, *, normalize_pooled):
    """x_sum: (B, S, H) pre-LayerNorm embedding sum, mask_f: (B, 1, S) float 1/0."""
    B, S0, H = x_sum.shape
    # Pad the sequence to a sublane multiple: unmasked vst on seq_ref and free
    # (R,S,H)<->(R*S,H) reshapes in the kernel; padded keys are masked out.
    S = ((S0 + 7) // 8) * 8
    if S != S0:
        x_sum = jnp.pad(x_sum, ((0, 0), (0, S - S0), (0, 0)))
        mask_f = jnp.pad(mask_f, ((0, 0), (0, 0), (0, S - S0)))

    R = _rows_per_step(B)
    G = B // R
    kern = functools.partial(_encoder_kernel, n_layers=cfg["layers"],
                             n_heads=cfg["heads"], eps=LN_EPS,
                             normalize_pooled=normalize_pooled)

    weights = [pk["emb_ln_g"], pk["emb_ln_b"],
               pk["wqkv"], pk["bqkv"], pk["wao"], pk["aob"],
               pk["aln_g"], pk["aln_b"],
               pk["f1w"], pk["f1b"], pk["f2w"], pk["f2b"],
               pk["fln_g"], pk["fln_b"], pk["pool_w"], pk["pool_b"]]

    # TODO(synk): at real BERT sizes add a grid axis over layers ("arbitrary")
    # with layer-indexed weight BlockSpecs so only 1-2 layers of weights are
    # VMEM-resident (v7x has 64 MiB); at CFG sizes full residency is fine.
    in_specs = ([pl.BlockSpec((R, S, H), lambda b: (b, 0, 0)),
                 pl.BlockSpec((R, 1, S), lambda b: (b, 0, 0))]
                + [_weight_spec(a) for a in weights])
    out_specs = (pl.BlockSpec((R, S, H), lambda b: (b, 0, 0)),
                 pl.BlockSpec((R, 1, H), lambda b: (b, 0, 0)))

    seq, pooled = pl.pallas_call(
        kern,
        grid=(G,),
        in_specs=in_specs,
        out_specs=out_specs,
        out_shape=(jax.ShapeDtypeStruct((B, S, H), jnp.float32),
                   jax.ShapeDtypeStruct((B, 1, H), jnp.float32)),
        compiler_params=pltpu.CompilerParams(
            dimension_semantics=("parallel",)),
    )(x_sum.astype(jnp.bfloat16), mask_f.astype(jnp.bfloat16), *weights)
    return seq[:, :S0], pooled[:, 0, :]


# -------------------- fused image branch (one kernel) ------------------------


def _image_kernel(patch_ref, valid_ref, wc_ref, bc_ref,
                  f1w_ref, f1b_ref, f2w_ref, f2b_ref,
                  tok_ref, feat_ref, *, tokens_per_clip):
    # patch-embedding conv + img_proj folded into one bf16 matmul.
    proj = _mm(patch_ref[...], wc_ref[...]) + bc_ref[...]                 # (Np, H) f32
    n_clips_tot = tok_ref.shape[0]
    n_patch = proj.shape[0]
    row = lax.broadcasted_iota(jnp.int32, (n_clips_tot, n_patch), 0)
    col = lax.broadcasted_iota(jnp.int32, (n_clips_tot, n_patch), 1)
    sel = jnp.logical_and(col >= row * tokens_per_clip,
                          col < (row + 1) * tokens_per_clip)
    m = sel.astype(jnp.float32) * valid_ref[...]                          # (n_clips, Np), 0/1
    den = jnp.maximum(jnp.sum(m, axis=-1, keepdims=True), 1.0)            # guard all-padded clip
    tok = _mm(m, proj) / den                        # masked mean: bf16 MXU, f32 accumulate
    tok_ref[...] = tok                                                    # clip tokens
    hid = jnp.maximum(_mm(tok, f1w_ref[...]) + f1b_ref[...], 0.0)         # img_fc: Linear+ReLU
    feat = _mm(hid, f2w_ref[...]) + f2b_ref[...]                          # Linear
    nrm = jnp.sqrt(jnp.sum(feat * feat, axis=-1, keepdims=True))
    feat_ref[...] = feat / jnp.maximum(nrm, 1e-12)                        # F.normalize


# ----------------------------- parameters ------------------------------------


def _init(key, shape, scale=0.02):
    return scale * jax.random.normal(key, shape, dtype=jnp.float32)


def init_params(key, cfg):
    H, I = cfg["hidden"], cfg["intermediate"]
    keys = iter(jax.random.split(key, 64))
    p = {}
    p["word_emb"] = _init(next(keys), (cfg["vocab"], H))
    p["pos_emb"] = _init(next(keys), (cfg["max_pos"], H))
    p["type_emb"] = _init(next(keys), (cfg["type_vocab"], H))
    p["emb_ln_g"] = jnp.ones((H,), jnp.float32)
    p["emb_ln_b"] = jnp.zeros((H,), jnp.float32)
    layers = []
    for _ in range(cfg["layers"]):
        layers.append(dict(
            q_w=_init(next(keys), (H, H)), q_b=jnp.zeros((H,)),
            k_w=_init(next(keys), (H, H)), k_b=jnp.zeros((H,)),
            v_w=_init(next(keys), (H, H)), v_b=jnp.zeros((H,)),
            ao_w=_init(next(keys), (H, H)), ao_b=jnp.zeros((H,)),
            a_ln_g=jnp.ones((H,)), a_ln_b=jnp.zeros((H,)),
            f1_w=_init(next(keys), (H, I)), f1_b=jnp.zeros((I,)),
            f2_w=_init(next(keys), (I, H)), f2_b=jnp.zeros((H,)),
            f_ln_g=jnp.ones((H,)), f_ln_b=jnp.zeros((H,)),
        ))
    p["layers"] = layers
    p["pool_w"] = _init(next(keys), (H, H))
    p["pool_b"] = jnp.zeros((H,))
    p["patch_w"] = _init(next(keys),
                         (cfg["in_ch"] * cfg["patch"] * cfg["patch"], cfg["img_out_dim"]))
    p["patch_b"] = jnp.zeros((cfg["img_out_dim"],))
    p["img_proj"] = _init(next(keys), (cfg["img_out_dim"], H))
    p["fc1_w"] = _init(next(keys), (H, H)); p["fc1_b"] = jnp.zeros((H,))
    p["fc2_w"] = _init(next(keys), (H, H)); p["fc2_b"] = jnp.zeros((H,))
    return p


def prepare_params(p, cfg):
    """One-time repack: lane-dense fused QKV/output weights, layer-stacked
    slabs, 1/sqrt(d) folded into Q, bf16 matmul operands."""
    H, I = cfg["hidden"], cfg["intermediate"]
    L, nh = cfg["layers"], cfg["heads"]
    d = H // nh
    scale = 1.0 / (d ** 0.5)
    bf16 = jnp.bfloat16

    def stack(name):
        return jnp.stack([lp[name] for lp in p["layers"]], axis=0)

    wqkv = jnp.concatenate([stack("q_w") * scale, stack("k_w"), stack("v_w")],
                           axis=-1)                                       # (L, H, 3H)
    bqkv = jnp.concatenate([stack("q_b") * scale, stack("k_b"), stack("v_b")],
                           axis=-1)                                       # (L, 3H)

    pk = dict(
        word_emb=p["word_emb"], pos_emb=p["pos_emb"], type_emb=p["type_emb"],
        emb_ln_g=p["emb_ln_g"].reshape(1, H), emb_ln_b=p["emb_ln_b"].reshape(1, H),
        wqkv=wqkv.astype(bf16), bqkv=bqkv.reshape(L, 1, 3 * H),
        wao=stack("ao_w").astype(bf16), aob=stack("ao_b").reshape(L, 1, H),
        aln_g=stack("a_ln_g").reshape(L, 1, H), aln_b=stack("a_ln_b").reshape(L, 1, H),
        f1w=stack("f1_w").astype(bf16), f1b=stack("f1_b").reshape(L, 1, I),
        f2w=stack("f2_w").astype(bf16), f2b=stack("f2_b").reshape(L, 1, H),
        fln_g=stack("f_ln_g").reshape(L, 1, H), fln_b=stack("f_ln_b").reshape(L, 1, H),
        pool_w=p["pool_w"].astype(bf16), pool_b=p["pool_b"].reshape(1, H),
        # image branch: fold patch-embedding conv and img_proj into a single weight
        wc=(p["patch_w"] @ p["img_proj"]).astype(bf16),
        bc=(p["patch_b"] @ p["img_proj"]).reshape(1, H),
        fc1_w=p["fc1_w"].astype(bf16), fc1_b=p["fc1_b"].reshape(1, H),
        fc2_w=p["fc2_w"].astype(bf16), fc2_b=p["fc2_b"].reshape(1, H),
    )
    return pk


# --------------------------- UnivlVideoBase ----------------------------------


def embed_pre_ln(pk, *, input_ids=None, inputs_embeds=None, token_type):
    """word/pos/type embedding sum (LayerNorm is fused into the encoder kernel)."""
    if inputs_embeds is None:
        inputs_embeds = jnp.take(pk["word_emb"], input_ids, axis=0)
    S = inputs_embeds.shape[1]
    pos = pk["pos_emb"][:S][None, :, :]
    typ = pk["type_emb"][token_type][None, None, :]
    return inputs_embeds + pos + typ


def forward_img_encoder(pk, cfg, image_data, image_pad_mask, n_clips, n_frames):
    B, N, Cin, Himg, Wimg = image_data.shape
    P = cfg["patch"]
    h, w = Himg // P, Wimg // P
    # TODO(synk): im2col patch extraction stays in XLA — a per-patch BlockSpec would need
    # last-dim blocks of P=8 which violates the (8,128) lane rule at this patch size.
    x = image_data.reshape(B, N, Cin, h, P, w, P)
    x = x.transpose(0, 1, 3, 5, 2, 4, 6).reshape(B * N * h * w, Cin * P * P)
    grid_mask = jnp.any(image_pad_mask.reshape(B, N, h, P, w, P), axis=(3, 5))  # True = padded
    valid = (~grid_mask).reshape(1, B * N * h * w).astype(jnp.float32)
    n_clips_tot = B * n_clips
    tokens_per_clip = n_frames * h * w
    H = cfg["hidden"]

    tok, feat = pl.pallas_call(
        functools.partial(_image_kernel, tokens_per_clip=tokens_per_clip),
        out_shape=(jax.ShapeDtypeStruct((n_clips_tot, H), jnp.float32),
                   jax.ShapeDtypeStruct((n_clips_tot, H), jnp.float32)),
    )(x, valid, pk["wc"], pk["bc"], pk["fc1_w"], pk["fc1_b"],
      pk["fc2_w"], pk["fc2_b"])

    clip_tokens = tok.reshape(B, n_clips, H)
    clip_mask = jnp.zeros((B, n_clips), dtype=bool)
    return dict(visual_embed=clip_tokens, visual_mask=clip_mask,
                visual_grid_shape=(h, w), clip_feature=feat)


def forward_text_encoder(pk, cfg, input_ids, input_mask):
    emb = embed_pre_ln(pk, input_ids=input_ids, token_type=0)
    mask_f = input_mask.astype(jnp.float32)[:, None, :]
    seq, pooled = fused_encoder(pk, cfg, emb, mask_f, normalize_pooled=True)
    # TODO(synk): training-mode words_importance (mean of per-layer attention maps) is
    # not computed; the eval path of the reference module is reproduced.
    return dict(sequence_output=seq, pooled_output=pooled,
                input_mask=input_mask, words_importance=None)


def get_cross_output(pk, cfg, cap_ids, cap_mask, visual_embed, visual_mask, n_clips):
    B, _, H = visual_embed.shape
    # prepare_cross_text: caption embeddings (token_type 0, positions from 0)
    cap_sum = embed_pre_ln(pk, input_ids=cap_ids, token_type=0)
    # prepare_cross_visual: clip tokens + [SEP] word embedding (token_type 1, positions from 0)
    sep = jnp.broadcast_to(pk["word_emb"][102][None, None, :], (B, 1, H))
    vis_sum = embed_pre_ln(
        pk, inputs_embeds=jnp.concatenate([visual_embed, sep], axis=1), token_type=1)
    vis_valid = 1.0 - visual_mask.astype(jnp.float32)          # logical_not
    vis_mask = jnp.concatenate([vis_valid, jnp.ones((B, 1), jnp.float32)], axis=1)

    cap_sum_r = cap_sum
    cap_mask_r = cap_mask.astype(jnp.float32)
    if n_clips > 1:
        # TODO(synk): could instead re-read the same caption block per clip via a
        # BlockSpec index_map; the repeat path is never hit for n_clips == 1.
        cap_sum_r = jnp.repeat(cap_sum_r, n_clips, axis=0)
        cap_mask_r = jnp.repeat(cap_mask_r, n_clips, axis=0)

    cap_len = cap_sum_r.shape[1]
    embed = jnp.concatenate([cap_sum_r, vis_sum], axis=1)      # pre-LN; LN fused in kernel
    mask = jnp.concatenate([cap_mask_r, vis_mask], axis=1)[:, None, :]
    # fused_encoder pads the (cap_len + n_clips + 1) sequence up to a multiple
    # of 8 with masked zero rows and slices the padding off after the call.
    seq, pooled = fused_encoder(pk, cfg, embed, mask, normalize_pooled=False)
    cap_seq = seq[:, :cap_len]
    vis_seq = seq[:, cap_len:]
    return cap_seq, vis_seq[:, :-1], pooled


@functools.partial(jax.jit, static_argnames=("n_clips", "n_frames"))
def univl_forward(pk, image_data, image_pad_mask, caption_input_ids,
                  caption_raw_input_ids, caption_input_mask, *, n_clips, n_frames):
    cfg = CFG
    vis = forward_img_encoder(pk, cfg, image_data, image_pad_mask, n_clips, n_frames)
    txt = forward_text_encoder(pk, cfg, caption_raw_input_ids, caption_input_mask)
    cap_seq, vis_seq, pooled = get_cross_output(
        pk, cfg, caption_input_ids, caption_input_mask,
        vis["visual_embed"], vis["visual_mask"], n_clips)
    # text pooled output / clip feature returned so those branches stay live under jit.
    return cap_seq, vis_seq, pooled, txt["pooled_output"], vis["clip_feature"]


# --------------------------------- main ---------------------------------------

if __name__ == "__main__":
    cfg = CFG
    key = jax.random.PRNGKey(0)
    kp, kd, kt = jax.random.split(key, 3)
    params = init_params(kp, cfg)
    pk = prepare_params(params, cfg)

    B, n_clips, n_frames = 2, 1, 2
    N = n_clips * n_frames
    Himg = Wimg = 16
    image_data = jax.random.normal(kd, (B, N, cfg["in_ch"], Himg, Wimg),
                                   dtype=jnp.float32)
    image_pad_mask = jnp.zeros((B, N, Himg, Wimg), dtype=bool)
    image_pad_mask = image_pad_mask.at[1, :, :, 8:].set(True)  # pad right half of sample 1

    S = 8
    ids = jax.random.randint(kt, (B, S), 0, cfg["vocab"], dtype=jnp.int32)
    input_mask = jnp.ones((B, S), dtype=jnp.int32).at[1, 6:].set(0)

    cap_seq, vis_seq, pooled, txt_pooled, clip_feat = univl_forward(
        pk, image_data, image_pad_mask, ids, ids, input_mask,
        n_clips=n_clips, n_frames=n_frames)
    jax.block_until_ready((cap_seq, vis_seq, pooled, txt_pooled, clip_feat))

    assert cap_seq.shape == (B, S, cfg["hidden"])
    assert vis_seq.shape == (B, n_clips, cfg["hidden"])
    assert pooled.shape == (B, cfg["hidden"])
    assert txt_pooled.shape == (B, cfg["hidden"])
    assert clip_feat.shape == (B * n_clips, cfg["hidden"])
    assert bool(jnp.all(jnp.isfinite(cap_seq)))
    assert bool(jnp.all(jnp.isfinite(vis_seq)))
    assert bool(jnp.all(jnp.isfinite(pooled)))
    assert bool(jnp.all(jnp.isfinite(txt_pooled)))
    assert bool(jnp.all(jnp.isfinite(clip_feat)))
    print("KERNEL_OK")
</pallas_src>

<mosaic_0001>
module attributes {stable_mosaic.version = 11 : i64} {
  func.func @_image_kernel(%arg0: memref<16x192xf32, #tpu.memory_space<vmem>>, %arg1: memref<1x16xf32, #tpu.memory_space<vmem>>, %arg2: memref<192x32xbf16, #tpu.memory_space<vmem>>, %arg3: memref<1x32xf32, #tpu.memory_space<vmem>>, %arg4: memref<32x32xbf16, #tpu.memory_space<vmem>>, %arg5: memref<1x32xf32, #tpu.memory_space<vmem>>, %arg6: memref<32x32xbf16, #tpu.memory_space<vmem>>, %arg7: memref<1x32xf32, #tpu.memory_space<vmem>>, %arg8: memref<2x32xf32, #tpu.memory_space<vmem>>, %arg9: memref<2x32xf32, #tpu.memory_space<vmem>>) attributes {dimension_semantics = [], scalar_prefetch = 0 : i64, scratch_operands = 0 : i64, tpu.core_type = #tpu.core_type<tc>} {
    %c0 = arith.constant 0 : index
    %c0_0 = arith.constant 0 : index
    %0 = vector.load %arg0[%c0, %c0_0] : memref<16x192xf32, #tpu.memory_space<vmem>>, vector<16x192xf32>
    %c0_1 = arith.constant 0 : index
    %c0_2 = arith.constant 0 : index
    %1 = vector.load %arg2[%c0_1, %c0_2] : memref<192x32xbf16, #tpu.memory_space<vmem>>, vector<192x32xbf16>
    %2 = arith.truncf %0 : vector<16x192xf32> to vector<16x192xbf16>
    %cst = arith.constant dense<0.000000e+00> : vector<16x32xf32>
    %3 = tpu.matmul %2, %1, %cst {dimension_numbers = #tpu.dot_dimension_numbers<[1], [0], [0], [1], [0, 0, 1, 1], [], []>} : vector<16x192xbf16>, vector<192x32xbf16>, vector<16x32xf32> -> vector<16x32xf32>
    %c0_3 = arith.constant 0 : index
    %c0_4 = arith.constant 0 : index
    %4 = vector.load %arg3[%c0_3, %c0_4] : memref<1x32xf32, #tpu.memory_space<vmem>>, vector<1x32xf32>
    %5 = vector.broadcast %4 : vector<1x32xf32> to vector<16x32xf32>
    %6 = arith.addf %3, %5 : vector<16x32xf32>
    %7 = tpu.iota {dimensions = array<i32: 0>} : vector<2x16xi32>
    %8 = tpu.iota {dimensions = array<i32: 1>} : vector<2x16xi32>
    %c8_i32 = arith.constant 8 : i32
    %9 = vector.broadcast %c8_i32 : i32 to vector<2x16xi32>
    %10 = arith.muli %7, %9 : vector<2x16xi32>
    %11 = arith.cmpi sge, %8, %10 : vector<2x16xi32>
    %c1_i32 = arith.constant 1 : i32
    %12 = vector.broadcast %c1_i32 : i32 to vector<2x16xi32>
    %13 = arith.addi %7, %12 : vector<2x16xi32>
    %c8_i32_5 = arith.constant 8 : i32
    %14 = vector.broadcast %c8_i32_5 : i32 to vector<2x16xi32>
    %15 = arith.muli %13, %14 : vector<2x16xi32>
    %16 = arith.cmpi slt, %8, %15 : vector<2x16xi32>
    %17 = arith.andi %11, %16 : vector<2x16xi1>
    %18 = arith.extui %17 : vector<2x16xi1> to vector<2x16xi32>
    %19 = arith.sitofp %18 : vector<2x16xi32> to vector<2x16xf32>
    %c0_6 = arith.constant 0 : index
    %c0_7 = arith.constant 0 : index
    %20 = vector.load %arg1[%c0_6, %c0_7] : memref<1x16xf32, #tpu.memory_space<vmem>>, vector<1x16xf32>
    %21 = vector.broadcast %20 : vector<1x16xf32> to vector<2x16xf32>
    %22 = arith.mulf %19, %21 : vector<2x16xf32>
    %cst_8 = arith.constant dense<0.000000e+00> : vector<2xf32>
    %23 = vector.multi_reduction <add>, %22, %cst_8 [1] : vector<2x16xf32> to vector<2xf32>
    %24 = vector.shape_cast %23 : vector<2xf32> to vector<2x1xf32>
    %cst_9 = arith.constant 1.000000e+00 : f32
    %25 = vector.broadcast %cst_9 : f32 to vector<2x1xf32>
    %26 = arith.maximumf %24, %25 : vector<2x1xf32>
    %27 = arith.truncf %22 : vector<2x16xf32> to vector<2x16xbf16>
    %28 = arith.truncf %6 : vector<16x32xf32> to vector<16x32xbf16>
    %cst_10 = arith.constant dense<0.000000e+00> : vector<2x32xf32>
    %29 = tpu.matmul %27, %28, %cst_10 {dimension_numbers = #tpu.dot_dimension_numbers<[1], [0], [0], [1], [0, 0, 1, 1], [], []>} : vector<2x16xbf16>, vector<16x32xbf16>, vector<2x32xf32> -> vector<2x32xf32>
    %30 = vector.broadcast %26 : vector<2x1xf32> to vector<2x32xf32>
    %31 = arith.divf %29, %30 : vector<2x32xf32>
    %c0_11 = arith.constant 0 : index
    %c0_12 = arith.constant 0 : index
    %32 = vector.load %arg8[%c0_11, %c0_12] : memref<2x32xf32, #tpu.memory_space<vmem>>, vector<2x32xf32>
    tpu.vector_store %arg8[%c0_11, %c0_12], %31 {strides = array<i32>} : memref<2x32xf32, #tpu.memory_space<vmem>>, vector<2x32xf32>,
    %c0_13 = arith.constant 0 : index
    %c0_14 = arith.constant 0 : index
    %33 = vector.load %arg4[%c0_13, %c0_14] : memref<32x32xbf16, #tpu.memory_space<vmem>>, vector<32x32xbf16>
    %34 = arith.truncf %31 : vector<2x32xf32> to vector<2x32xbf16>
    %cst_15 = arith.constant dense<0.000000e+00> : vector<2x32xf32>
    %35 = tpu.matmul %34, %33, %cst_15 {dimension_numbers = #tpu.dot_dimension_numbers<[1], [0], [0], [1], [0, 0, 1, 1], [], []>} : vector<2x32xbf16>, vector<32x32xbf16>, vector<2x32xf32> -> vector<2x32xf32>
    %c0_16 = arith.constant 0 : index
    %c0_17 = arith.constant 0 : index
    %36 = vector.load %arg5[%c0_16, %c0_17] : memref<1x32xf32, #tpu.memory_space<vmem>>, vector<1x32xf32>
    %37 = vector.broadcast %36 : vector<1x32xf32> to vector<2x32xf32>
    %38 = arith.addf %35, %37 : vector<2x32xf32>
    %cst_18 = arith.constant 0.000000e+00 : f32
    %39 = vector.broadcast %cst_18 : f32 to vector<2x32xf32>
    %40 = arith.maximumf %38, %39 : vector<2x32xf32>
    %c0_19 = arith.constant 0 : index
    %c0_20 = arith.constant 0 : index
    %41 = vector.load %arg6[%c0_19, %c0_20] : memref<32x32xbf16, #tpu.memory_space<vmem>>, vector<32x32xbf16>
    %42 = arith.truncf %40 : vector<2x32xf32> to vector<2x32xbf16>
    %cst_21 = arith.constant dense<0.000000e+00> : vector<2x32xf32>
    %43 = tpu.matmul %42, %41, %cst_21 {dimension_numbers = #tpu.dot_dimension_numbers<[1], [0], [0], [1], [0, 0, 1, 1], [], []>} : vector<2x32xbf16>, vector<32x32xbf16>, vector<2x32xf32> -> vector<2x32xf32>
    %c0_22 = arith.constant 0 : index
    %c0_23 = arith.constant 0 : index
    %44 = vector.load %arg7[%c0_22, %c0_23] : memref<1x32xf32, #tpu.memory_space<vmem>>, vector<1x32xf32>
    %45 = vector.broadcast %44 : vector<1x32xf32> to vector<2x32xf32>
    %46 = arith.addf %43, %45 : vector<2x32xf32>
    %47 = arith.mulf %46, %46 : vector<2x32xf32>
    %cst_24 = arith.constant dense<0.000000e+00> : vector<2xf32>
    %48 = vector.multi_reduction <add>, %47, %cst_24 [1] : vector<2x32xf32> to vector<2xf32>
    %49 = vector.shape_cast %48 : vector<2xf32> to vector<2x1xf32>
    %50 = math.sqrt %49 : vector<2x1xf32>
    %cst_25 = arith.constant 9.99999996E-13 : f32
    %51 = vector.broadcast %cst_25 : f32 to vector<2x1xf32>
    %52 = arith.maximumf %50, %51 : vector<2x1xf32>
    %53 = vector.broadcast %52 : vector<2x1xf32> to vector<2x32xf32>
    %54 = arith.divf %46, %53 : vector<2x32xf32>
    %c0_26 = arith.constant 0 : index
    %c0_27 = arith.constant 0 : index
    %55 = vector.load %arg9[%c0_26, %c0_27] : memref<2x32xf32, #tpu.memory_space<vmem>>, vector<2x32xf32>
    tpu.vector_store %arg9[%c0_26, %c0_27], %54 {strides = array<i32>} : memref<2x32xf32, #tpu.memory_space<vmem>>, vector<2x32xf32>,
    return
  }
}

module attributes {stable_mosaic.version = 11 : i64} {
  func.func @_encoder_kernel(%arg0: i32, %arg1: memref<1x16x32xbf16, #tpu.memory_space<vmem>>, %arg2: memref<1x1x16xbf16, #tpu.memory_space<vmem>>, %arg3: memref<1x32xf32, #tpu.memory_space<vmem>>, %arg4: memref<1x32xf32, #tpu.memory_space<vmem>>, %arg5: memref<2x32x96xbf16, #tpu.memory_space<vmem>>, %arg6: memref<2x1x96xf32, #tpu.memory_space<vmem>>, %arg7: memref<2x32x32xbf16, #tpu.memory_space<vmem>>, %arg8: memref<2x1x32xf32, #tpu.memory_space<vmem>>, %arg9: memref<2x1x32xf32, #tpu.memory_space<vmem>>, %arg10: memref<2x1x32xf32, #tpu.memory_space<vmem>>, %arg11: memref<2x32x64xbf16, #tpu.memory_space<vmem>>, %arg12: memref<2x1x64xf32, #tpu.memory_space<vmem>>, %arg13: memref<2x64x32xbf16, #tpu.memory_space<vmem>>, %arg14: memref<2x1x32xf32, #tpu.memory_space<vmem>>, %arg15: memref<2x1x32xf32, #tpu.memory_space<vmem>>, %arg16: memref<2x1x32xf32, #tpu.memory_space<vmem>>, %arg17: memref<32x32xbf16, #tpu.memory_space<vmem>>, %arg18: memref<1x32xf32, #tpu.memory_space<vmem>>, %arg19: memref<1x16x32xf32, #tpu.memory_space<vmem>>, %arg20: memref<1x1x32xf32, #tpu.memory_space<vmem>>) attributes {dimension_semantics = [#tpu.dimension_semantics<parallel>], iteration_bounds = array<i64: 2>, scalar_prefetch = 0 : i64, scratch_operands = 0 : i64, tpu.core_type = #tpu.core_type<tc>, window_params = [{transform_indices = @transform_0, window_bounds = array<i64: 1, 16, 32>}, {transform_indices = @transform_1, window_bounds = array<i64: 1, 1, 16>}, {pipeline_mode = #tpu.pipeline_mode<synchronous>, transform_indices = @transform_2, window_bounds = array<i64: 1, 32>}, {pipeline_mode = #tpu.pipeline_mode<synchronous>, transform_indices = @transform_3, window_bounds = array<i64: 1, 32>}, {pipeline_mode = #tpu.pipeline_mode<synchronous>, transform_indices = @transform_4, window_bounds = array<i64: 2, 32, 96>}, {pipeline_mode = #tpu.pipeline_mode<synchronous>, transform_indices = @transform_5, window_bounds = array<i64: 2, 1, 96>}, {pipeline_mode = #tpu.pipeline_mode<synchronous>, transform_indices = @transform_6, window_bounds = array<i64: 2, 32, 32>}, {pipeline_mode = #tpu.pipeline_mode<synchronous>, transform_indices = @transform_7, window_bounds = array<i64: 2, 1, 32>}, {pipeline_mode = #tpu.pipeline_mode<synchronous>, transform_indices = @transform_8, window_bounds = array<i64: 2, 1, 32>}, {pipeline_mode = #tpu.pipeline_mode<synchronous>, transform_indices = @transform_9, window_bounds = array<i64: 2, 1, 32>}, {pipeline_mode = #tpu.pipeline_mode<synchronous>, transform_indices = @transform_10, window_bounds = array<i64: 2, 32, 64>}, {pipeline_mode = #tpu.pipeline_mode<synchronous>, transform_indices = @transform_11, window_bounds = array<i64: 2, 1, 64>}, {pipeline_mode = #tpu.pipeline_mode<synchronous>, transform_indices = @transform_12, window_bounds = array<i64: 2, 64, 32>}, {pipeline_mode = #tpu.pipeline_mode<synchronous>, transform_indices = @transform_13, window_bounds = array<i64: 2, 1, 32>}, {pipeline_mode = #tpu.pipeline_mode<synchronous>, transform_indices = @transform_14, window_bounds = array<i64: 2, 1, 32>}, {pipeline_mode = #tpu.pipeline_mode<synchronous>, transform_indices = @transform_15, window_bounds = array<i64: 2, 1, 32>}, {pipeline_mode = #tpu.pipeline_mode<synchronous>, transform_indices = @transform_16, window_bounds = array<i64: 32, 32>}, {pipeline_mode = #tpu.pipeline_mode<synchronous>, transform_indices = @transform_17, window_bounds = array<i64: 1, 32>}, {transform_indices = @transform_18, window_bounds = array<i64: 1, 16, 32>}, {transform_indices = @transform_19, window_bounds = array<i64: 1, 1, 32>}]} {
    %c0 = arith.constant 0 : index
    %c0_0 = arith.constant 0 : index
    %c0_1 = arith.constant 0 : index
    %0 = vector.load %arg1[%c0, %c0_0, %c0_1] : memref<1x16x32xbf16, #tpu.memory_space<vmem>>, vector<1x16x32xbf16>
    %1 = arith.extf %0 : vector<1x16x32xbf16> to vector<1x16x32xf32>
    %c0_2 = arith.constant 0 : index
    %c0_3 = arith.constant 0 : index
    %2 = vector.load %arg3[%c0_2, %c0_3] : memref<1x32xf32, #tpu.memory_space<vmem>>, vector<1x32xf32>
    %c0_4 = arith.constant 0 : index
    %c0_5 = arith.constant 0 : index
    %3 = vector.load %arg4[%c0_4, %c0_5] : memref<1x32xf32, #tpu.memory_space<vmem>>, vector<1x32xf32>
    %cst = arith.constant dense<0.000000e+00> : vector<1x16xf32>
    %4 = vector.multi_reduction <add>, %1, %cst [2] : vector<1x16x32xf32> to vector<1x16xf32>
    %5 = vector.shape_cast %4 : vector<1x16xf32> to vector<1x16x1xf32>
    %cst_6 = arith.constant 3.200000e+01 : f32
    %6 = vector.broadcast %cst_6 : f32 to vector<1x16x1xf32>
    %7 = arith.divf %5, %6 : vector<1x16x1xf32>
    %8 = vector.broadcast %7 : vector<1x16x1xf32> to vector<1x16x32xf32>
    %9 = arith.subf %1, %8 : vector<1x16x32xf32>
    %10 = arith.mulf %9, %9 : vector<1x16x32xf32>
    %cst_7 = arith.constant dense<0.000000e+00> : vector<1x16xf32>
    %11 = vector.multi_reduction <add>, %10, %cst_7 [2] : vector<1x16x32xf32> to vector<1x16xf32>
    %12 = vector.shape_cast %11 : vector<1x16xf32> to vector<1x16x1xf32>
    %cst_8 = arith.constant 3.200000e+01 : f32
    %13 = vector.broadcast %cst_8 : f32 to vector<1x16x1xf32>
    %14 = arith.divf %12, %13 : vector<1x16x1xf32>
    %15 = vector.broadcast %7 : vector<1x16x1xf32> to vector<1x16x32xf32>
    %16 = arith.subf %1, %15 : vector<1x16x32xf32>
    %cst_9 = arith.constant 9.99999996E-13 : f32
    %17 = vector.broadcast %cst_9 : f32 to vector<1x16x1xf32>
    %18 = arith.addf %14, %17 : vector<1x16x1xf32>
    %19 = math.rsqrt %18 : vector<1x16x1xf32>
    %20 = vector.broadcast %19 : vector<1x16x1xf32> to vector<1x16x32xf32>
    %21 = arith.mulf %16, %20 : vector<1x16x32xf32>
    %22 = vector.shape_cast %2 : vector<1x32xf32> to vector<1x1x32xf32>
    %23 = vector.broadcast %22 : vector<1x1x32xf32> to vector<1x16x32xf32>
    %24 = arith.mulf %21, %23 : vector<1x16x32xf32>
    %25 = vector.shape_cast %3 : vector<1x32xf32> to vector<1x1x32xf32>
    %26 = vector.broadcast %25 : vector<1x1x32xf32> to vector<1x16x32xf32>
    %27 = arith.addf %24, %26 : vector<1x16x32xf32>
    %c0_10 = arith.constant 0 : index
    %c0_11 = arith.constant 0 : index
    %c0_12 = arith.constant 0 : index
    %28 = vector.load %arg2[%c0_10, %c0_11, %c0_12] : memref<1x1x16xbf16, #tpu.memory_space<vmem>>, vector<1x1x16xbf16>
    %29 = arith.extf %28 : vector<1x1x16xbf16> to vector<1x1x16xf32>
    %cst_13 = arith.constant 1.000000e+00 : f32
    %30 = vector.broadcast %cst_13 : f32 to vector<1x1x16xf32>
    %31 = arith.subf %30, %29 : vector<1x1x16xf32>
    %cst_14 = arith.constant -1.000000e+04 : f32
    %32 = vector.broadcast %cst_14 : f32 to vector<1x1x16xf32>
    %33 = arith.mulf %31, %32 : vector<1x1x16xf32>
    %34 = vector.shape_cast %33 : vector<1x1x16xf32> to vector<1x1x16xf32>
    %35 = vector.broadcast %34 : vector<1x1x16xf32> to vector<1x16x16xf32>
    %36 = arith.truncf %27 : vector<1x16x32xf32> to vector<1x16x32xbf16>
    %37 = vector.shape_cast %36 : vector<1x16x32xbf16> to vector<16x32xbf16>
    %c0_15 = arith.constant 0 : index
    %c0_16 = arith.constant 0 : index
    %c0_17 = arith.constant 0 : index
    %38 = vector.load %arg5[%c0_15, %c0_16, %c0_17] : memref<2x32x96xbf16, #tpu.memory_space<vmem>>, vector<1x32x96xbf16>
    %39 = vector.shape_cast %38 : vector<1x32x96xbf16> to vector<32x96xbf16>
    %cst_18 = arith.constant dense<0.000000e+00> : vector<16x96xf32>
    %40 = tpu.matmul %37, %39, %cst_18 {dimension_numbers = #tpu.dot_dimension_numbers<[1], [0], [0], [1], [0, 0, 1, 1], [], []>} : vector<16x32xbf16>, vector<32x96xbf16>, vector<16x96xf32> -> vector<16x96xf32>
    %c0_19 = arith.constant 0 : index
    %c0_20 = arith.constant 0 : index
    %c0_21 = arith.constant 0 : index
    %41 = vector.load %arg6[%c0_19, %c0_20, %c0_21] : memref<2x1x96xf32, #tpu.memory_space<vmem>>, vector<1x1x96xf32>
    %42 = vector.shape_cast %41 : vector<1x1x96xf32> to vector<1x96xf32>
    %43 = vector.broadcast %42 : vector<1x96xf32> to vector<16x96xf32>
    %44 = arith.addf %40, %43 : vector<16x96xf32>
    %45 = vector.shape_cast %44 : vector<16x96xf32> to vector<1x16x96xf32>
    %46 = arith.truncf %45 : vector<1x16x96xf32> to vector<1x16x96xbf16>
    %47 = vector.extract_strided_slice %46 {offsets = [0, 0, 0], sizes = [1, 16, 8], strides = [1, 1, 1]} : vector<1x16x96xbf16> to vector<1x16x8xbf16>
    %48 = vector.extract_strided_slice %46 {offsets = [0, 0, 32], sizes = [1, 16, 8], strides = [1, 1, 1]} : vector<1x16x96xbf16> to vector<1x16x8xbf16>
    %49 = vector.extract_strided_slice %46 {offsets = [0, 0, 64], sizes = [1, 16, 8], strides = [1, 1, 1]} : vector<1x16x96xbf16> to vector<1x16x8xbf16>
    "tpu.trace_start"() <{level = 10 : i32, message = "rqd,rkd->rqk"}> : () -> ()
    %cst_22 = arith.constant dense<0.000000e+00> : vector<1x16x16xf32>
    %50 = tpu.matmul %47, %48, %cst_22 {dimension_numbers = #tpu.dot_dimension_numbers<[2], [2], [1], [1], [0, 0, 0, 1, 1, 1], [0], [0]>} : vector<1x16x8xbf16>, vector<1x16x8xbf16>, vector<1x16x16xf32> -> vector<1x16x16xf32>
    "tpu.trace_stop"() : () -> ()
    %51 = arith.addf %50, %35 : vector<1x16x16xf32>
    %cst_23 = arith.constant dense<0xFF800000> : vector<1x16xf32>
    %52 = vector.multi_reduction <maximumf>, %51, %cst_23 [2] : vector<1x16x16xf32> to vector<1x16xf32>
    %53 = vector.shape_cast %52 : vector<1x16xf32> to vector<1x16x1xf32>
    %54 = vector.broadcast %53 : vector<1x16x1xf32> to vector<1x16x16xf32>
    %55 = arith.subf %51, %54 : vector<1x16x16xf32>
    %56 = math.exp %55 : vector<1x16x16xf32>
    %cst_24 = arith.constant dense<0.000000e+00> : vector<1x16xf32>
    %57 = vector.multi_reduction <add>, %56, %cst_24 [2] : vector<1x16x16xf32> to vector<1x16xf32>
    %58 = vector.shape_cast %57 : vector<1x16xf32> to vector<1x16x1xf32>
    %59 = vector.broadcast %58 : vector<1x16x1xf32> to vector<1x16x16xf32>
    %60 = arith.divf %56, %59 : vector<1x16x16xf32>
    %61 = arith.truncf %60 : vector<1x16x16xf32> to vector<1x16x16xbf16>
    "tpu.trace_start"() <{level = 10 : i32, message = "rqk,rkd->rqd"}> : () -> ()
    %cst_25 = arith.constant dense<0.000000e+00> : vector<1x16x8xf32>
    %62 = tpu.matmul %61, %49, %cst_25 {dimension_numbers = #tpu.dot_dimension_numbers<[2], [1], [1], [2], [0, 0, 0, 1, 1, 2], [0], [0]>} : vector<1x16x16xbf16>, vector<1x16x8xbf16>, vector<1x16x8xf32> -> vector<1x16x8xf32>
    "tpu.trace_stop"() : () -> ()
    %63 = vector.extract_strided_slice %46 {offsets = [0, 0, 8], sizes = [1, 16, 8], strides = [1, 1, 1]} : vector<1x16x96xbf16> to vector<1x16x8xbf16>
    %64 = vector.extract_strided_slice %46 {offsets = [0, 0, 40], sizes = [1, 16, 8], strides = [1, 1, 1]} : vector<1x16x96xbf16> to vector<1x16x8xbf16>
    %65 = vector.extract_strided_slice %46 {offsets = [0, 0, 72], sizes = [1, 16, 8], strides = [1, 1, 1]} : vector<1x16x96xbf16> to vector<1x16x8xbf16>
    "tpu.trace_start"() <{level = 10 : i32, message = "rqd,rkd->rqk"}> : () -> ()
    %cst_26 = arith.constant dense<0.000000e+00> : vector<1x16x16xf32>
    %66 = tpu.matmul %63, %64, %cst_26 {dimension_numbers = #tpu.dot_dimension_numbers<[2], [2], [1], [1], [0, 0, 0, 1, 1, 1], [0], [0]>} : vector<1x16x8xbf16>, vector<1x16x8xbf16>, vector<1x16x16xf32> -> vector<1x16x16xf32>
    "tpu.trace_stop"() : () -> ()
    %67 = arith.addf %66, %35 : vector<1x16x16xf32>
    %cst_27 = arith.constant dense<0xFF800000> : vector<1x16xf32>
    %68 = vector.multi_reduction <maximumf>, %67, %cst_27 [2] : vector<1x16x16xf32> to vector<1x16xf32>
    %69 = vector.shape_cast %68 : vector<1x16xf32> to vector<1x16x1xf32>
    %70 = vector.broadcast %69 : vector<1x16x1xf32> to vector<1x16x16xf32>
    %71 = arith.subf %67, %70 : vector<1x16x16xf32>
    %72 = math.exp %71 : vector<1x16x16xf32>
    %cst_28 = arith.constant dense<0.000000e+00> : vector<1x16xf32>
    %73 = vector.multi_reduction <add>, %72, %cst_28 [2] : vector<1x16x16xf32> to vector<1x16xf32>
    %74 = vector.shape_cast %73 : vector<1x16xf32> to vector<1x16x1xf32>
    %75 = vector.broadcast %74 : vector<1x16x1xf32> to vector<1x16x16xf32>
    %76 = arith.divf %72, %75 : vector<1x16x16xf32>
    %77 = arith.truncf %76 : vector<1x16x16xf32> to vector<1x16x16xbf16>
    "tpu.trace_start"() <{level = 10 : i32, message = "rqk,rkd->rqd"}> : () -> ()
    %cst_29 = arith.constant dense<0.000000e+00> : vector<1x16x8xf32>
    %78 = tpu.matmul %77, %65, %cst_29 {dimension_numbers = #tpu.dot_dimension_numbers<[2], [1], [1], [2], [0, 0, 0, 1, 1, 2], [0], [0]>} : vector<1x16x16xbf16>, vector<1x16x8xbf16>, vector<1x16x8xf32> -> vector<1x16x8xf32>
    "tpu.trace_stop"() : () -> ()
    %79 = vector.extract_strided_slice %46 {offsets = [0, 0, 16], sizes = [1, 16, 8], strides = [1, 1, 1]} : vector<1x16x96xbf16> to vector<1x16x8xbf16>
    %80 = vector.extract_strided_slice %46 {offsets = [0, 0, 48], sizes = [1, 16, 8], strides = [1, 1, 1]} : vector<1x16x96xbf16> to vector<1x16x8xbf16>
    %81 = vector.extract_strided_slice %46 {offsets = [0, 0, 80], sizes = [1, 16, 8], strides = [1, 1, 1]} : vector<1x16x96xbf16> to vector<1x16x8xbf16>
    "tpu.trace_start"() <{level = 10 : i32, message = "rqd,rkd->rqk"}> : () -> ()
    %cst_30 = arith.constant dense<0.000000e+00> : vector<1x16x16xf32>
    %82 = tpu.matmul %79, %80, %cst_30 {dimension_numbers = #tpu.dot_dimension_numbers<[2], [2], [1], [1], [0, 0, 0, 1, 1, 1], [0], [0]>} : vector<1x16x8xbf16>, vector<1x16x8xbf16>, vector<1x16x16xf32> -> vector<1x16x16xf32>
    "tpu.trace_stop"() : () -> ()
    %83 = arith.addf %82, %35 : vector<1x16x16xf32>
    %cst_31 = arith.constant dense<0xFF800000> : vector<1x16xf32>
    %84 = vector.multi_reduction <maximumf>, %83, %cst_31 [2] : vector<1x16x16xf32> to vector<1x16xf32>
    %85 = vector.shape_cast %84 : vector<1x16xf32> to vector<1x16x1xf32>
    %86 = vector.broadcast %85 : vector<1x16x1xf32> to vector<1x16x16xf32>
    %87 = arith.subf %83, %86 : vector<1x16x16xf32>
    %88 = math.exp %87 : vector<1x16x16xf32>
    %cst_32 = arith.constant dense<0.000000e+00> : vector<1x16xf32>
    %89 = vector.multi_reduction <add>, %88, %cst_32 [2] : vector<1x16x16xf32> to vector<1x16xf32>
    %90 = vector.shape_cast %89 : vector<1x16xf32> to vector<1x16x1xf32>
    %91 = vector.broadcast %90 : vector<1x16x1xf32> to vector<1x16x16xf32>
    %92 = arith.divf %88, %91 : vector<1x16x16xf32>
    %93 = arith.truncf %92 : vector<1x16x16xf32> to vector<1x16x16xbf16>
    "tpu.trace_start"() <{level = 10 : i32, message = "rqk,rkd->rqd"}> : () -> ()
    %cst_33 = arith.constant dense<0.000000e+00> : vector<1x16x8xf32>
    %94 = tpu.matmul %93, %81, %cst_33 {dimension_numbers = #tpu.dot_dimension_numbers<[2], [1], [1], [2], [0, 0, 0, 1, 1, 2], [0], [0]>} : vector<1x16x16xbf16>, vector<1x16x8xbf16>, vector<1x16x8xf32> -> vector<1x16x8xf32>
    "tpu.trace_stop"() : () -> ()
    %95 = vector.extract_strided_slice %46 {offsets = [0, 0, 24], sizes = [1, 16, 8], strides = [1, 1, 1]} : vector<1x16x96xbf16> to vector<1x16x8xbf16>
    %96 = vector.extract_strided_slice %46 {offsets = [0, 0, 56], sizes = [1, 16, 8], strides = [1, 1, 1]} : vector<1x16x96xbf16> to vector<1x16x8xbf16>
    %97 = vector.extract_strided_slice %46 {offsets = [0, 0, 88], sizes = [1, 16, 8], strides = [1, 1, 1]} : vector<1x16x96xbf16> to vector<1x16x8xbf16>
    "tpu.trace_start"() <{level = 10 : i32, message = "rqd,rkd->rqk"}> : () -> ()
    %cst_34 = arith.constant dense<0.000000e+00> : vector<1x16x16xf32>
    %98 = tpu.matmul %95, %96, %cst_34 {dimension_numbers = #tpu.dot_dimension_numbers<[2], [2], [1], [1], [0, 0, 0, 1, 1, 1], [0], [0]>} : vector<1x16x8xbf16>, vector<1x16x8xbf16>, vector<1x16x16xf32> -> vector<1x16x16xf32>
    "tpu.trace_stop"() : () -> ()
    %99 = arith.addf %98, %35 : vector<1x16x16xf32>
    %cst_35 = arith.constant dense<0xFF800000> : vector<1x16xf32>
    %100 = vector.multi_reduction <maximumf>, %99, %cst_35 [2] : vector<1x16x16xf32> to vector<1x16xf32>
    %101 = vector.shape_cast %100 : vector<1x16xf32> to vector<1x16x1xf32>
    %102 = vector.broadcast %101 : vector<1x16x1xf32> to vector<1x16x16xf32>
    %103 = arith.subf %99, %102 : vector<1x16x16xf32>
    %104 = math.exp %103 : vector<1x16x16xf32>
    %cst_36 = arith.constant dense<0.000000e+00> : vector<1x16xf32>
    %105 = vector.multi_reduction <add>, %104, %cst_36 [2] : vector<1x16x16xf32> to vector<1x16xf32>
    %106 = vector.shape_cast %105 : vector<1x16xf32> to vector<1x16x1xf32>
    %107 = vector.broadcast %106 : vector<1x16x1xf32> to vector<1x16x16xf32>
    %108 = arith.divf %104, %107 : vector<1x16x16xf32>
    %109 = arith.truncf %108 : vector<1x16x16xf32> to vector<1x16x16xbf16>
    "tpu.trace_start"() <{level = 10 : i32, message = "rqk,rkd->rqd"}> : () -> ()
    %cst_37 = arith.constant dense<0.000000e+00> : vector<1x16x8xf32>
    %110 = tpu.matmul %109, %97, %cst_37 {dimension_numbers = #tpu.dot_dimension_numbers<[2], [1], [1], [2], [0, 0, 0, 1, 1, 2], [0], [0]>} : vector<1x16x16xbf16>, vector<1x16x8xbf16>, vector<1x16x8xf32> -> vector<1x16x8xf32>
    "tpu.trace_stop"() : () -> ()
    %111 = tpu.concatenate %62, %78, %94, %110 in 2 : vector<1x16x8xf32>, vector<1x16x8xf32>, vector<1x16x8xf32>, vector<1x16x8xf32> -> vector<1x16x32xf32>
    %112 = arith.truncf %111 : vector<1x16x32xf32> to vector<1x16x32xbf16>
    %113 = vector.shape_cast %112 : vector<1x16x32xbf16> to vector<16x32xbf16>
    %c0_38 = arith.constant 0 : index
    %c0_39 = arith.constant 0 : index
    %c0_40 = arith.constant 0 : index
    %114 = vector.load %arg7[%c0_38, %c0_39, %c0_40] : memref<2x32x32xbf16, #tpu.memory_space<vmem>>, vector<1x32x32xbf16>
    %115 = vector.shape_cast %114 : vector<1x32x32xbf16> to vector<32x32xbf16>
    %cst_41 = arith.constant dense<0.000000e+00> : vector<16x32xf32>
    %116 = tpu.matmul %113, %115, %cst_41 {dimension_numbers = #tpu.dot_dimension_numbers<[1], [0], [0], [1], [0, 0, 1, 1], [], []>} : vector<16x32xbf16>, vector<32x32xbf16>, vector<16x32xf32> -> vector<16x32xf32>
    %117 = vector.shape_cast %116 : vector<16x32xf32> to vector<1x16x32xf32>
    %c0_42 = arith.constant 0 : index
    %c0_43 = arith.constant 0 : index
    %c0_44 = arith.constant 0 : index
    %118 = vector.load %arg8[%c0_42, %c0_43, %c0_44] : memref<2x1x32xf32, #tpu.memory_space<vmem>>, vector<1x1x32xf32>
    %119 = vector.shape_cast %118 : vector<1x1x32xf32> to vector<1x32xf32>
    %120 = vector.shape_cast %119 : vector<1x32xf32> to vector<1x1x32xf32>
    %121 = vector.broadcast %120 : vector<1x1x32xf32> to vector<1x16x32xf32>
    %122 = arith.addf %117, %121 : vector<1x16x32xf32>
    %123 = arith.addf %122, %27 : vector<1x16x32xf32>
    %c0_45 = arith.constant 0 : index
    %c0_46 = arith.constant 0 : index
    %c0_47 = arith.constant 0 : index
    %124 = vector.load %arg9[%c0_45, %c0_46, %c0_47] : memref<2x1x32xf32, #tpu.memory_space<vmem>>, vector<1x1x32xf32>
    %125 = vector.shape_cast %124 : vector<1x1x32xf32> to vector<1x32xf32>
    %c0_48 = arith.constant 0 : index
    %c0_49 = arith.constant 0 : index
    %c0_50 = arith.constant 0 : index
    %126 = vector.load %arg10[%c0_48, %c0_49, %c0_50] : memref<2x1x32xf32, #tpu.memory_space<vmem>>, vector<1x1x32xf32>
    %127 = vector.shape_cast %126 : vector<1x1x32xf32> to vector<1x32xf32>
    %cst_51 = arith.constant dense<0.000000e+00> : vector<1x16xf32>
    %128 = vector.multi_reduction <add>, %123, %cst_51 [2] : vector<1x16x32xf32> to vector<1x16xf32>
    %129 = vector.shape_cast %128 : vector<1x16xf32> to vector<1x16x1xf32>
    %cst_52 = arith.constant 3.200000e+01 : f32
    %130 = vector.broadcast %cst_52 : f32 to vector<1x16x1xf32>
    %131 = arith.divf %129, %130 : vector<1x16x1xf32>
    %132 = vector.broadcast %131 : vector<1x16x1xf32> to vector<1x16x32xf32>
    %133 = arith.subf %123, %132 : vector<1x16x32xf32>
    %134 = arith.mulf %133, %133 : vector<1x16x32xf32>
    %cst_53 = arith.constant dense<0.000000e+00> : vector<1x16xf32>
    %135 = vector.multi_reduction <add>, %134, %cst_53 [2] : vector<1x16x32xf32> to vector<1x16xf32>
    %136 = vector.shape_cast %135 : vector<1x16xf32> to vector<1x16x1xf32>
    %cst_54 = arith.constant 3.200000e+01 : f32
    %137 = vector.broadcast %cst_54 : f32 to vector<1x16x1xf32>
    %138 = arith.divf %136, %137 : vector<1x16x1xf32>
    %139 = vector.broadcast %131 : vector<1x16x1xf32> to vector<1x16x32xf32>
    %140 = arith.subf %123, %139 : vector<1x16x32xf32>
    %cst_55 = arith.constant 9.99999996E-13 : f32
    %141 = vector.broadcast %cst_55 : f32 to vector<1x16x1xf32>
    %142 = arith.addf %138, %141 : vector<1x16x1xf32>
    %143 = math.rsqrt %142 : vector<1x16x1xf32>
    %144 = vector.broadcast %143 : vector<1x16x1xf32> to vector<1x16x32xf32>
    %145 = arith.mulf %140, %144 : vector<1x16x32xf32>
    %146 = vector.shape_cast %125 : vector<1x32xf32> to vector<1x1x32xf32>
    %147 = vector.broadcast %146 : vector<1x1x32xf32> to vector<1x16x32xf32>
    %148 = arith.mulf %145, %147 : vector<1x16x32xf32>
    %149 = vector.shape_cast %127 : vector<1x32xf32> to vector<1x1x32xf32>
    %150 = vector.broadcast %149 : vector<1x1x32xf32> to vector<1x16x32xf32>
    %151 = arith.addf %148, %150 : vector<1x16x32xf32>
    %152 = arith.truncf %151 : vector<1x16x32xf32> to vector<1x16x32xbf16>
    %153 = vector.shape_cast %152 : vector<1x16x32xbf16> to vector<16x32xbf16>
    %c0_56 = arith.constant 0 : index
    %c0_57 = arith.constant 0 : index
    %c0_58 = arith.constant 0 : index
    %154 = vector.load %arg11[%c0_56, %c0_57, %c0_58] : memref<2x32x64xbf16, #tpu.memory_space<vmem>>, vector<1x32x64xbf16>
    %155 = vector.shape_cast %154 : vector<1x32x64xbf16> to vector<32x64xbf16>
    %cst_59 = arith.constant dense<0.000000e+00> : vector<16x64xf32>
    %156 = tpu.matmul %153, %155, %cst_59 {dimension_numbers = #tpu.dot_dimension_numbers<[1], [0], [0], [1], [0, 0, 1, 1], [], []>} : vector<16x32xbf16>, vector<32x64xbf16>, vector<16x64xf32> -> vector<16x64xf32>
    %c0_60 = arith.constant 0 : index
    %c0_61 = arith.constant 0 : index
    %c0_62 = arith.constant 0 : index
    %157 = vector.load %arg12[%c0_60, %c0_61, %c0_62] : memref<2x1x64xf32, #tpu.memory_space<vmem>>, vector<1x1x64xf32>
    %158 = vector.shape_cast %157 : vector<1x1x64xf32> to vector<1x64xf32>
    %159 = vector.broadcast %158 : vector<1x64xf32> to vector<16x64xf32>
    %160 = arith.addf %156, %159 : vector<16x64xf32>
    %161 = arith.mulf %160, %160 : vector<16x64xf32>
    %162 = arith.mulf %160, %161 : vector<16x64xf32>
    %cst_63 = arith.constant 4.471500e-02 : f32
    %163 = vector.broadcast %cst_63 : f32 to vector<16x64xf32>
    %164 = arith.mulf %163, %162 : vector<16x64xf32>
    %165 = arith.addf %160, %164 : vector<16x64xf32>
    %cst_64 = arith.constant 0.797884583 : f32
    %166 = vector.broadcast %cst_64 : f32 to vector<16x64xf32>
    %167 = arith.mulf %166, %165 : vector<16x64xf32>
    %168 = math.tanh %167 : vector<16x64xf32>
    %cst_65 = arith.constant 1.000000e+00 : f32
    %169 = vector.broadcast %cst_65 : f32 to vector<16x64xf32>
    %170 = arith.addf %169, %168 : vector<16x64xf32>
    %cst_66 = arith.constant 5.000000e-01 : f32
    %171 = vector.broadcast %cst_66 : f32 to vector<16x64xf32>
    %172 = arith.mulf %171, %170 : vector<16x64xf32>
    %173 = arith.mulf %160, %172 : vector<16x64xf32>
    %174 = arith.truncf %173 : vector<16x64xf32> to vector<16x64xbf16>
    %c0_67 = arith.constant 0 : index
    %c0_68 = arith.constant 0 : index
    %c0_69 = arith.constant 0 : index
    %175 = vector.load %arg13[%c0_67, %c0_68, %c0_69] : memref<2x64x32xbf16, #tpu.memory_space<vmem>>, vector<1x64x32xbf16>
    %176 = vector.shape_cast %175 : vector<1x64x32xbf16> to vector<64x32xbf16>
    %cst_70 = arith.constant dense<0.000000e+00> : vector<16x32xf32>
    %177 = tpu.matmul %174, %176, %cst_70 {dimension_numbers = #tpu.dot_dimension_numbers<[1], [0], [0], [1], [0, 0, 1, 1], [], []>} : vector<16x64xbf16>, vector<64x32xbf16>, vector<16x32xf32> -> vector<16x32xf32>
    %178 = vector.shape_cast %177 : vector<16x32xf32> to vector<1x16x32xf32>
    %c0_71 = arith.constant 0 : index
    %c0_72 = arith.constant 0 : index
    %c0_73 = arith.constant 0 : index
    %179 = vector.load %arg14[%c0_71, %c0_72, %c0_73] : memref<2x1x32xf32, #tpu.memory_space<vmem>>, vector<1x1x32xf32>
    %180 = vector.shape_cast %179 : vector<1x1x32xf32> to vector<1x32xf32>
    %181 = vector.shape_cast %180 : vector<1x32xf32> to vector<1x1x32xf32>
    %182 = vector.broadcast %181 : vector<1x1x32xf32> to vector<1x16x32xf32>
    %183 = arith.addf %178, %182 : vector<1x16x32xf32>
    %184 = arith.addf %183, %151 : vector<1x16x32xf32>
    %c0_74 = arith.constant 0 : index
    %c0_75 = arith.constant 0 : index
    %c0_76 = arith.constant 0 : index
    %185 = vector.load %arg15[%c0_74, %c0_75, %c0_76] : memref<2x1x32xf32, #tpu.memory_space<vmem>>, vector<1x1x32xf32>
    %186 = vector.shape_cast %185 : vector<1x1x32xf32> to vector<1x32xf32>
    %c0_77 = arith.constant 0 : index
    %c0_78 = arith.constant 0 : index
    %c0_79 = arith.constant 0 : index
    %187 = vector.load %arg16[%c0_77, %c0_78, %c0_79] : memref<2x1x32xf32, #tpu.memory_space<vmem>>, vector<1x1x32xf32>
    %188 = vector.shape_cast %187 : vector<1x1x32xf32> to vector<1x32xf32>
    %cst_80 = arith.constant dense<0.000000e+00> : vector<1x16xf32>
    %189 = vector.multi_reduction <add>, %184, %cst_80 [2] : vector<1x16x32xf32> to vector<1x16xf32>
    %190 = vector.shape_cast %189 : vector<1x16xf32> to vector<1x16x1xf32>
    %cst_81 = arith.constant 3.200000e+01 : f32
    %191 = vector.broadcast %cst_81 : f32 to vector<1x16x1xf32>
    %192 = arith.divf %190, %191 : vector<1x16x1xf32>
    %193 = vector.broadcast %192 : vector<1x16x1xf32> to vector<1x16x32xf32>
    %194 = arith.subf %184, %193 : vector<1x16x32xf32>
    %195 = arith.mulf %194, %194 : vector<1x16x32xf32>
    %cst_82 = arith.constant dense<0.000000e+00> : vector<1x16xf32>
    %196 = vector.multi_reduction <add>, %195, %cst_82 [2] : vector<1x16x32xf32> to vector<1x16xf32>
    %197 = vector.shape_cast %196 : vector<1x16xf32> to vector<1x16x1xf32>
    %cst_83 = arith.constant 3.200000e+01 : f32
    %198 = vector.broadcast %cst_83 : f32 to vector<1x16x1xf32>
    %199 = arith.divf %197, %198 : vector<1x16x1xf32>
    %200 = vector.broadcast %192 : vector<1x16x1xf32> to vector<1x16x32xf32>
    %201 = arith.subf %184, %200 : vector<1x16x32xf32>
    %cst_84 = arith.constant 9.99999996E-13 : f32
    %202 = vector.broadcast %cst_84 : f32 to vector<1x16x1xf32>
    %203 = arith.addf %199, %202 : vector<1x16x1xf32>
    %204 = math.rsqrt %203 : vector<1x16x1xf32>
    %205 = vector.broadcast %204 : vector<1x16x1xf32> to vector<1x16x32xf32>
    %206 = arith.mulf %201, %205 : vector<1x16x32xf32>
    %207 = vector.shape_cast %186 : vector<1x32xf32> to vector<1x1x32xf32>
    %208 = vector.broadcast %207 : vector<1x1x32xf32> to vector<1x16x32xf32>
    %209 = arith.mulf %206, %208 : vector<1x16x32xf32>
    %210 = vector.shape_cast %188 : vector<1x32xf32> to vector<1x1x32xf32>
    %211 = vector.broadcast %210 : vector<1x1x32xf32> to vector<1x16x32xf32>
    %212 = arith.addf %209, %211 : vector<1x16x32xf32>
    %213 = arith.truncf %212 : vector<1x16x32xf32> to vector<1x16x32xbf16>
    %214 = vector.shape_cast %213 : vector<1x16x32xbf16> to vector<16x32xbf16>
    %c1 = arith.constant 1 : index
    %c0_85 = arith.constant 0 : index
    %c0_86 = arith.constant 0 : index
    %215 = vector.load %arg5[%c1, %c0_85, %c0_86] : memref<2x32x96xbf16, #tpu.memory_space<vmem>>, vector<1x32x96xbf16>
    %216 = vector.shape_cast %215 : vector<1x32x96xbf16> to vector<32x96xbf16>
    %cst_87 = arith.constant dense<0.000000e+00> : vector<16x96xf32>
    %217 = tpu.matmul %214, %216, %cst_87 {dimension_numbers = #tpu.dot_dimension_numbers<[1], [0], [0], [1], [0, 0, 1, 1], [], []>} : vector<16x32xbf16>, vector<32x96xbf16>, vector<16x96xf32> -> vector<16x96xf32>
    %c1_88 = arith.constant 1 : index
    %c0_89 = arith.constant 0 : index
    %c0_90 = arith.constant 0 : index
    %218 = vector.load %arg6[%c1_88, %c0_89, %c0_90] : memref<2x1x96xf32, #tpu.memory_space<vmem>>, vector<1x1x96xf32>
    %219 = vector.shape_cast %218 : vector<1x1x96xf32> to vector<1x96xf32>
    %220 = vector.broadcast %219 : vector<1x96xf32> to vector<16x96xf32>
    %221 = arith.addf %217, %220 : vector<16x96xf32>
    %222 = vector.shape_cast %221 : vector<16x96xf32> to vector<1x16x96xf32>
    %223 = arith.truncf %222 : vector<1x16x96xf32> to vector<1x16x96xbf16>
    %224 = vector.extract_strided_slice %223 {offsets = [0, 0, 0], sizes = [1, 16, 8], strides = [1, 1, 1]} : vector<1x16x96xbf16> to vector<1x16x8xbf16>
    %225 = vector.extract_strided_slice %223 {offsets = [0, 0, 32], sizes = [1, 16, 8], strides = [1, 1, 1]} : vector<1x16x96xbf16> to vector<1x16x8xbf16>
    %226 = vector.extract_strided_slice %223 {offsets = [0, 0, 64], sizes = [1, 16, 8], strides = [1, 1, 1]} : vector<1x16x96xbf16> to vector<1x16x8xbf16>
    "tpu.trace_start"() <{level = 10 : i32, message = "rqd,rkd->rqk"}> : () -> ()
    %cst_91 = arith.constant dense<0.000000e+00> : vector<1x16x16xf32>
    %227 = tpu.matmul %224, %225, %cst_91 {dimension_numbers = #tpu.dot_dimension_numbers<[2], [2], [1], [1], [0, 0, 0, 1, 1, 1], [0], [0]>} : vector<1x16x8xbf16>, vector<1x16x8xbf16>, vector<1x16x16xf32> -> vector<1x16x16xf32>
    "tpu.trace_stop"() : () -> ()
    %228 = arith.addf %227, %35 : vector<1x16x16xf32>
    %cst_92 = arith.constant dense<0xFF800000> : vector<1x16xf32>
    %229 = vector.multi_reduction <maximumf>, %228, %cst_92 [2] : vector<1x16x16xf32> to vector<1x16xf32>
    %230 = vector.shape_cast %229 : vector<1x16xf32> to vector<1x16x1xf32>
    %231 = vector.broadcast %230 : vector<1x16x1xf32> to vector<1x16x16xf32>
    %232 = arith.subf %228, %231 : vector<1x16x16xf32>
    %233 = math.exp %232 : vector<1x16x16xf32>
    %cst_93 = arith.constant dense<0.000000e+00> : vector<1x16xf32>
    %234 = vector.multi_reduction <add>, %233, %cst_93 [2] : vector<1x16x16xf32> to vector<1x16xf32>
    %235 = vector.shape_cast %234 : vector<1x16xf32> to vector<1x16x1xf32>
    %236 = vector.broadcast %235 : vector<1x16x1xf32> to vector<1x16x16xf32>
    %237 = arith.divf %233, %236 : vector<1x16x16xf32>
    %238 = arith.truncf %237 : vector<1x16x16xf32> to vector<1x16x16xbf16>
    "tpu.trace_start"() <{level = 10 : i32, message = "rqk,rkd->rqd"}> : () -> ()
    %cst_94 = arith.constant dense<0.000000e+00> : vector<1x16x8xf32>
    %239 = tpu.matmul %238, %226, %cst_94 {dimension_numbers = #tpu.dot_dimension_numbers<[2], [1], [1], [2], [0, 0, 0, 1, 1, 2], [0], [0]>} : vector<1x16x16xbf16>, vector<1x16x8xbf16>, vector<1x16x8xf32> -> vector<1x16x8xf32>
    "tpu.trace_stop"() : () -> ()
    %240 = vector.extract_strided_slice %223 {offsets = [0, 0, 8], sizes = [1, 16, 8], strides = [1, 1, 1]} : vector<1x16x96xbf16> to vector<1x16x8xbf16>
    %241 = vector.extract_strided_slice %223 {offsets = [0, 0, 40], sizes = [1, 16, 8], strides = [1, 1, 1]} : vector<1x16x96xbf16> to vector<1x16x8xbf16>
    %242 = vector.extract_strided_slice %223 {offsets = [0, 0, 72], sizes = [1, 16, 8], strides = [1, 1, 1]} : vector<1x16x96xbf16> to vector<1x16x8xbf16>
    "tpu.trace_start"() <{level = 10 : i32, message = "rqd,rkd->rqk"}> : () -> ()
    %cst_95 = arith.constant dense<0.000000e+00> : vector<1x16x16xf32>
    %243 = tpu.matmul %240, %241, %cst_95 {dimension_numbers = #tpu.dot_dimension_numbers<[2], [2], [1], [1], [0, 0, 0, 1, 1, 1], [0], [0]>} : vector<1x16x8xbf16>, vector<1x16x8xbf16>, vector<1x16x16xf32> -> vector<1x16x16xf32>
    "tpu.trace_stop"() : () -> ()
    %244 = arith.addf %243, %35 : vector<1x16x16xf32>
    %cst_96 = arith.constant dense<0xFF800000> : vector<1x16xf32>
    %245 = vector.multi_reduction <maximumf>, %244, %cst_96 [2] : vector<1x16x16xf32> to vector<1x16xf32>
    %246 = vector.shape_cast %245 : vector<1x16xf32> to vector<1x16x1xf32>
    %247 = vector.broadcast %246 : vector<1x16x1xf32> to vector<1x16x16xf32>
    %248 = arith.subf %244, %247 : vector<1x16x16xf32>
    %249 = math.exp %248 : vector<1x16x16xf32>
    %cst_97 = arith.constant dense<0.000000e+00> : vector<1x16xf32>
    %250 = vector.multi_reduction <add>, %249, %cst_97 [2] : vector<1x16x16xf32> to vector<1x16xf32>
    %251 = vector.shape_cast %250 : vector<1x16xf32> to vector<1x16x1xf32>
    %252 = vector.broadcast %251 : vector<1x16x1xf32> to vector<1x16x16xf32>
    %253 = arith.divf %249, %252 : vector<1x16x16xf32>
    %254 = arith.truncf %253 : vector<1x16x16xf32> to vector<1x16x16xbf16>
    "tpu.trace_start"() <{level = 10 : i32, message = "rqk,rkd->rqd"}> : () -> ()
    %cst_98 = arith.constant dense<0.000000e+00> : vector<1x16x8xf32>
    %255 = tpu.matmul %254, %242, %cst_98 {dimension_numbers = #tpu.dot_dimension_numbers<[2], [1], [1], [2], [0, 0, 0, 1, 1, 2], [0], [0]>} : vector<1x16x16xbf16>, vector<1x16x8xbf16>, vector<1x16x8xf32> -> vector<1x16x8xf32>
    "tpu.trace_stop"() : () -> ()
    %256 = vector.extract_strided_slice %223 {offsets = [0, 0, 16], sizes = [1, 16, 8], strides = [1, 1, 1]} : vector<1x16x96xbf16> to vector<1x16x8xbf16>
    %257 = vector.extract_strided_slice %223 {offsets = [0, 0, 48], sizes = [1, 16, 8], strides = [1, 1, 1]} : vector<1x16x96xbf16> to vector<1x16x8xbf16>
    %258 = vector.extract_strided_slice %223 {offsets = [0, 0, 80], sizes = [1, 16, 8], strides = [1, 1, 1]} : vector<1x16x96xbf16> to vector<1x16x8xbf16>
    "tpu.trace_start"() <{level = 10 : i32, message = "rqd,rkd->rqk"}> : () -> ()
    %cst_99 = arith.constant dense<0.000000e+00> : vector<1x16x16xf32>
    %259 = tpu.matmul %256, %257, %cst_99 {dimension_numbers = #tpu.dot_dimension_numbers<[2], [2], [1], [1], [0, 0, 0, 1, 1, 1], [0], [0]>} : vector<1x16x8xbf16>, vector<1x16x8xbf16>, vector<1x16x16xf32> -> vector<1x16x16xf32>
    "tpu.trace_stop"() : () -> ()
    %260 = arith.addf %259, %35 : vector<1x16x16xf32>
    %cst_100 = arith.constant dense<0xFF800000> : vector<1x16xf32>
    %261 = vector.multi_reduction <maximumf>, %260, %cst_100 [2] : vector<1x16x16xf32> to vector<1x16xf32>
    %262 = vector.shape_cast %261 : vector<1x16xf32> to vector<1x16x1xf32>
    %263 = vector.broadcast %262 : vector<1x16x1xf32> to vector<1x16x16xf32>
    %264 = arith.subf %260, %263 : vector<1x16x16xf32>
    %265 = math.exp %264 : vector<1x16x16xf32>
    %cst_101 = arith.constant dense<0.000000e+00> : vector<1x16xf32>
    %266 = vector.multi_reduction <add>, %265, %cst_101 [2] : vector<1x16x16xf32> to vector<1x16xf32>
    %267 = vector.shape_cast %266 : vector<1x16xf32> to vector<1x16x1xf32>
    %268 = vector.broadcast %267 : vector<1x16x1xf32> to vector<1x16x16xf32>
    %269 = arith.divf %265, %268 : vector<1x16x16xf32>
    %270 = arith.truncf %269 : vector<1x16x16xf32> to vector<1x16x16xbf16>
    "tpu.trace_start"() <{level = 10 : i32, message = "rqk,rkd->rqd"}> : () -> ()
    %cst_102 = arith.constant dense<0.000000e+00> : vector<1x16x8xf32>
    %271 = tpu.matmul %270, %258, %cst_102 {dimension_numbers = #tpu.dot_dimension_numbers<[2], [1], [1], [2], [0, 0, 0, 1, 1, 2], [0], [0]>} : vector<1x16x16xbf16>, vector<1x16x8xbf16>, vector<1x16x8xf32> -> vector<1x16x8xf32>
    "tpu.trace_stop"() : () -> ()
    %272 = vector.extract_strided_slice %223 {offsets = [0, 0, 24], sizes = [1, 16, 8], strides = [1, 1, 1]} : vector<1x16x96xbf16> to vector<1x16x8xbf16>
    %273 = vector.extract_strided_slice %223 {offsets = [0, 0, 56], sizes = [1, 16, 8], strides = [1, 1, 1]} : vector<1x16x96xbf16> to vector<1x16x8xbf16>
    %274 = vector.extract_strided_slice %223 {offsets = [0, 0, 88], sizes = [1, 16, 8], strides = [1, 1, 1]} : vector<1x16x96xbf16> to vector<1x16x8xbf16>
    "tpu.trace_start"() <{level = 10 : i32, message = "rqd,rkd->rqk"}> : () -> ()
    %cst_103 = arith.constant dense<0.000000e+00> : vector<1x16x16xf32>
    %275 = tpu.matmul %272, %273, %cst_103 {dimension_numbers = #tpu.dot_dimension_numbers<[2], [2], [1], [1], [0, 0, 0, 1, 1, 1], [0], [0]>} : vector<1x16x8xbf16>, vector<1x16x8xbf16>, vector<1x16x16xf32> -> vector<1x16x16xf32>
    "tpu.trace_stop"() : () -> ()
    %276 = arith.addf %275, %35 : vector<1x16x16xf32>
    %cst_104 = arith.constant dense<0xFF800000> : vector<1x16xf32>
    %277 = vector.multi_reduction <maximumf>, %276, %cst_104 [2] : vector<1x16x16xf32> to vector<1x16xf32>
    %278 = vector.shape_cast %277 : vector<1x16xf32> to vector<1x16x1xf32>
    %279 = vector.broadcast %278 : vector<1x16x1xf32> to vector<1x16x16xf32>
    %280 = arith.subf %276, %279 : vector<1x16x16xf32>
    %281 = math.exp %280 : vector<1x16x16xf32>
    %cst_105 = arith.constant dense<0.000000e+00> : vector<1x16xf32>
    %282 = vector.multi_reduction <add>, %281, %cst_105 [2] : vector<1x16x16xf32> to vector<1x16xf32>
    %283 = vector.shape_cast %282 : vector<1x16xf32> to vector<1x16x1xf32>
    %284 = vector.broadcast %283 : vector<1x16x1xf32> to vector<1x16x16xf32>
    %285 = arith.divf %281, %284 : vector<1x16x16xf32>
    %286 = arith.truncf %285 : vector<1x16x16xf32> to vector<1x16x16xbf16>
    "tpu.trace_start"() <{level = 10 : i32, message = "rqk,rkd->rqd"}> : () -> ()
    %cst_106 = arith.constant dense<0.000000e+00> : vector<1x16x8xf32>
    %287 = tpu.matmul %286, %274, %cst_106 {dimension_numbers = #tpu.dot_dimension_numbers<[2], [1], [1], [2], [0, 0, 0, 1, 1, 2], [0], [0]>} : vector<1x16x16xbf16>, vector<1x16x8xbf16>, vector<1x16x8xf32> -> vector<1x16x8xf32>
    "tpu.trace_stop"() : () -> ()
    %288 = tpu.concatenate %239, %255, %271, %287 in 2 : vector<1x16x8xf32>, vector<1x16x8xf32>, vector<1x16x8xf32>, vector<1x16x8xf32> -> vector<1x16x32xf32>
    %289 = arith.truncf %288 : vector<1x16x32xf32> to vector<1x16x32xbf16>
    %290 = vector.shape_cast %289 : vector<1x16x32xbf16> to vector<16x32xbf16>
    %c1_107 = arith.constant 1 : index
    %c0_108 = arith.constant 0 : index
    %c0_109 = arith.constant 0 : index
    %291 = vector.load %arg7[%c1_107, %c0_108, %c0_109] : memref<2x32x32xbf16, #tpu.memory_space<vmem>>, vector<1x32x32xbf16>
    %292 = vector.shape_cast %291 : vector<1x32x32xbf16> to vector<32x32xbf16>
    %cst_110 = arith.constant dense<0.000000e+00> : vector<16x32xf32>
    %293 = tpu.matmul %290, %292, %cst_110 {dimension_numbers = #tpu.dot_dimension_numbers<[1], [0], [0], [1], [0, 0, 1, 1], [], []>} : vector<16x32xbf16>, vector<32x32xbf16>, vector<16x32xf32> -> vector<16x32xf32>
    %294 = vector.shape_cast %293 : vector<16x32xf32> to vector<1x16x32xf32>
    %c1_111 = arith.constant 1 : index
    %c0_112 = arith.constant 0 : index
    %c0_113 = arith.constant 0 : index
    %295 = vector.load %arg8[%c1_111, %c0_112, %c0_113] : memref<2x1x32xf32, #tpu.memory_space<vmem>>, vector<1x1x32xf32>
    %296 = vector.shape_cast %295 : vector<1x1x32xf32> to vector<1x32xf32>
    %297 = vector.shape_cast %296 : vector<1x32xf32> to vector<1x1x32xf32>
    %298 = vector.broadcast %297 : vector<1x1x32xf32> to vector<1x16x32xf32>
    %299 = arith.addf %294, %298 : vector<1x16x32xf32>
    %300 = arith.addf %299, %212 : vector<1x16x32xf32>
    %c1_114 = arith.constant 1 : index
    %c0_115 = arith.constant 0 : index
    %c0_116 = arith.constant 0 : index
    %301 = vector.load %arg9[%c1_114, %c0_115, %c0_116] : memref<2x1x32xf32, #tpu.memory_space<vmem>>, vector<1x1x32xf32>
    %302 = vector.shape_cast %301 : vector<1x1x32xf32> to vector<1x32xf32>
    %c1_117 = arith.constant 1 : index
    %c0_118 = arith.constant 0 : index
    %c0_119 = arith.constant 0 : index
    %303 = vector.load %arg10[%c1_117, %c0_118, %c0_119] : memref<2x1x32xf32, #tpu.memory_space<vmem>>, vector<1x1x32xf32>
    %304 = vector.shape_cast %303 : vector<1x1x32xf32> to vector<1x32xf32>
    %cst_120 = arith.constant dense<0.000000e+00> : vector<1x16xf32>
    %305 = vector.multi_reduction <add>, %300, %cst_120 [2] : vector<1x16x32xf32> to vector<1x16xf32>
    %306 = vector.shape_cast %305 : vector<1x16xf32> to vector<1x16x1xf32>
    %cst_121 = arith.constant 3.200000e+01 : f32
    %307 = vector.broadcast %cst_121 : f32 to vector<1x16x1xf32>
    %308 = arith.divf %306, %307 : vector<1x16x1xf32>
    %309 = vector.broadcast %308 : vector<1x16x1xf32> to vector<1x16x32xf32>
    %310 = arith.subf %300, %309 : vector<1x16x32xf32>
    %311 = arith.mulf %310, %310 : vector<1x16x32xf32>
    %cst_122 = arith.constant dense<0.000000e+00> : vector<1x16xf32>
    %312 = vector.multi_reduction <add>, %311, %cst_122 [2] : vector<1x16x32xf32> to vector<1x16xf32>
    %313 = vector.shape_cast %312 : vector<1x16xf32> to vector<1x16x1xf32>
    %cst_123 = arith.constant 3.200000e+01 : f32
    %314 = vector.broadcast %cst_123 : f32 to vector<1x16x1xf32>
    %315 = arith.divf %313, %314 : vector<1x16x1xf32>
    %316 = vector.broadcast %308 : vector<1x16x1xf32> to vector<1x16x32xf32>
    %317 = arith.subf %300, %316 : vector<1x16x32xf32>
    %cst_124 = arith.constant 9.99999996E-13 : f32
    %318 = vector.broadcast %cst_124 : f32 to vector<1x16x1xf32>
    %319 = arith.addf %315, %318 : vector<1x16x1xf32>
    %320 = math.rsqrt %319 : vector<1x16x1xf32>
    %321 = vector.broadcast %320 : vector<1x16x1xf32> to vector<1x16x32xf32>
    %322 = arith.mulf %317, %321 : vector<1x16x32xf32>
    %323 = vector.shape_cast %302 : vector<1x32xf32> to vector<1x1x32xf32>
    %324 = vector.broadcast %323 : vector<1x1x32xf32> to vector<1x16x32xf32>
    %325 = arith.mulf %322, %324 : vector<1x16x32xf32>
    %326 = vector.shape_cast %304 : vector<1x32xf32> to vector<1x1x32xf32>
    %327 = vector.broadcast %326 : vector<1x1x32xf32> to vector<1x16x32xf32>
    %328 = arith.addf %325, %327 : vector<1x16x32xf32>
    %329 = arith.truncf %328 : vector<1x16x32xf32> to vector<1x16x32xbf16>
    %330 = vector.shape_cast %329 : vector<1x16x32xbf16> to vector<16x32xbf16>
    %c1_125 = arith.constant 1 : index
    %c0_126 = arith.constant 0 : index
    %c0_127 = arith.constant 0 : index
    %331 = vector.load %arg11[%c1_125, %c0_126, %c0_127] : memref<2x32x64xbf16, #tpu.memory_space<vmem>>, vector<1x32x64xbf16>
    %332 = vector.shape_cast %331 : vector<1x32x64xbf16> to vector<32x64xbf16>
    %cst_128 = arith.constant dense<0.000000e+00> : vector<16x64xf32>
    %333 = tpu.matmul %330, %332, %cst_128 {dimension_numbers = #tpu.dot_dimension_numbers<[1], [0], [0], [1], [0, 0, 1, 1], [], []>} : vector<16x32xbf16>, vector<32x64xbf16>, vector<16x64xf32> -> vector<16x64xf32>
    %c1_129 = arith.constant 1 : index
    %c0_130 = arith.constant 0 : index
    %c0_131 = arith.constant 0 : index
    %334 = vector.load %arg12[%c1_129, %c0_130, %c0_131] : memref<2x1x64xf32, #tpu.memory_space<vmem>>, vector<1x1x64xf32>
    %335 = vector.shape_cast %334 : vector<1x1x64xf32> to vector<1x64xf32>
    %336 = vector.broadcast %335 : vector<1x64xf32> to vector<16x64xf32>
    %337 = arith.addf %333, %336 : vector<16x64xf32>
    %338 = arith.mulf %337, %337 : vector<16x64xf32>
    %339 = arith.mulf %337, %338 : vector<16x64xf32>
    %cst_132 = arith.constant 4.471500e-02 : f32
    %340 = vector.broadcast %cst_132 : f32 to vector<16x64xf32>
    %341 = arith.mulf %340, %339 : vector<16x64xf32>
    %342 = arith.addf %337, %341 : vector<16x64xf32>
    %cst_133 = arith.constant 0.797884583 : f32
    %343 = vector.broadcast %cst_133 : f32 to vector<16x64xf32>
    %344 = arith.mulf %343, %342 : vector<16x64xf32>
    %345 = math.tanh %344 : vector<16x64xf32>
    %cst_134 = arith.constant 1.000000e+00 : f32
    %346 = vector.broadcast %cst_134 : f32 to vector<16x64xf32>
    %347 = arith.addf %346, %345 : vector<16x64xf32>
    %cst_135 = arith.constant 5.000000e-01 : f32
    %348 = vector.broadcast %cst_135 : f32 to vector<16x64xf32>
    %349 = arith.mulf %348, %347 : vector<16x64xf32>
    %350 = arith.mulf %337, %349 : vector<16x64xf32>
    %351 = arith.truncf %350 : vector<16x64xf32> to vector<16x64xbf16>
    %c1_136 = arith.constant 1 : index
    %c0_137 = arith.constant 0 : index
    %c0_138 = arith.constant 0 : index
    %352 = vector.load %arg13[%c1_136, %c0_137, %c0_138] : memref<2x64x32xbf16, #tpu.memory_space<vmem>>, vector<1x64x32xbf16>
    %353 = vector.shape_cast %352 : vector<1x64x32xbf16> to vector<64x32xbf16>
    %cst_139 = arith.constant dense<0.000000e+00> : vector<16x32xf32>
    %354 = tpu.matmul %351, %353, %cst_139 {dimension_numbers = #tpu.dot_dimension_numbers<[1], [0], [0], [1], [0, 0, 1, 1], [], []>} : vector<16x64xbf16>, vector<64x32xbf16>, vector<16x32xf32> -> vector<16x32xf32>
    %355 = vector.shape_cast %354 : vector<16x32xf32> to vector<1x16x32xf32>
    %c1_140 = arith.constant 1 : index
    %c0_141 = arith.constant 0 : index
    %c0_142 = arith.constant 0 : index
    %356 = vector.load %arg14[%c1_140, %c0_141, %c0_142] : memref<2x1x32xf32, #tpu.memory_space<vmem>>, vector<1x1x32xf32>
    %357 = vector.shape_cast %356 : vector<1x1x32xf32> to vector<1x32xf32>
    %358 = vector.shape_cast %357 : vector<1x32xf32> to vector<1x1x32xf32>
    %359 = vector.broadcast %358 : vector<1x1x32xf32> to vector<1x16x32xf32>
    %360 = arith.addf %355, %359 : vector<1x16x32xf32>
    %361 = arith.addf %360, %328 : vector<1x16x32xf32>
    %c1_143 = arith.constant 1 : index
    %c0_144 = arith.constant 0 : index
    %c0_145 = arith.constant 0 : index
    %362 = vector.load %arg15[%c1_143, %c0_144, %c0_145] : memref<2x1x32xf32, #tpu.memory_space<vmem>>, vector<1x1x32xf32>
    %363 = vector.shape_cast %362 : vector<1x1x32xf32> to vector<1x32xf32>
    %c1_146 = arith.constant 1 : index
    %c0_147 = arith.constant 0 : index
    %c0_148 = arith.constant 0 : index
    %364 = vector.load %arg16[%c1_146, %c0_147, %c0_148] : memref<2x1x32xf32, #tpu.memory_space<vmem>>, vector<1x1x32xf32>
    %365 = vector.shape_cast %364 : vector<1x1x32xf32> to vector<1x32xf32>
    %cst_149 = arith.constant dense<0.000000e+00> : vector<1x16xf32>
    %366 = vector.multi_reduction <add>, %361, %cst_149 [2] : vector<1x16x32xf32> to vector<1x16xf32>
    %367 = vector.shape_cast %366 : vector<1x16xf32> to vector<1x16x1xf32>
    %cst_150 = arith.constant 3.200000e+01 : f32
    %368 = vector.broadcast %cst_150 : f32 to vector<1x16x1xf32>
    %369 = arith.divf %367, %368 : vector<1x16x1xf32>
    %370 = vector.broadcast %369 : vector<1x16x1xf32> to vector<1x16x32xf32>
    %371 = arith.subf %361, %370 : vector<1x16x32xf32>
    %372 = arith.mulf %371, %371 : vector<1x16x32xf32>
    %cst_151 = arith.constant dense<0.000000e+00> : vector<1x16xf32>
    %373 = vector.multi_reduction <add>, %372, %cst_151 [2] : vector<1x16x32xf32> to vector<1x16xf32>
    %374 = vector.shape_cast %373 : vector<1x16xf32> to vector<1x16x1xf32>
    %cst_152 = arith.constant 3.200000e+01 : f32
    %375 = vector.broadcast %cst_152 : f32 to vector<1x16x1xf32>
    %376 = arith.divf %374, %375 : vector<1x16x1xf32>
    %377 = vector.broadcast %369 : vector<1x16x1xf32> to vector<1x16x32xf32>
    %378 = arith.subf %361, %377 : vector<1x16x32xf32>
    %cst_153 = arith.constant 9.99999996E-13 : f32
    %379 = vector.broadcast %cst_153 : f32 to vector<1x16x1xf32>
    %380 = arith.addf %376, %379 : vector<1x16x1xf32>
    %381 = math.rsqrt %380 : vector<1x16x1xf32>
    %382 = vector.broadcast %381 : vector<1x16x1xf32> to vector<1x16x32xf32>
    %383 = arith.mulf %378, %382 : vector<1x16x32xf32>
    %384 = vector.shape_cast %363 : vector<1x32xf32> to vector<1x1x32xf32>
    %385 = vector.broadcast %384 : vector<1x1x32xf32> to vector<1x16x32xf32>
    %386 = arith.mulf %383, %385 : vector<1x16x32xf32>
    %387 = vector.shape_cast %365 : vector<1x32xf32> to vector<1x1x32xf32>
    %388 = vector.broadcast %387 : vector<1x1x32xf32> to vector<1x16x32xf32>
    %389 = arith.addf %386, %388 : vector<1x16x32xf32>
    %c0_154 = arith.constant 0 : index
    %c0_155 = arith.constant 0 : index
    %c0_156 = arith.constant 0 : index
    %390 = vector.load %arg19[%c0_154, %c0_155, %c0_156] : memref<1x16x32xf32, #tpu.memory_space<vmem>>, vector<1x16x32xf32>
    tpu.vector_store %arg19[%c0_154, %c0_155, %c0_156], %389 {strides = array<i32>} : memref<1x16x32xf32, #tpu.memory_space<vmem>>, vector<1x16x32xf32>,
    %391 = vector.extract_strided_slice %389 {offsets = [0, 0, 0], sizes = [1, 1, 32], strides = [1, 1, 1]} : vector<1x16x32xf32> to vector<1x1x32xf32>
    %392 = vector.shape_cast %391 : vector<1x1x32xf32> to vector<1x32xf32>
    %393 = arith.truncf %392 : vector<1x32xf32> to vector<1x32xbf16>
    %c0_157 = arith.constant 0 : index
    %c0_158 = arith.constant 0 : index
    %394 = vector.load %arg17[%c0_157, %c0_158] : memref<32x32xbf16, #tpu.memory_space<vmem>>, vector<32x32xbf16>
    %cst_159 = arith.constant dense<0.000000e+00> : vector<1x32xf32>
    %395 = tpu.matmul %393, %394, %cst_159 {dimension_numbers = #tpu.dot_dimension_numbers<[1], [0], [0], [1], [0, 0, 1, 1], [], []>} : vector<1x32xbf16>, vector<32x32xbf16>, vector<1x32xf32> -> vector<1x32xf32>
    %c0_160 = arith.constant 0 : index
    %c0_161 = arith.constant 0 : index
    %396 = vector.load %arg18[%c0_160, %c0_161] : memref<1x32xf32, #tpu.memory_space<vmem>>, vector<1x32xf32>
    %397 = arith.addf %395, %396 : vector<1x32xf32>
    %398 = math.tanh %397 : vector<1x32xf32>
    %399 = vector.shape_cast %398 : vector<1x32xf32> to vector<1x1x32xf32>
    %c0_162 = arith.constant 0 : index
    %c0_163 = arith.constant 0 : index
    %c0_164 = arith.constant 0 : index
    %400 = vector.load %arg20[%c0_162, %c0_163, %c0_164] : memref<1x1x32xf32, #tpu.memory_space<vmem>>, vector<1x1x32xf32>
    tpu.vector_store %arg20[%c0_162, %c0_163, %c0_164], %399 {strides = array<i32>} : memref<1x1x32xf32, #tpu.memory_space<vmem>>, vector<1x1x32xf32>,
    return
  }
  func.func @transform_0(%arg0: i32) -> (i32, i32, i32) {
    %c0_i32 = arith.constant 0 : i32
    %c0_i32_0 = arith.constant 0 : i32
    %c0_i32_1 = arith.constant 0 : i32
    return %arg0, %c0_i32, %c0_i32_0 : i32, i32, i32
  }
  func.func @transform_1(%arg0: i32) -> (i32, i32, i32) {
    %c0_i32 = arith.constant 0 : i32
    %c0_i32_0 = arith.constant 0 : i32
    %c0_i32_1 = arith.constant 0 : i32
    return %arg0, %c0_i32, %c0_i32_0 : i32, i32, i32
  }
  func.func @transform_2(%arg0: i32) -> (i32, i32) {
    %c0_i32 = arith.constant 0 : i32
    %c0_i32_0 = arith.constant 0 : i32
    %c0_i32_1 = arith.constant 0 : i32
    return %c0_i32, %c0_i32_0 : i32, i32
  }
  func.func @transform_3(%arg0: i32) -> (i32, i32) {
    %c0_i32 = arith.constant 0 : i32
    %c0_i32_0 = arith.constant 0 : i32
    %c0_i32_1 = arith.constant 0 : i32
    return %c0_i32, %c0_i32_0 : i32, i32
  }
  func.func @transform_4(%arg0: i32) -> (i32, i32, i32) {
    %c0_i32 = arith.constant 0 : i32
    %c0_i32_0 = arith.constant 0 : i32
    %c0_i32_1 = arith.constant 0 : i32
    %c0_i32_2 = arith.constant 0 : i32
    return %c0_i32, %c0_i32_0, %c0_i32_1 : i32, i32, i32
  }
  func.func @transform_5(%arg0: i32) -> (i32, i32, i32) {
    %c0_i32 = arith.constant 0 : i32
    %c0_i32_0 = arith.constant 0 : i32
    %c0_i32_1 = arith.constant 0 : i32
    %c0_i32_2 = arith.constant 0 : i32
    return %c0_i32, %c0_i32_0, %c0_i32_1 : i32, i32, i32
  }
  func.func @transform_6(%arg0: i32) -> (i32, i32, i32) {
    %c0_i32 = arith.constant 0 : i32
    %c0_i32_0 = arith.constant 0 : i32
    %c0_i32_1 = arith.constant 0 : i32
    %c0_i32_2 = arith.constant 0 : i32
    return %c0_i32, %c0_i32_0, %c0_i32_1 : i32, i32, i32
  }
  func.func @transform_7(%arg0: i32) -> (i32, i32, i32) {
    %c0_i32 = arith.constant 0 : i32
    %c0_i32_0 = arith.constant 0 : i32
    %c0_i32_1 = arith.constant 0 : i32
    %c0_i32_2 = arith.constant 0 : i32
    return %c0_i32, %c0_i32_0, %c0_i32_1 : i32, i32, i32
  }
  func.func @transform_8(%arg0: i32) -> (i32, i32, i32) {
    %c0_i32 = arith.constant 0 : i32
    %c0_i32_0 = arith.constant 0 : i32
    %c0_i32_1 = arith.constant 0 : i32
    %c0_i32_2 = arith.constant 0 : i32
    return %c0_i32, %c0_i32_0, %c0_i32_1 : i32, i32, i32
  }
  func.func @transform_9(%arg0: i32) -> (i32, i32, i32) {
    %c0_i32 = arith.constant 0 : i32
    %c0_i32_0 = arith.constant 0 : i32
    %c0_i32_1 = arith.constant 0 : i32
    %c0_i32_2 = arith.constant 0 : i32
    return %c0_i32, %c0_i32_0, %c0_i32_1 : i32, i32, i32
  }
  func.func @transform_10(%arg0: i32) -> (i32, i32, i32) {
    %c0_i32 = arith.constant 0 : i32
    %c0_i32_0 = arith.constant 0 : i32
    %c0_i32_1 = arith.constant 0 : i32
    %c0_i32_2 = arith.constant 0 : i32
    return %c0_i32, %c0_i32_0, %c0_i32_1 : i32, i32, i32
  }
  func.func @transform_11(%arg0: i32) -> (i32, i32, i32) {
    %c0_i32 = arith.constant 0 : i32
    %c0_i32_0 = arith.constant 0 : i32
    %c0_i32_1 = arith.constant 0 : i32
    %c0_i32_2 = arith.constant 0 : i32
    return %c0_i32, %c0_i32_0, %c0_i32_1 : i32, i32, i32
  }
  func.func @transform_12(%arg0: i32) -> (i32, i32, i32) {
    %c0_i32 = arith.constant 0 : i32
    %c0_i32_0 = arith.constant 0 : i32
    %c0_i32_1 = arith.constant 0 : i32
    %c0_i32_2 = arith.constant 0 : i32
    return %c0_i32, %c0_i32_0, %c0_i32_1 : i32, i32, i32
  }
  func.func @transform_13(%arg0: i32) -> (i32, i32, i32) {
    %c0_i32 = arith.constant 0 : i32
    %c0_i32_0 = arith.constant 0 : i32
    %c0_i32_1 = arith.constant 0 : i32
    %c0_i32_2 = arith.constant 0 : i32
    return %c0_i32, %c0_i32_0, %c0_i32_1 : i32, i32, i32
  }
  func.func @transform_14(%arg0: i32) -> (i32, i32, i32) {
    %c0_i32 = arith.constant 0 : i32
    %c0_i32_0 = arith.constant 0 : i32
    %c0_i32_1 = arith.constant 0 : i32
    %c0_i32_2 = arith.constant 0 : i32
    return %c0_i32, %c0_i32_0, %c0_i32_1 : i32, i32, i32
  }
  func.func @transform_15(%arg0: i32) -> (i32, i32, i32) {
    %c0_i32 = arith.constant 0 : i32
    %c0_i32_0 = arith.constant 0 : i32
    %c0_i32_1 = arith.constant 0 : i32
    %c0_i32_2 = arith.constant 0 : i32
    return %c0_i32, %c0_i32_0, %c0_i32_1 : i32, i32, i32
  }
  func.func @transform_16(%arg0: i32) -> (i32, i32) {
    %c0_i32 = arith.constant 0 : i32
    %c0_i32_0 = arith.constant 0 : i32
    %c0_i32_1 = arith.constant 0 : i32
    return %c0_i32, %c0_i32_0 : i32, i32
  }
  func.func @transform_17(%arg0: i32) -> (i32, i32) {
    %c0_i32 = arith.constant 0 : i32
    %c0_i32_0 = arith.constant 0 : i32
    %c0_i32_1 = arith.constant 0 : i32
    return %c0_i32, %c0_i32_0 : i32, i32
  }
  func.func @transform_18(%arg0: i32) -> (i32, i32, i32) {
    %c0_i32 = arith.constant 0 : i32
    %c0_i32_0 = arith.constant 0 : i32
    %c0_i32_1 = arith.constant 0 : i32
    return %arg0, %c0_i32, %c0_i32_0 : i32, i32, i32
  }
  func.func @transform_19(%arg0: i32) -> (i32, i32, i32) {
    %c0_i32 = arith.constant 0 : i32
    %c0_i32_0 = arith.constant 0 : i32
    %c0_i32_1 = arith.constant 0 : i32
    return %arg0, %c0_i32, %c0_i32_0 : i32, i32, i32
  }
}

module attributes {stable_mosaic.version = 11 : i64} {
  func.func @_encoder_kernel(%arg0: i32, %arg1: memref<1x8x32xbf16, #tpu.memory_space<vmem>>, %arg2: memref<1x1x8xbf16, #tpu.memory_space<vmem>>, %arg3: memref<1x32xf32, #tpu.memory_space<vmem>>, %arg4: memref<1x32xf32, #tpu.memory_space<vmem>>, %arg5: memref<2x32x96xbf16, #tpu.memory_space<vmem>>, %arg6: memref<2x1x96xf32, #tpu.memory_space<vmem>>, %arg7: memref<2x32x32xbf16, #tpu.memory_space<vmem>>, %arg8: memref<2x1x32xf32, #tpu.memory_space<vmem>>, %arg9: memref<2x1x32xf32, #tpu.memory_space<vmem>>, %arg10: memref<2x1x32xf32, #tpu.memory_space<vmem>>, %arg11: memref<2x32x64xbf16, #tpu.memory_space<vmem>>, %arg12: memref<2x1x64xf32, #tpu.memory_space<vmem>>, %arg13: memref<2x64x32xbf16, #tpu.memory_space<vmem>>, %arg14: memref<2x1x32xf32, #tpu.memory_space<vmem>>, %arg15: memref<2x1x32xf32, #tpu.memory_space<vmem>>, %arg16: memref<2x1x32xf32, #tpu.memory_space<vmem>>, %arg17: memref<32x32xbf16, #tpu.memory_space<vmem>>, %arg18: memref<1x32xf32, #tpu.memory_space<vmem>>, %arg19: memref<1x8x32xf32, #tpu.memory_space<vmem>>, %arg20: memref<1x1x32xf32, #tpu.memory_space<vmem>>) attributes {dimension_semantics = [#tpu.dimension_semantics<parallel>], iteration_bounds = array<i64: 2>, scalar_prefetch = 0 : i64, scratch_operands = 0 : i64, tpu.core_type = #tpu.core_type<tc>, window_params = [{transform_indices = @transform_0, window_bounds = array<i64: 1, 8, 32>}, {transform_indices = @transform_1, window_bounds = array<i64: 1, 1, 8>}, {pipeline_mode = #tpu.pipeline_mode<synchronous>, transform_indices = @transform_2, window_bounds = array<i64: 1, 32>}, {pipeline_mode = #tpu.pipeline_mode<synchronous>, transform_indices = @transform_3, window_bounds = array<i64: 1, 32>}, {pipeline_mode = #tpu.pipeline_mode<synchronous>, transform_indices = @transform_4, window_bounds = array<i64: 2, 32, 96>}, {pipeline_mode = #tpu.pipeline_mode<synchronous>, transform_indices = @transform_5, window_bounds = array<i64: 2, 1, 96>}, {pipeline_mode = #tpu.pipeline_mode<synchronous>, transform_indices = @transform_6, window_bounds = array<i64: 2, 32, 32>}, {pipeline_mode = #tpu.pipeline_mode<synchronous>, transform_indices = @transform_7, window_bounds = array<i64: 2, 1, 32>}, {pipeline_mode = #tpu.pipeline_mode<synchronous>, transform_indices = @transform_8, window_bounds = array<i64: 2, 1, 32>}, {pipeline_mode = #tpu.pipeline_mode<synchronous>, transform_indices = @transform_9, window_bounds = array<i64: 2, 1, 32>}, {pipeline_mode = #tpu.pipeline_mode<synchronous>, transform_indices = @transform_10, window_bounds = array<i64: 2, 32, 64>}, {pipeline_mode = #tpu.pipeline_mode<synchronous>, transform_indices = @transform_11, window_bounds = array<i64: 2, 1, 64>}, {pipeline_mode = #tpu.pipeline_mode<synchronous>, transform_indices = @transform_12, window_bounds = array<i64: 2, 64, 32>}, {pipeline_mode = #tpu.pipeline_mode<synchronous>, transform_indices = @transform_13, window_bounds = array<i64: 2, 1, 32>}, {pipeline_mode = #tpu.pipeline_mode<synchronous>, transform_indices = @transform_14, window_bounds = array<i64: 2, 1, 32>}, {pipeline_mode = #tpu.pipeline_mode<synchronous>, transform_indices = @transform_15, window_bounds = array<i64: 2, 1, 32>}, {pipeline_mode = #tpu.pipeline_mode<synchronous>, transform_indices = @transform_16, window_bounds = array<i64: 32, 32>}, {pipeline_mode = #tpu.pipeline_mode<synchronous>, transform_indices = @transform_17, window_bounds = array<i64: 1, 32>}, {transform_indices = @transform_18, window_bounds = array<i64: 1, 8, 32>}, {transform_indices = @transform_19, window_bounds = array<i64: 1, 1, 32>}]} {
    %c0 = arith.constant 0 : index
    %c0_0 = arith.constant 0 : index
    %c0_1 = arith.constant 0 : index
    %0 = vector.load %arg1[%c0, %c0_0, %c0_1] : memref<1x8x32xbf16, #tpu.memory_space<vmem>>, vector<1x8x32xbf16>
    %1 = arith.extf %0 : vector<1x8x32xbf16> to vector<1x8x32xf32>
    %c0_2 = arith.constant 0 : index
    %c0_3 = arith.constant 0 : index
    %2 = vector.load %arg3[%c0_2, %c0_3] : memref<1x32xf32, #tpu.memory_space<vmem>>, vector<1x32xf32>
    %c0_4 = arith.constant 0 : index
    %c0_5 = arith.constant 0 : index
    %3 = vector.load %arg4[%c0_4, %c0_5] : memref<1x32xf32, #tpu.memory_space<vmem>>, vector<1x32xf32>
    %cst = arith.constant dense<0.000000e+00> : vector<1x8xf32>
    %4 = vector.multi_reduction <add>, %1, %cst [2] : vector<1x8x32xf32> to vector<1x8xf32>
    %5 = vector.shape_cast %4 : vector<1x8xf32> to vector<1x8x1xf32>
    %cst_6 = arith.constant 3.200000e+01 : f32
    %6 = vector.broadcast %cst_6 : f32 to vector<1x8x1xf32>
    %7 = arith.divf %5, %6 : vector<1x8x1xf32>
    %8 = vector.broadcast %7 : vector<1x8x1xf32> to vector<1x8x32xf32>
    %9 = arith.subf %1, %8 : vector<1x8x32xf32>
    %10 = arith.mulf %9, %9 : vector<1x8x32xf32>
    %cst_7 = arith.constant dense<0.000000e+00> : vector<1x8xf32>
    %11 = vector.multi_reduction <add>, %10, %cst_7 [2] : vector<1x8x32xf32> to vector<1x8xf32>
    %12 = vector.shape_cast %11 : vector<1x8xf32> to vector<1x8x1xf32>
    %cst_8 = arith.constant 3.200000e+01 : f32
    %13 = vector.broadcast %cst_8 : f32 to vector<1x8x1xf32>
    %14 = arith.divf %12, %13 : vector<1x8x1xf32>
    %15 = vector.broadcast %7 : vector<1x8x1xf32> to vector<1x8x32xf32>
    %16 = arith.subf %1, %15 : vector<1x8x32xf32>
    %cst_9 = arith.constant 9.99999996E-13 : f32
    %17 = vector.broadcast %cst_9 : f32 to vector<1x8x1xf32>
    %18 = arith.addf %14, %17 : vector<1x8x1xf32>
    %19 = math.rsqrt %18 : vector<1x8x1xf32>
    %20 = vector.broadcast %19 : vector<1x8x1xf32> to vector<1x8x32xf32>
    %21 = arith.mulf %16, %20 : vector<1x8x32xf32>
    %22 = vector.shape_cast %2 : vector<1x32xf32> to vector<1x1x32xf32>
    %23 = vector.broadcast %22 : vector<1x1x32xf32> to vector<1x8x32xf32>
    %24 = arith.mulf %21, %23 : vector<1x8x32xf32>
    %25 = vector.shape_cast %3 : vector<1x32xf32> to vector<1x1x32xf32>
    %26 = vector.broadcast %25 : vector<1x1x32xf32> to vector<1x8x32xf32>
    %27 = arith.addf %24, %26 : vector<1x8x32xf32>
    %c0_10 = arith.constant 0 : index
    %c0_11 = arith.constant 0 : index
    %c0_12 = arith.constant 0 : index
    %28 = vector.load %arg2[%c0_10, %c0_11, %c0_12] : memref<1x1x8xbf16, #tpu.memory_space<vmem>>, vector<1x1x8xbf16>
    %29 = arith.extf %28 : vector<1x1x8xbf16> to vector<1x1x8xf32>
    %cst_13 = arith.constant 1.000000e+00 : f32
    %30 = vector.broadcast %cst_13 : f32 to vector<1x1x8xf32>
    %31 = arith.subf %30, %29 : vector<1x1x8xf32>
    %cst_14 = arith.constant -1.000000e+04 : f32
    %32 = vector.broadcast %cst_14 : f32 to vector<1x1x8xf32>
    %33 = arith.mulf %31, %32 : vector<1x1x8xf32>
    %34 = vector.shape_cast %33 : vector<1x1x8xf32> to vector<1x1x8xf32>
    %35 = vector.broadcast %34 : vector<1x1x8xf32> to vector<1x8x8xf32>
    %36 = arith.truncf %27 : vector<1x8x32xf32> to vector<1x8x32xbf16>
    %37 = vector.shape_cast %36 : vector<1x8x32xbf16> to vector<8x32xbf16>
    %c0_15 = arith.constant 0 : index
    %c0_16 = arith.constant 0 : index
    %c0_17 = arith.constant 0 : index
    %38 = vector.load %arg5[%c0_15, %c0_16, %c0_17] : memref<2x32x96xbf16, #tpu.memory_space<vmem>>, vector<1x32x96xbf16>
    %39 = vector.shape_cast %38 : vector<1x32x96xbf16> to vector<32x96xbf16>
    %cst_18 = arith.constant dense<0.000000e+00> : vector<8x96xf32>
    %40 = tpu.matmul %37, %39, %cst_18 {dimension_numbers = #tpu.dot_dimension_numbers<[1], [0], [0], [1], [0, 0, 1, 1], [], []>} : vector<8x32xbf16>, vector<32x96xbf16>, vector<8x96xf32> -> vector<8x96xf32>
    %c0_19 = arith.constant 0 : index
    %c0_20 = arith.constant 0 : index
    %c0_21 = arith.constant 0 : index
    %41 = vector.load %arg6[%c0_19, %c0_20, %c0_21] : memref<2x1x96xf32, #tpu.memory_space<vmem>>, vector<1x1x96xf32>
    %42 = vector.shape_cast %41 : vector<1x1x96xf32> to vector<1x96xf32>
    %43 = vector.broadcast %42 : vector<1x96xf32> to vector<8x96xf32>
    %44 = arith.addf %40, %43 : vector<8x96xf32>
    %45 = vector.shape_cast %44 : vector<8x96xf32> to vector<1x8x96xf32>
    %46 = arith.truncf %45 : vector<1x8x96xf32> to vector<1x8x96xbf16>
    %47 = vector.extract_strided_slice %46 {offsets = [0, 0, 0], sizes = [1, 8, 8], strides = [1, 1, 1]} : vector<1x8x96xbf16> to vector<1x8x8xbf16>
    %48 = vector.extract_strided_slice %46 {offsets = [0, 0, 32], sizes = [1, 8, 8], strides = [1, 1, 1]} : vector<1x8x96xbf16> to vector<1x8x8xbf16>
    %49 = vector.extract_strided_slice %46 {offsets = [0, 0, 64], sizes = [1, 8, 8], strides = [1, 1, 1]} : vector<1x8x96xbf16> to vector<1x8x8xbf16>
    "tpu.trace_start"() <{level = 10 : i32, message = "rqd,rkd->rqk"}> : () -> ()
    %cst_22 = arith.constant dense<0.000000e+00> : vector<1x8x8xf32>
    %50 = tpu.matmul %47, %48, %cst_22 {dimension_numbers = #tpu.dot_dimension_numbers<[2], [2], [1], [1], [0, 0, 0, 1, 1, 1], [0], [0]>} : vector<1x8x8xbf16>, vector<1x8x8xbf16>, vector<1x8x8xf32> -> vector<1x8x8xf32>
    "tpu.trace_stop"() : () -> ()
    %51 = arith.addf %50, %35 : vector<1x8x8xf32>
    %cst_23 = arith.constant dense<0xFF800000> : vector<1x8xf32>
    %52 = vector.multi_reduction <maximumf>, %51, %cst_23 [2] : vector<1x8x8xf32> to vector<1x8xf32>
    %53 = vector.shape_cast %52 : vector<1x8xf32> to vector<1x8x1xf32>
    %54 = vector.broadcast %53 : vector<1x8x1xf32> to vector<1x8x8xf32>
    %55 = arith.subf %51, %54 : vector<1x8x8xf32>
    %56 = math.exp %55 : vector<1x8x8xf32>
    %cst_24 = arith.constant dense<0.000000e+00> : vector<1x8xf32>
    %57 = vector.multi_reduction <add>, %56, %cst_24 [2] : vector<1x8x8xf32> to vector<1x8xf32>
    %58 = vector.shape_cast %57 : vector<1x8xf32> to vector<1x8x1xf32>
    %59 = vector.broadcast %58 : vector<1x8x1xf32> to vector<1x8x8xf32>
    %60 = arith.divf %56, %59 : vector<1x8x8xf32>
    %61 = arith.truncf %60 : vector<1x8x8xf32> to vector<1x8x8xbf16>
    "tpu.trace_start"() <{level = 10 : i32, message = "rqk,rkd->rqd"}> : () -> ()
    %cst_25 = arith.constant dense<0.000000e+00> : vector<1x8x8xf32>
    %62 = tpu.matmul %61, %49, %cst_25 {dimension_numbers = #tpu.dot_dimension_numbers<[2], [1], [1], [2], [0, 0, 0, 1, 1, 2], [0], [0]>} : vector<1x8x8xbf16>, vector<1x8x8xbf16>, vector<1x8x8xf32> -> vector<1x8x8xf32>
    "tpu.trace_stop"() : () -> ()
    %63 = vector.extract_strided_slice %46 {offsets = [0, 0, 8], sizes = [1, 8, 8], strides = [1, 1, 1]} : vector<1x8x96xbf16> to vector<1x8x8xbf16>
    %64 = vector.extract_strided_slice %46 {offsets = [0, 0, 40], sizes = [1, 8, 8], strides = [1, 1, 1]} : vector<1x8x96xbf16> to vector<1x8x8xbf16>
    %65 = vector.extract_strided_slice %46 {offsets = [0, 0, 72], sizes = [1, 8, 8], strides = [1, 1, 1]} : vector<1x8x96xbf16> to vector<1x8x8xbf16>
    "tpu.trace_start"() <{level = 10 : i32, message = "rqd,rkd->rqk"}> : () -> ()
    %cst_26 = arith.constant dense<0.000000e+00> : vector<1x8x8xf32>
    %66 = tpu.matmul %63, %64, %cst_26 {dimension_numbers = #tpu.dot_dimension_numbers<[2], [2], [1], [1], [0, 0, 0, 1, 1, 1], [0], [0]>} : vector<1x8x8xbf16>, vector<1x8x8xbf16>, vector<1x8x8xf32> -> vector<1x8x8xf32>
    "tpu.trace_stop"() : () -> ()
    %67 = arith.addf %66, %35 : vector<1x8x8xf32>
    %cst_27 = arith.constant dense<0xFF800000> : vector<1x8xf32>
    %68 = vector.multi_reduction <maximumf>, %67, %cst_27 [2] : vector<1x8x8xf32> to vector<1x8xf32>
    %69 = vector.shape_cast %68 : vector<1x8xf32> to vector<1x8x1xf32>
    %70 = vector.broadcast %69 : vector<1x8x1xf32> to vector<1x8x8xf32>
    %71 = arith.subf %67, %70 : vector<1x8x8xf32>
    %72 = math.exp %71 : vector<1x8x8xf32>
    %cst_28 = arith.constant dense<0.000000e+00> : vector<1x8xf32>
    %73 = vector.multi_reduction <add>, %72, %cst_28 [2] : vector<1x8x8xf32> to vector<1x8xf32>
    %74 = vector.shape_cast %73 : vector<1x8xf32> to vector<1x8x1xf32>
    %75 = vector.broadcast %74 : vector<1x8x1xf32> to vector<1x8x8xf32>
    %76 = arith.divf %72, %75 : vector<1x8x8xf32>
    %77 = arith.truncf %76 : vector<1x8x8xf32> to vector<1x8x8xbf16>
    "tpu.trace_start"() <{level = 10 : i32, message = "rqk,rkd->rqd"}> : () -> ()
    %cst_29 = arith.constant dense<0.000000e+00> : vector<1x8x8xf32>
    %78 = tpu.matmul %77, %65, %cst_29 {dimension_numbers = #tpu.dot_dimension_numbers<[2], [1], [1], [2], [0, 0, 0, 1, 1, 2], [0], [0]>} : vector<1x8x8xbf16>, vector<1x8x8xbf16>, vector<1x8x8xf32> -> vector<1x8x8xf32>
    "tpu.trace_stop"() : () -> ()
    %79 = vector.extract_strided_slice %46 {offsets = [0, 0, 16], sizes = [1, 8, 8], strides = [1, 1, 1]} : vector<1x8x96xbf16> to vector<1x8x8xbf16>
    %80 = vector.extract_strided_slice %46 {offsets = [0, 0, 48], sizes = [1, 8, 8], strides = [1, 1, 1]} : vector<1x8x96xbf16> to vector<1x8x8xbf16>
    %81 = vector.extract_strided_slice %46 {offsets = [0, 0, 80], sizes = [1, 8, 8], strides = [1, 1, 1]} : vector<1x8x96xbf16> to vector<1x8x8xbf16>
    "tpu.trace_start"() <{level = 10 : i32, message = "rqd,rkd->rqk"}> : () -> ()
    %cst_30 = arith.constant dense<0.000000e+00> : vector<1x8x8xf32>
    %82 = tpu.matmul %79, %80, %cst_30 {dimension_numbers = #tpu.dot_dimension_numbers<[2], [2], [1], [1], [0, 0, 0, 1, 1, 1], [0], [0]>} : vector<1x8x8xbf16>, vector<1x8x8xbf16>, vector<1x8x8xf32> -> vector<1x8x8xf32>
    "tpu.trace_stop"() : () -> ()
    %83 = arith.addf %82, %35 : vector<1x8x8xf32>
    %cst_31 = arith.constant dense<0xFF800000> : vector<1x8xf32>
    %84 = vector.multi_reduction <maximumf>, %83, %cst_31 [2] : vector<1x8x8xf32> to vector<1x8xf32>
    %85 = vector.shape_cast %84 : vector<1x8xf32> to vector<1x8x1xf32>
    %86 = vector.broadcast %85 : vector<1x8x1xf32> to vector<1x8x8xf32>
    %87 = arith.subf %83, %86 : vector<1x8x8xf32>
    %88 = math.exp %87 : vector<1x8x8xf32>
    %cst_32 = arith.constant dense<0.000000e+00> : vector<1x8xf32>
    %89 = vector.multi_reduction <add>, %88, %cst_32 [2] : vector<1x8x8xf32> to vector<1x8xf32>
    %90 = vector.shape_cast %89 : vector<1x8xf32> to vector<1x8x1xf32>
    %91 = vector.broadcast %90 : vector<1x8x1xf32> to vector<1x8x8xf32>
    %92 = arith.divf %88, %91 : vector<1x8x8xf32>
    %93 = arith.truncf %92 : vector<1x8x8xf32> to vector<1x8x8xbf16>
    "tpu.trace_start"() <{level = 10 : i32, message = "rqk,rkd->rqd"}> : () -> ()
    %cst_33 = arith.constant dense<0.000000e+00> : vector<1x8x8xf32>
    %94 = tpu.matmul %93, %81, %cst_33 {dimension_numbers = #tpu.dot_dimension_numbers<[2], [1], [1], [2], [0, 0, 0, 1, 1, 2], [0], [0]>} : vector<1x8x8xbf16>, vector<1x8x8xbf16>, vector<1x8x8xf32> -> vector<1x8x8xf32>
    "tpu.trace_stop"() : () -> ()
    %95 = vector.extract_strided_slice %46 {offsets = [0, 0, 24], sizes = [1, 8, 8], strides = [1, 1, 1]} : vector<1x8x96xbf16> to vector<1x8x8xbf16>
    %96 = vector.extract_strided_slice %46 {offsets = [0, 0, 56], sizes = [1, 8, 8], strides = [1, 1, 1]} : vector<1x8x96xbf16> to vector<1x8x8xbf16>
    %97 = vector.extract_strided_slice %46 {offsets = [0, 0, 88], sizes = [1, 8, 8], strides = [1, 1, 1]} : vector<1x8x96xbf16> to vector<1x8x8xbf16>
    "tpu.trace_start"() <{level = 10 : i32, message = "rqd,rkd->rqk"}> : () -> ()
    %cst_34 = arith.constant dense<0.000000e+00> : vector<1x8x8xf32>
    %98 = tpu.matmul %95, %96, %cst_34 {dimension_numbers = #tpu.dot_dimension_numbers<[2], [2], [1], [1], [0, 0, 0, 1, 1, 1], [0], [0]>} : vector<1x8x8xbf16>, vector<1x8x8xbf16>, vector<1x8x8xf32> -> vector<1x8x8xf32>
    "tpu.trace_stop"() : () -> ()
    %99 = arith.addf %98, %35 : vector<1x8x8xf32>
    %cst_35 = arith.constant dense<0xFF800000> : vector<1x8xf32>
    %100 = vector.multi_reduction <maximumf>, %99, %cst_35 [2] : vector<1x8x8xf32> to vector<1x8xf32>
    %101 = vector.shape_cast %100 : vector<1x8xf32> to vector<1x8x1xf32>
    %102 = vector.broadcast %101 : vector<1x8x1xf32> to vector<1x8x8xf32>
    %103 = arith.subf %99, %102 : vector<1x8x8xf32>
    %104 = math.exp %103 : vector<1x8x8xf32>
    %cst_36 = arith.constant dense<0.000000e+00> : vector<1x8xf32>
    %105 = vector.multi_reduction <add>, %104, %cst_36 [2] : vector<1x8x8xf32> to vector<1x8xf32>
    %106 = vector.shape_cast %105 : vector<1x8xf32> to vector<1x8x1xf32>
    %107 = vector.broadcast %106 : vector<1x8x1xf32> to vector<1x8x8xf32>
    %108 = arith.divf %104, %107 : vector<1x8x8xf32>
    %109 = arith.truncf %108 : vector<1x8x8xf32> to vector<1x8x8xbf16>
    "tpu.trace_start"() <{level = 10 : i32, message = "rqk,rkd->rqd"}> : () -> ()
    %cst_37 = arith.constant dense<0.000000e+00> : vector<1x8x8xf32>
    %110 = tpu.matmul %109, %97, %cst_37 {dimension_numbers = #tpu.dot_dimension_numbers<[2], [1], [1], [2], [0, 0, 0, 1, 1, 2], [0], [0]>} : vector<1x8x8xbf16>, vector<1x8x8xbf16>, vector<1x8x8xf32> -> vector<1x8x8xf32>
    "tpu.trace_stop"() : () -> ()
    %111 = tpu.concatenate %62, %78, %94, %110 in 2 : vector<1x8x8xf32>, vector<1x8x8xf32>, vector<1x8x8xf32>, vector<1x8x8xf32> -> vector<1x8x32xf32>
    %112 = arith.truncf %111 : vector<1x8x32xf32> to vector<1x8x32xbf16>
    %113 = vector.shape_cast %112 : vector<1x8x32xbf16> to vector<8x32xbf16>
    %c0_38 = arith.constant 0 : index
    %c0_39 = arith.constant 0 : index
    %c0_40 = arith.constant 0 : index
    %114 = vector.load %arg7[%c0_38, %c0_39, %c0_40] : memref<2x32x32xbf16, #tpu.memory_space<vmem>>, vector<1x32x32xbf16>
    %115 = vector.shape_cast %114 : vector<1x32x32xbf16> to vector<32x32xbf16>
    %cst_41 = arith.constant dense<0.000000e+00> : vector<8x32xf32>
    %116 = tpu.matmul %113, %115, %cst_41 {dimension_numbers = #tpu.dot_dimension_numbers<[1], [0], [0], [1], [0, 0, 1, 1], [], []>} : vector<8x32xbf16>, vector<32x32xbf16>, vector<8x32xf32> -> vector<8x32xf32>
    %117 = vector.shape_cast %116 : vector<8x32xf32> to vector<1x8x32xf32>
    %c0_42 = arith.constant 0 : index
    %c0_43 = arith.constant 0 : index
    %c0_44 = arith.constant 0 : index
    %118 = vector.load %arg8[%c0_42, %c0_43, %c0_44] : memref<2x1x32xf32, #tpu.memory_space<vmem>>, vector<1x1x32xf32>
    %119 = vector.shape_cast %118 : vector<1x1x32xf32> to vector<1x32xf32>
    %120 = vector.shape_cast %119 : vector<1x32xf32> to vector<1x1x32xf32>
    %121 = vector.broadcast %120 : vector<1x1x32xf32> to vector<1x8x32xf32>
    %122 = arith.addf %117, %121 : vector<1x8x32xf32>
    %123 = arith.addf %122, %27 : vector<1x8x32xf32>
    %c0_45 = arith.constant 0 : index
    %c0_46 = arith.constant 0 : index
    %c0_47 = arith.constant 0 : index
    %124 = vector.load %arg9[%c0_45, %c0_46, %c0_47] : memref<2x1x32xf32, #tpu.memory_space<vmem>>, vector<1x1x32xf32>
    %125 = vector.shape_cast %124 : vector<1x1x32xf32> to vector<1x32xf32>
    %c0_48 = arith.constant 0 : index
    %c0_49 = arith.constant 0 : index
    %c0_50 = arith.constant 0 : index
    %126 = vector.load %arg10[%c0_48, %c0_49, %c0_50] : memref<2x1x32xf32, #tpu.memory_space<vmem>>, vector<1x1x32xf32>
    %127 = vector.shape_cast %126 : vector<1x1x32xf32> to vector<1x32xf32>
    %cst_51 = arith.constant dense<0.000000e+00> : vector<1x8xf32>
    %128 = vector.multi_reduction <add>, %123, %cst_51 [2] : vector<1x8x32xf32> to vector<1x8xf32>
    %129 = vector.shape_cast %128 : vector<1x8xf32> to vector<1x8x1xf32>
    %cst_52 = arith.constant 3.200000e+01 : f32
    %130 = vector.broadcast %cst_52 : f32 to vector<1x8x1xf32>
    %131 = arith.divf %129, %130 : vector<1x8x1xf32>
    %132 = vector.broadcast %131 : vector<1x8x1xf32> to vector<1x8x32xf32>
    %133 = arith.subf %123, %132 : vector<1x8x32xf32>
    %134 = arith.mulf %133, %133 : vector<1x8x32xf32>
    %cst_53 = arith.constant dense<0.000000e+00> : vector<1x8xf32>
    %135 = vector.multi_reduction <add>, %134, %cst_53 [2] : vector<1x8x32xf32> to vector<1x8xf32>
    %136 = vector.shape_cast %135 : vector<1x8xf32> to vector<1x8x1xf32>
    %cst_54 = arith.constant 3.200000e+01 : f32
    %137 = vector.broadcast %cst_54 : f32 to vector<1x8x1xf32>
    %138 = arith.divf %136, %137 : vector<1x8x1xf32>
    %139 = vector.broadcast %131 : vector<1x8x1xf32> to vector<1x8x32xf32>
    %140 = arith.subf %123, %139 : vector<1x8x32xf32>
    %cst_55 = arith.constant 9.99999996E-13 : f32
    %141 = vector.broadcast %cst_55 : f32 to vector<1x8x1xf32>
    %142 = arith.addf %138, %141 : vector<1x8x1xf32>
    %143 = math.rsqrt %142 : vector<1x8x1xf32>
    %144 = vector.broadcast %143 : vector<1x8x1xf32> to vector<1x8x32xf32>
    %145 = arith.mulf %140, %144 : vector<1x8x32xf32>
    %146 = vector.shape_cast %125 : vector<1x32xf32> to vector<1x1x32xf32>
    %147 = vector.broadcast %146 : vector<1x1x32xf32> to vector<1x8x32xf32>
    %148 = arith.mulf %145, %147 : vector<1x8x32xf32>
    %149 = vector.shape_cast %127 : vector<1x32xf32> to vector<1x1x32xf32>
    %150 = vector.broadcast %149 : vector<1x1x32xf32> to vector<1x8x32xf32>
    %151 = arith.addf %148, %150 : vector<1x8x32xf32>
    %152 = arith.truncf %151 : vector<1x8x32xf32> to vector<1x8x32xbf16>
    %153 = vector.shape_cast %152 : vector<1x8x32xbf16> to vector<8x32xbf16>
    %c0_56 = arith.constant 0 : index
    %c0_57 = arith.constant 0 : index
    %c0_58 = arith.constant 0 : index
    %154 = vector.load %arg11[%c0_56, %c0_57, %c0_58] : memref<2x32x64xbf16, #tpu.memory_space<vmem>>, vector<1x32x64xbf16>
    %155 = vector.shape_cast %154 : vector<1x32x64xbf16> to vector<32x64xbf16>
    %cst_59 = arith.constant dense<0.000000e+00> : vector<8x64xf32>
    %156 = tpu.matmul %153, %155, %cst_59 {dimension_numbers = #tpu.dot_dimension_numbers<[1], [0], [0], [1], [0, 0, 1, 1], [], []>} : vector<8x32xbf16>, vector<32x64xbf16>, vector<8x64xf32> -> vector<8x64xf32>
    %c0_60 = arith.constant 0 : index
    %c0_61 = arith.constant 0 : index
    %c0_62 = arith.constant 0 : index
    %157 = vector.load %arg12[%c0_60, %c0_61, %c0_62] : memref<2x1x64xf32, #tpu.memory_space<vmem>>, vector<1x1x64xf32>
    %158 = vector.shape_cast %157 : vector<1x1x64xf32> to vector<1x64xf32>
    %159 = vector.broadcast %158 : vector<1x64xf32> to vector<8x64xf32>
    %160 = arith.addf %156, %159 : vector<8x64xf32>
    %161 = arith.mulf %160, %160 : vector<8x64xf32>
    %162 = arith.mulf %160, %161 : vector<8x64xf32>
    %cst_63 = arith.constant 4.471500e-02 : f32
    %163 = vector.broadcast %cst_63 : f32 to vector<8x64xf32>
    %164 = arith.mulf %163, %162 : vector<8x64xf32>
    %165 = arith.addf %160, %164 : vector<8x64xf32>
    %cst_64 = arith.constant 0.797884583 : f32
    %166 = vector.broadcast %cst_64 : f32 to vector<8x64xf32>
    %167 = arith.mulf %166, %165 : vector<8x64xf32>
    %168 = math.tanh %167 : vector<8x64xf32>
    %cst_65 = arith.constant 1.000000e+00 : f32
    %169 = vector.broadcast %cst_65 : f32 to vector<8x64xf32>
    %170 = arith.addf %169, %168 : vector<8x64xf32>
    %cst_66 = arith.constant 5.000000e-01 : f32
    %171 = vector.broadcast %cst_66 : f32 to vector<8x64xf32>
    %172 = arith.mulf %171, %170 : vector<8x64xf32>
    %173 = arith.mulf %160, %172 : vector<8x64xf32>
    %174 = arith.truncf %173 : vector<8x64xf32> to vector<8x64xbf16>
    %c0_67 = arith.constant 0 : index
    %c0_68 = arith.constant 0 : index
    %c0_69 = arith.constant 0 : index
    %175 = vector.load %arg13[%c0_67, %c0_68, %c0_69] : memref<2x64x32xbf16, #tpu.memory_space<vmem>>, vector<1x64x32xbf16>
    %176 = vector.shape_cast %175 : vector<1x64x32xbf16> to vector<64x32xbf16>
    %cst_70 = arith.constant dense<0.000000e+00> : vector<8x32xf32>
    %177 = tpu.matmul %174, %176, %cst_70 {dimension_numbers = #tpu.dot_dimension_numbers<[1], [0], [0], [1], [0, 0, 1, 1], [], []>} : vector<8x64xbf16>, vector<64x32xbf16>, vector<8x32xf32> -> vector<8x32xf32>
    %178 = vector.shape_cast %177 : vector<8x32xf32> to vector<1x8x32xf32>
    %c0_71 = arith.constant 0 : index
    %c0_72 = arith.constant 0 : index
    %c0_73 = arith.constant 0 : index
    %179 = vector.load %arg14[%c0_71, %c0_72, %c0_73] : memref<2x1x32xf32, #tpu.memory_space<vmem>>, vector<1x1x32xf32>
    %180 = vector.shape_cast %179 : vector<1x1x32xf32> to vector<1x32xf32>
    %181 = vector.shape_cast %180 : vector<1x32xf32> to vector<1x1x32xf32>
    %182 = vector.broadcast %181 : vector<1x1x32xf32> to vector<1x8x32xf32>
    %183 = arith.addf %178, %182 : vector<1x8x32xf32>
    %184 = arith.addf %183, %151 : vector<1x8x32xf32>
    %c0_74 = arith.constant 0 : index
    %c0_75 = arith.constant 0 : index
    %c0_76 = arith.constant 0 : index
    %185 = vector.load %arg15[%c0_74, %c0_75, %c0_76] : memref<2x1x32xf32, #tpu.memory_space<vmem>>, vector<1x1x32xf32>
    %186 = vector.shape_cast %185 : vector<1x1x32xf32> to vector<1x32xf32>
    %c0_77 = arith.constant 0 : index
    %c0_78 = arith.constant 0 : index
    %c0_79 = arith.constant 0 : index
    %187 = vector.load %arg16[%c0_77, %c0_78, %c0_79] : memref<2x1x32xf32, #tpu.memory_space<vmem>>, vector<1x1x32xf32>
    %188 = vector.shape_cast %187 : vector<1x1x32xf32> to vector<1x32xf32>
    %cst_80 = arith.constant dense<0.000000e+00> : vector<1x8xf32>
    %189 = vector.multi_reduction <add>, %184, %cst_80 [2] : vector<1x8x32xf32> to vector<1x8xf32>
    %190 = vector.shape_cast %189 : vector<1x8xf32> to vector<1x8x1xf32>
    %cst_81 = arith.constant 3.200000e+01 : f32
    %191 = vector.broadcast %cst_81 : f32 to vector<1x8x1xf32>
    %192 = arith.divf %190, %191 : vector<1x8x1xf32>
    %193 = vector.broadcast %192 : vector<1x8x1xf32> to vector<1x8x32xf32>
    %194 = arith.subf %184, %193 : vector<1x8x32xf32>
    %195 = arith.mulf %194, %194 : vector<1x8x32xf32>
    %cst_82 = arith.constant dense<0.000000e+00> : vector<1x8xf32>
    %196 = vector.multi_reduction <add>, %195, %cst_82 [2] : vector<1x8x32xf32> to vector<1x8xf32>
    %197 = vector.shape_cast %196 : vector<1x8xf32> to vector<1x8x1xf32>
    %cst_83 = arith.constant 3.200000e+01 : f32
    %198 = vector.broadcast %cst_83 : f32 to vector<1x8x1xf32>
    %199 = arith.divf %197, %198 : vector<1x8x1xf32>
    %200 = vector.broadcast %192 : vector<1x8x1xf32> to vector<1x8x32xf32>
    %201 = arith.subf %184, %200 : vector<1x8x32xf32>
    %cst_84 = arith.constant 9.99999996E-13 : f32
    %202 = vector.broadcast %cst_84 : f32 to vector<1x8x1xf32>
    %203 = arith.addf %199, %202 : vector<1x8x1xf32>
    %204 = math.rsqrt %203 : vector<1x8x1xf32>
    %205 = vector.broadcast %204 : vector<1x8x1xf32> to vector<1x8x32xf32>
    %206 = arith.mulf %201, %205 : vector<1x8x32xf32>
    %207 = vector.shape_cast %186 : vector<1x32xf32> to vector<1x1x32xf32>
    %208 = vector.broadcast %207 : vector<1x1x32xf32> to vector<1x8x32xf32>
    %209 = arith.mulf %206, %208 : vector<1x8x32xf32>
    %210 = vector.shape_cast %188 : vector<1x32xf32> to vector<1x1x32xf32>
    %211 = vector.broadcast %210 : vector<1x1x32xf32> to vector<1x8x32xf32>
    %212 = arith.addf %209, %211 : vector<1x8x32xf32>
    %213 = arith.truncf %212 : vector<1x8x32xf32> to vector<1x8x32xbf16>
    %214 = vector.shape_cast %213 : vector<1x8x32xbf16> to vector<8x32xbf16>
    %c1 = arith.constant 1 : index
    %c0_85 = arith.constant 0 : index
    %c0_86 = arith.constant 0 : index
    %215 = vector.load %arg5[%c1, %c0_85, %c0_86] : memref<2x32x96xbf16, #tpu.memory_space<vmem>>, vector<1x32x96xbf16>
    %216 = vector.shape_cast %215 : vector<1x32x96xbf16> to vector<32x96xbf16>
    %cst_87 = arith.constant dense<0.000000e+00> : vector<8x96xf32>
    %217 = tpu.matmul %214, %216, %cst_87 {dimension_numbers = #tpu.dot_dimension_numbers<[1], [0], [0], [1], [0, 0, 1, 1], [], []>} : vector<8x32xbf16>, vector<32x96xbf16>, vector<8x96xf32> -> vector<8x96xf32>
    %c1_88 = arith.constant 1 : index
    %c0_89 = arith.constant 0 : index
    %c0_90 = arith.constant 0 : index
    %218 = vector.load %arg6[%c1_88, %c0_89, %c0_90] : memref<2x1x96xf32, #tpu.memory_space<vmem>>, vector<1x1x96xf32>
    %219 = vector.shape_cast %218 : vector<1x1x96xf32> to vector<1x96xf32>
    %220 = vector.broadcast %219 : vector<1x96xf32> to vector<8x96xf32>
    %221 = arith.addf %217, %220 : vector<8x96xf32>
    %222 = vector.shape_cast %221 : vector<8x96xf32> to vector<1x8x96xf32>
    %223 = arith.truncf %222 : vector<1x8x96xf32> to vector<1x8x96xbf16>
    %224 = vector.extract_strided_slice %223 {offsets = [0, 0, 0], sizes = [1, 8, 8], strides = [1, 1, 1]} : vector<1x8x96xbf16> to vector<1x8x8xbf16>
    %225 = vector.extract_strided_slice %223 {offsets = [0, 0, 32], sizes = [1, 8, 8], strides = [1, 1, 1]} : vector<1x8x96xbf16> to vector<1x8x8xbf16>
    %226 = vector.extract_strided_slice %223 {offsets = [0, 0, 64], sizes = [1, 8, 8], strides = [1, 1, 1]} : vector<1x8x96xbf16> to vector<1x8x8xbf16>
    "tpu.trace_start"() <{level = 10 : i32, message = "rqd,rkd->rqk"}> : () -> ()
    %cst_91 = arith.constant dense<0.000000e+00> : vector<1x8x8xf32>
    %227 = tpu.matmul %224, %225, %cst_91 {dimension_numbers = #tpu.dot_dimension_numbers<[2], [2], [1], [1], [0, 0, 0, 1, 1, 1], [0], [0]>} : vector<1x8x8xbf16>, vector<1x8x8xbf16>, vector<1x8x8xf32> -> vector<1x8x8xf32>
    "tpu.trace_stop"() : () -> ()
    %228 = arith.addf %227, %35 : vector<1x8x8xf32>
    %cst_92 = arith.constant dense<0xFF800000> : vector<1x8xf32>
    %229 = vector.multi_reduction <maximumf>, %228, %cst_92 [2] : vector<1x8x8xf32> to vector<1x8xf32>
    %230 = vector.shape_cast %229 : vector<1x8xf32> to vector<1x8x1xf32>
    %231 = vector.broadcast %230 : vector<1x8x1xf32> to vector<1x8x8xf32>
    %232 = arith.subf %228, %231 : vector<1x8x8xf32>
    %233 = math.exp %232 : vector<1x8x8xf32>
    %cst_93 = arith.constant dense<0.000000e+00> : vector<1x8xf32>
    %234 = vector.multi_reduction <add>, %233, %cst_93 [2] : vector<1x8x8xf32> to vector<1x8xf32>
    %235 = vector.shape_cast %234 : vector<1x8xf32> to vector<1x8x1xf32>
    %236 = vector.broadcast %235 : vector<1x8x1xf32> to vector<1x8x8xf32>
    %237 = arith.divf %233, %236 : vector<1x8x8xf32>
    %238 = arith.truncf %237 : vector<1x8x8xf32> to vector<1x8x8xbf16>
    "tpu.trace_start"() <{level = 10 : i32, message = "rqk,rkd->rqd"}> : () -> ()
    %cst_94 = arith.constant dense<0.000000e+00> : vector<1x8x8xf32>
    %239 = tpu.matmul %238, %226, %cst_94 {dimension_numbers = #tpu.dot_dimension_numbers<[2], [1], [1], [2], [0, 0, 0, 1, 1, 2], [0], [0]>} : vector<1x8x8xbf16>, vector<1x8x8xbf16>, vector<1x8x8xf32> -> vector<1x8x8xf32>
    "tpu.trace_stop"() : () -> ()
    %240 = vector.extract_strided_slice %223 {offsets = [0, 0, 8], sizes = [1, 8, 8], strides = [1, 1, 1]} : vector<1x8x96xbf16> to vector<1x8x8xbf16>
    %241 = vector.extract_strided_slice %223 {offsets = [0, 0, 40], sizes = [1, 8, 8], strides = [1, 1, 1]} : vector<1x8x96xbf16> to vector<1x8x8xbf16>
    %242 = vector.extract_strided_slice %223 {offsets = [0, 0, 72], sizes = [1, 8, 8], strides = [1, 1, 1]} : vector<1x8x96xbf16> to vector<1x8x8xbf16>
    "tpu.trace_start"() <{level = 10 : i32, message = "rqd,rkd->rqk"}> : () -> ()
    %cst_95 = arith.constant dense<0.000000e+00> : vector<1x8x8xf32>
    %243 = tpu.matmul %240, %241, %cst_95 {dimension_numbers = #tpu.dot_dimension_numbers<[2], [2], [1], [1], [0, 0, 0, 1, 1, 1], [0], [0]>} : vector<1x8x8xbf16>, vector<1x8x8xbf16>, vector<1x8x8xf32> -> vector<1x8x8xf32>
    "tpu.trace_stop"() : () -> ()
    %244 = arith.addf %243, %35 : vector<1x8x8xf32>
    %cst_96 = arith.constant dense<0xFF800000> : vector<1x8xf32>
    %245 = vector.multi_reduction <maximumf>, %244, %cst_96 [2] : vector<1x8x8xf32> to vector<1x8xf32>
    %246 = vector.shape_cast %245 : vector<1x8xf32> to vector<1x8x1xf32>
    %247 = vector.broadcast %246 : vector<1x8x1xf32> to vector<1x8x8xf32>
    %248 = arith.subf %244, %247 : vector<1x8x8xf32>
    %249 = math.exp %248 : vector<1x8x8xf32>
    %cst_97 = arith.constant dense<0.000000e+00> : vector<1x8xf32>
    %250 = vector.multi_reduction <add>, %249, %cst_97 [2] : vector<1x8x8xf32> to vector<1x8xf32>
    %251 = vector.shape_cast %250 : vector<1x8xf32> to vector<1x8x1xf32>
    %252 = vector.broadcast %251 : vector<1x8x1xf32> to vector<1x8x8xf32>
    %253 = arith.divf %249, %252 : vector<1x8x8xf32>
    %254 = arith.truncf %253 : vector<1x8x8xf32> to vector<1x8x8xbf16>
    "tpu.trace_start"() <{level = 10 : i32, message = "rqk,rkd->rqd"}> : () -> ()
    %cst_98 = arith.constant dense<0.000000e+00> : vector<1x8x8xf32>
    %255 = tpu.matmul %254, %242, %cst_98 {dimension_numbers = #tpu.dot_dimension_numbers<[2], [1], [1], [2], [0, 0, 0, 1, 1, 2], [0], [0]>} : vector<1x8x8xbf16>, vector<1x8x8xbf16>, vector<1x8x8xf32> -> vector<1x8x8xf32>
    "tpu.trace_stop"() : () -> ()
    %256 = vector.extract_strided_slice %223 {offsets = [0, 0, 16], sizes = [1, 8, 8], strides = [1, 1, 1]} : vector<1x8x96xbf16> to vector<1x8x8xbf16>
    %257 = vector.extract_strided_slice %223 {offsets = [0, 0, 48], sizes = [1, 8, 8], strides = [1, 1, 1]} : vector<1x8x96xbf16> to vector<1x8x8xbf16>
    %258 = vector.extract_strided_slice %223 {offsets = [0, 0, 80], sizes = [1, 8, 8], strides = [1, 1, 1]} : vector<1x8x96xbf16> to vector<1x8x8xbf16>
    "tpu.trace_start"() <{level = 10 : i32, message = "rqd,rkd->rqk"}> : () -> ()
    %cst_99 = arith.constant dense<0.000000e+00> : vector<1x8x8xf32>
    %259 = tpu.matmul %256, %257, %cst_99 {dimension_numbers = #tpu.dot_dimension_numbers<[2], [2], [1], [1], [0, 0, 0, 1, 1, 1], [0], [0]>} : vector<1x8x8xbf16>, vector<1x8x8xbf16>, vector<1x8x8xf32> -> vector<1x8x8xf32>
    "tpu.trace_stop"() : () -> ()
    %260 = arith.addf %259, %35 : vector<1x8x8xf32>
    %cst_100 = arith.constant dense<0xFF800000> : vector<1x8xf32>
    %261 = vector.multi_reduction <maximumf>, %260, %cst_100 [2] : vector<1x8x8xf32> to vector<1x8xf32>
    %262 = vector.shape_cast %261 : vector<1x8xf32> to vector<1x8x1xf32>
    %263 = vector.broadcast %262 : vector<1x8x1xf32> to vector<1x8x8xf32>
    %264 = arith.subf %260, %263 : vector<1x8x8xf32>
    %265 = math.exp %264 : vector<1x8x8xf32>
    %cst_101 = arith.constant dense<0.000000e+00> : vector<1x8xf32>
    %266 = vector.multi_reduction <add>, %265, %cst_101 [2] : vector<1x8x8xf32> to vector<1x8xf32>
    %267 = vector.shape_cast %266 : vector<1x8xf32> to vector<1x8x1xf32>
    %268 = vector.broadcast %267 : vector<1x8x1xf32> to vector<1x8x8xf32>
    %269 = arith.divf %265, %268 : vector<1x8x8xf32>
    %270 = arith.truncf %269 : vector<1x8x8xf32> to vector<1x8x8xbf16>
    "tpu.trace_start"() <{level = 10 : i32, message = "rqk,rkd->rqd"}> : () -> ()
    %cst_102 = arith.constant dense<0.000000e+00> : vector<1x8x8xf32>
    %271 = tpu.matmul %270, %258, %cst_102 {dimension_numbers = #tpu.dot_dimension_numbers<[2], [1], [1], [2], [0, 0, 0, 1, 1, 2], [0], [0]>} : vector<1x8x8xbf16>, vector<1x8x8xbf16>, vector<1x8x8xf32> -> vector<1x8x8xf32>
    "tpu.trace_stop"() : () -> ()
    %272 = vector.extract_strided_slice %223 {offsets = [0, 0, 24], sizes = [1, 8, 8], strides = [1, 1, 1]} : vector<1x8x96xbf16> to vector<1x8x8xbf16>
    %273 = vector.extract_strided_slice %223 {offsets = [0, 0, 56], sizes = [1, 8, 8], strides = [1, 1, 1]} : vector<1x8x96xbf16> to vector<1x8x8xbf16>
    %274 = vector.extract_strided_slice %223 {offsets = [0, 0, 88], sizes = [1, 8, 8], strides = [1, 1, 1]} : vector<1x8x96xbf16> to vector<1x8x8xbf16>
    "tpu.trace_start"() <{level = 10 : i32, message = "rqd,rkd->rqk"}> : () -> ()
    %cst_103 = arith.constant dense<0.000000e+00> : vector<1x8x8xf32>
    %275 = tpu.matmul %272, %273, %cst_103 {dimension_numbers = #tpu.dot_dimension_numbers<[2], [2], [1], [1], [0, 0, 0, 1, 1, 1], [0], [0]>} : vector<1x8x8xbf16>, vector<1x8x8xbf16>, vector<1x8x8xf32> -> vector<1x8x8xf32>
    "tpu.trace_stop"() : () -> ()
    %276 = arith.addf %275, %35 : vector<1x8x8xf32>
    %cst_104 = arith.constant dense<0xFF800000> : vector<1x8xf32>
    %277 = vector.multi_reduction <maximumf>, %276, %cst_104 [2] : vector<1x8x8xf32> to vector<1x8xf32>
    %278 = vector.shape_cast %277 : vector<1x8xf32> to vector<1x8x1xf32>
    %279 = vector.broadcast %278 : vector<1x8x1xf32> to vector<1x8x8xf32>
    %280 = arith.subf %276, %279 : vector<1x8x8xf32>
    %281 = math.exp %280 : vector<1x8x8xf32>
    %cst_105 = arith.constant dense<0.000000e+00> : vector<1x8xf32>
    %282 = vector.multi_reduction <add>, %281, %cst_105 [2] : vector<1x8x8xf32> to vector<1x8xf32>
    %283 = vector.shape_cast %282 : vector<1x8xf32> to vector<1x8x1xf32>
    %284 = vector.broadcast %283 : vector<1x8x1xf32> to vector<1x8x8xf32>
    %285 = arith.divf %281, %284 : vector<1x8x8xf32>
    %286 = arith.truncf %285 : vector<1x8x8xf32> to vector<1x8x8xbf16>
    "tpu.trace_start"() <{level = 10 : i32, message = "rqk,rkd->rqd"}> : () -> ()
    %cst_106 = arith.constant dense<0.000000e+00> : vector<1x8x8xf32>
    %287 = tpu.matmul %286, %274, %cst_106 {dimension_numbers = #tpu.dot_dimension_numbers<[2], [1], [1], [2], [0, 0, 0, 1, 1, 2], [0], [0]>} : vector<1x8x8xbf16>, vector<1x8x8xbf16>, vector<1x8x8xf32> -> vector<1x8x8xf32>
    "tpu.trace_stop"() : () -> ()
    %288 = tpu.concatenate %239, %255, %271, %287 in 2 : vector<1x8x8xf32>, vector<1x8x8xf32>, vector<1x8x8xf32>, vector<1x8x8xf32> -> vector<1x8x32xf32>
    %289 = arith.truncf %288 : vector<1x8x32xf32> to vector<1x8x32xbf16>
    %290 = vector.shape_cast %289 : vector<1x8x32xbf16> to vector<8x32xbf16>
    %c1_107 = arith.constant 1 : index
    %c0_108 = arith.constant 0 : index
    %c0_109 = arith.constant 0 : index
    %291 = vector.load %arg7[%c1_107, %c0_108, %c0_109] : memref<2x32x32xbf16, #tpu.memory_space<vmem>>, vector<1x32x32xbf16>
    %292 = vector.shape_cast %291 : vector<1x32x32xbf16> to vector<32x32xbf16>
    %cst_110 = arith.constant dense<0.000000e+00> : vector<8x32xf32>
    %293 = tpu.matmul %290, %292, %cst_110 {dimension_numbers = #tpu.dot_dimension_numbers<[1], [0], [0], [1], [0, 0, 1, 1], [], []>} : vector<8x32xbf16>, vector<32x32xbf16>, vector<8x32xf32> -> vector<8x32xf32>
    %294 = vector.shape_cast %293 : vector<8x32xf32> to vector<1x8x32xf32>
    %c1_111 = arith.constant 1 : index
    %c0_112 = arith.constant 0 : index
    %c0_113 = arith.constant 0 : index
    %295 = vector.load %arg8[%c1_111, %c0_112, %c0_113] : memref<2x1x32xf32, #tpu.memory_space<vmem>>, vector<1x1x32xf32>
    %296 = vector.shape_cast %295 : vector<1x1x32xf32> to vector<1x32xf32>
    %297 = vector.shape_cast %296 : vector<1x32xf32> to vector<1x1x32xf32>
    %298 = vector.broadcast %297 : vector<1x1x32xf32> to vector<1x8x32xf32>
    %299 = arith.addf %294, %298 : vector<1x8x32xf32>
    %300 = arith.addf %299, %212 : vector<1x8x32xf32>
    %c1_114 = arith.constant 1 : index
    %c0_115 = arith.constant 0 : index
    %c0_116 = arith.constant 0 : index
    %301 = vector.load %arg9[%c1_114, %c0_115, %c0_116] : memref<2x1x32xf32, #tpu.memory_space<vmem>>, vector<1x1x32xf32>
    %302 = vector.shape_cast %301 : vector<1x1x32xf32> to vector<1x32xf32>
    %c1_117 = arith.constant 1 : index
    %c0_118 = arith.constant 0 : index
    %c0_119 = arith.constant 0 : index
    %303 = vector.load %arg10[%c1_117, %c0_118, %c0_119] : memref<2x1x32xf32, #tpu.memory_space<vmem>>, vector<1x1x32xf32>
    %304 = vector.shape_cast %303 : vector<1x1x32xf32> to vector<1x32xf32>
    %cst_120 = arith.constant dense<0.000000e+00> : vector<1x8xf32>
    %305 = vector.multi_reduction <add>, %300, %cst_120 [2] : vector<1x8x32xf32> to vector<1x8xf32>
    %306 = vector.shape_cast %305 : vector<1x8xf32> to vector<1x8x1xf32>
    %cst_121 = arith.constant 3.200000e+01 : f32
    %307 = vector.broadcast %cst_121 : f32 to vector<1x8x1xf32>
    %308 = arith.divf %306, %307 : vector<1x8x1xf32>
    %309 = vector.broadcast %308 : vector<1x8x1xf32> to vector<1x8x32xf32>
    %310 = arith.subf %300, %309 : vector<1x8x32xf32>
    %311 = arith.mulf %310, %310 : vector<1x8x32xf32>
    %cst_122 = arith.constant dense<0.000000e+00> : vector<1x8xf32>
    %312 = vector.multi_reduction <add>, %311, %cst_122 [2] : vector<1x8x32xf32> to vector<1x8xf32>
    %313 = vector.shape_cast %312 : vector<1x8xf32> to vector<1x8x1xf32>
    %cst_123 = arith.constant 3.200000e+01 : f32
    %314 = vector.broadcast %cst_123 : f32 to vector<1x8x1xf32>
    %315 = arith.divf %313, %314 : vector<1x8x1xf32>
    %316 = vector.broadcast %308 : vector<1x8x1xf32> to vector<1x8x32xf32>
    %317 = arith.subf %300, %316 : vector<1x8x32xf32>
    %cst_124 = arith.constant 9.99999996E-13 : f32
    %318 = vector.broadcast %cst_124 : f32 to vector<1x8x1xf32>
    %319 = arith.addf %315, %318 : vector<1x8x1xf32>
    %320 = math.rsqrt %319 : vector<1x8x1xf32>
    %321 = vector.broadcast %320 : vector<1x8x1xf32> to vector<1x8x32xf32>
    %322 = arith.mulf %317, %321 : vector<1x8x32xf32>
    %323 = vector.shape_cast %302 : vector<1x32xf32> to vector<1x1x32xf32>
    %324 = vector.broadcast %323 : vector<1x1x32xf32> to vector<1x8x32xf32>
    %325 = arith.mulf %322, %324 : vector<1x8x32xf32>
    %326 = vector.shape_cast %304 : vector<1x32xf32> to vector<1x1x32xf32>
    %327 = vector.broadcast %326 : vector<1x1x32xf32> to vector<1x8x32xf32>
    %328 = arith.addf %325, %327 : vector<1x8x32xf32>
    %329 = arith.truncf %328 : vector<1x8x32xf32> to vector<1x8x32xbf16>
    %330 = vector.shape_cast %329 : vector<1x8x32xbf16> to vector<8x32xbf16>
    %c1_125 = arith.constant 1 : index
    %c0_126 = arith.constant 0 : index
    %c0_127 = arith.constant 0 : index
    %331 = vector.load %arg11[%c1_125, %c0_126, %c0_127] : memref<2x32x64xbf16, #tpu.memory_space<vmem>>, vector<1x32x64xbf16>
    %332 = vector.shape_cast %331 : vector<1x32x64xbf16> to vector<32x64xbf16>
    %cst_128 = arith.constant dense<0.000000e+00> : vector<8x64xf32>
    %333 = tpu.matmul %330, %332, %cst_128 {dimension_numbers = #tpu.dot_dimension_numbers<[1], [0], [0], [1], [0, 0, 1, 1], [], []>} : vector<8x32xbf16>, vector<32x64xbf16>, vector<8x64xf32> -> vector<8x64xf32>
    %c1_129 = arith.constant 1 : index
    %c0_130 = arith.constant 0 : index
    %c0_131 = arith.constant 0 : index
    %334 = vector.load %arg12[%c1_129, %c0_130, %c0_131] : memref<2x1x64xf32, #tpu.memory_space<vmem>>, vector<1x1x64xf32>
    %335 = vector.shape_cast %334 : vector<1x1x64xf32> to vector<1x64xf32>
    %336 = vector.broadcast %335 : vector<1x64xf32> to vector<8x64xf32>
    %337 = arith.addf %333, %336 : vector<8x64xf32>
    %338 = arith.mulf %337, %337 : vector<8x64xf32>
    %339 = arith.mulf %337, %338 : vector<8x64xf32>
    %cst_132 = arith.constant 4.471500e-02 : f32
    %340 = vector.broadcast %cst_132 : f32 to vector<8x64xf32>
    %341 = arith.mulf %340, %339 : vector<8x64xf32>
    %342 = arith.addf %337, %341 : vector<8x64xf32>
    %cst_133 = arith.constant 0.797884583 : f32
    %343 = vector.broadcast %cst_133 : f32 to vector<8x64xf32>
    %344 = arith.mulf %343, %342 : vector<8x64xf32>
    %345 = math.tanh %344 : vector<8x64xf32>
    %cst_134 = arith.constant 1.000000e+00 : f32
    %346 = vector.broadcast %cst_134 : f32 to vector<8x64xf32>
    %347 = arith.addf %346, %345 : vector<8x64xf32>
    %cst_135 = arith.constant 5.000000e-01 : f32
    %348 = vector.broadcast %cst_135 : f32 to vector<8x64xf32>
    %349 = arith.mulf %348, %347 : vector<8x64xf32>
    %350 = arith.mulf %337, %349 : vector<8x64xf32>
    %351 = arith.truncf %350 : vector<8x64xf32> to vector<8x64xbf16>
    %c1_136 = arith.constant 1 : index
    %c0_137 = arith.constant 0 : index
    %c0_138 = arith.constant 0 : index
    %352 = vector.load %arg13[%c1_136, %c0_137, %c0_138] : memref<2x64x32xbf16, #tpu.memory_space<vmem>>, vector<1x64x32xbf16>
    %353 = vector.shape_cast %352 : vector<1x64x32xbf16> to vector<64x32xbf16>
    %cst_139 = arith.constant dense<0.000000e+00> : vector<8x32xf32>
    %354 = tpu.matmul %351, %353, %cst_139 {dimension_numbers = #tpu.dot_dimension_numbers<[1], [0], [0], [1], [0, 0, 1, 1], [], []>} : vector<8x64xbf16>, vector<64x32xbf16>, vector<8x32xf32> -> vector<8x32xf32>
    %355 = vector.shape_cast %354 : vector<8x32xf32> to vector<1x8x32xf32>
    %c1_140 = arith.constant 1 : index
    %c0_141 = arith.constant 0 : index
    %c0_142 = arith.constant 0 : index
    %356 = vector.load %arg14[%c1_140, %c0_141, %c0_142] : memref<2x1x32xf32, #tpu.memory_space<vmem>>, vector<1x1x32xf32>
    %357 = vector.shape_cast %356 : vector<1x1x32xf32> to vector<1x32xf32>
    %358 = vector.shape_cast %357 : vector<1x32xf32> to vector<1x1x32xf32>
    %359 = vector.broadcast %358 : vector<1x1x32xf32> to vector<1x8x32xf32>
    %360 = arith.addf %355, %359 : vector<1x8x32xf32>
    %361 = arith.addf %360, %328 : vector<1x8x32xf32>
    %c1_143 = arith.constant 1 : index
    %c0_144 = arith.constant 0 : index
    %c0_145 = arith.constant 0 : index
    %362 = vector.load %arg15[%c1_143, %c0_144, %c0_145] : memref<2x1x32xf32, #tpu.memory_space<vmem>>, vector<1x1x32xf32>
    %363 = vector.shape_cast %362 : vector<1x1x32xf32> to vector<1x32xf32>
    %c1_146 = arith.constant 1 : index
    %c0_147 = arith.constant 0 : index
    %c0_148 = arith.constant 0 : index
    %364 = vector.load %arg16[%c1_146, %c0_147, %c0_148] : memref<2x1x32xf32, #tpu.memory_space<vmem>>, vector<1x1x32xf32>
    %365 = vector.shape_cast %364 : vector<1x1x32xf32> to vector<1x32xf32>
    %cst_149 = arith.constant dense<0.000000e+00> : vector<1x8xf32>
    %366 = vector.multi_reduction <add>, %361, %cst_149 [2] : vector<1x8x32xf32> to vector<1x8xf32>
    %367 = vector.shape_cast %366 : vector<1x8xf32> to vector<1x8x1xf32>
    %cst_150 = arith.constant 3.200000e+01 : f32
    %368 = vector.broadcast %cst_150 : f32 to vector<1x8x1xf32>
    %369 = arith.divf %367, %368 : vector<1x8x1xf32>
    %370 = vector.broadcast %369 : vector<1x8x1xf32> to vector<1x8x32xf32>
    %371 = arith.subf %361, %370 : vector<1x8x32xf32>
    %372 = arith.mulf %371, %371 : vector<1x8x32xf32>
    %cst_151 = arith.constant dense<0.000000e+00> : vector<1x8xf32>
    %373 = vector.multi_reduction <add>, %372, %cst_151 [2] : vector<1x8x32xf32> to vector<1x8xf32>
    %374 = vector.shape_cast %373 : vector<1x8xf32> to vector<1x8x1xf32>
    %cst_152 = arith.constant 3.200000e+01 : f32
    %375 = vector.broadcast %cst_152 : f32 to vector<1x8x1xf32>
    %376 = arith.divf %374, %375 : vector<1x8x1xf32>
    %377 = vector.broadcast %369 : vector<1x8x1xf32> to vector<1x8x32xf32>
    %378 = arith.subf %361, %377 : vector<1x8x32xf32>
    %cst_153 = arith.constant 9.99999996E-13 : f32
    %379 = vector.broadcast %cst_153 : f32 to vector<1x8x1xf32>
    %380 = arith.addf %376, %379 : vector<1x8x1xf32>
    %381 = math.rsqrt %380 : vector<1x8x1xf32>
    %382 = vector.broadcast %381 : vector<1x8x1xf32> to vector<1x8x32xf32>
    %383 = arith.mulf %378, %382 : vector<1x8x32xf32>
    %384 = vector.shape_cast %363 : vector<1x32xf32> to vector<1x1x32xf32>
    %385 = vector.broadcast %384 : vector<1x1x32xf32> to vector<1x8x32xf32>
    %386 = arith.mulf %383, %385 : vector<1x8x32xf32>
    %387 = vector.shape_cast %365 : vector<1x32xf32> to vector<1x1x32xf32>
    %388 = vector.broadcast %387 : vector<1x1x32xf32> to vector<1x8x32xf32>
    %389 = arith.addf %386, %388 : vector<1x8x32xf32>
    %c0_154 = arith.constant 0 : index
    %c0_155 = arith.constant 0 : index
    %c0_156 = arith.constant 0 : index
    %390 = vector.load %arg19[%c0_154, %c0_155, %c0_156] : memref<1x8x32xf32, #tpu.memory_space<vmem>>, vector<1x8x32xf32>
    tpu.vector_store %arg19[%c0_154, %c0_155, %c0_156], %389 {strides = array<i32>} : memref<1x8x32xf32, #tpu.memory_space<vmem>>, vector<1x8x32xf32>,
    %391 = vector.extract_strided_slice %389 {offsets = [0, 0, 0], sizes = [1, 1, 32], strides = [1, 1, 1]} : vector<1x8x32xf32> to vector<1x1x32xf32>
    %392 = vector.shape_cast %391 : vector<1x1x32xf32> to vector<1x32xf32>
    %393 = arith.truncf %392 : vector<1x32xf32> to vector<1x32xbf16>
    %c0_157 = arith.constant 0 : index
    %c0_158 = arith.constant 0 : index
    %394 = vector.load %arg17[%c0_157, %c0_158] : memref<32x32xbf16, #tpu.memory_space<vmem>>, vector<32x32xbf16>
    %cst_159 = arith.constant dense<0.000000e+00> : vector<1x32xf32>
    %395 = tpu.matmul %393, %394, %cst_159 {dimension_numbers = #tpu.dot_dimension_numbers<[1], [0], [0], [1], [0, 0, 1, 1], [], []>} : vector<1x32xbf16>, vector<32x32xbf16>, vector<1x32xf32> -> vector<1x32xf32>
    %c0_160 = arith.constant 0 : index
    %c0_161 = arith.constant 0 : index
    %396 = vector.load %arg18[%c0_160, %c0_161] : memref<1x32xf32, #tpu.memory_space<vmem>>, vector<1x32xf32>
    %397 = arith.addf %395, %396 : vector<1x32xf32>
    %398 = math.tanh %397 : vector<1x32xf32>
    %399 = arith.mulf %398, %398 : vector<1x32xf32>
    %cst_162 = arith.constant dense<0.000000e+00> : vector<1xf32>
    %400 = vector.multi_reduction <add>, %399, %cst_162 [1] : vector<1x32xf32> to vector<1xf32>
    %401 = vector.shape_cast %400 : vector<1xf32> to vector<1x1xf32>
    %402 = math.sqrt %401 : vector<1x1xf32>
    %cst_163 = arith.constant 9.99999996E-13 : f32
    %403 = vector.broadcast %cst_163 : f32 to vector<1x1xf32>
    %404 = arith.maximumf %402, %403 : vector<1x1xf32>
    %405 = vector.broadcast %404 : vector<1x1xf32> to vector<1x32xf32>
    %406 = arith.divf %398, %405 : vector<1x32xf32>
    %407 = vector.shape_cast %406 : vector<1x32xf32> to vector<1x1x32xf32>
    %c0_164 = arith.constant 0 : index
    %c0_165 = arith.constant 0 : index
    %c0_166 = arith.constant 0 : index
    %408 = vector.load %arg20[%c0_164, %c0_165, %c0_166] : memref<1x1x32xf32, #tpu.memory_space<vmem>>, vector<1x1x32xf32>
    tpu.vector_store %arg20[%c0_164, %c0_165, %c0_166], %407 {strides = array<i32>} : memref<1x1x32xf32, #tpu.memory_space<vmem>>, vector<1x1x32xf32>,
    return
  }
  func.func @transform_0(%arg0: i32) -> (i32, i32, i32) {
    %c0_i32 = arith.constant 0 : i32
    %c0_i32_0 = arith.constant 0 : i32
    %c0_i32_1 = arith.constant 0 : i32
    return %arg0, %c0_i32, %c0_i32_0 : i32, i32, i32
  }
  func.func @transform_1(%arg0: i32) -> (i32, i32, i32) {
    %c0_i32 = arith.constant 0 : i32
    %c0_i32_0 = arith.constant 0 : i32
    %c0_i32_1 = arith.constant 0 : i32
    return %arg0, %c0_i32, %c0_i32_0 : i32, i32, i32
  }
  func.func @transform_2(%arg0: i32) -> (i32, i32) {
    %c0_i32 = arith.constant 0 : i32
    %c0_i32_0 = arith.constant 0 : i32
    %c0_i32_1 = arith.constant 0 : i32
    return %c0_i32, %c0_i32_0 : i32, i32
  }
  func.func @transform_3(%arg0: i32) -> (i32, i32) {
    %c0_i32 = arith.constant 0 : i32
    %c0_i32_0 = arith.constant 0 : i32
    %c0_i32_1 = arith.constant 0 : i32
    return %c0_i32, %c0_i32_0 : i32, i32
  }
  func.func @transform_4(%arg0: i32) -> (i32, i32, i32) {
    %c0_i32 = arith.constant 0 : i32
    %c0_i32_0 = arith.constant 0 : i32
    %c0_i32_1 = arith.constant 0 : i32
    %c0_i32_2 = arith.constant 0 : i32
    return %c0_i32, %c0_i32_0, %c0_i32_1 : i32, i32, i32
  }
  func.func @transform_5(%arg0: i32) -> (i32, i32, i32) {
    %c0_i32 = arith.constant 0 : i32
    %c0_i32_0 = arith.constant 0 : i32
    %c0_i32_1 = arith.constant 0 : i32
    %c0_i32_2 = arith.constant 0 : i32
    return %c0_i32, %c0_i32_0, %c0_i32_1 : i32, i32, i32
  }
  func.func @transform_6(%arg0: i32) -> (i32, i32, i32) {
    %c0_i32 = arith.constant 0 : i32
    %c0_i32_0 = arith.constant 0 : i32
    %c0_i32_1 = arith.constant 0 : i32
    %c0_i32_2 = arith.constant 0 : i32
    return %c0_i32, %c0_i32_0, %c0_i32_1 : i32, i32, i32
  }
  func.func @transform_7(%arg0: i32) -> (i32, i32, i32) {
    %c0_i32 = arith.constant 0 : i32
    %c0_i32_0 = arith.constant 0 : i32
    %c0_i32_1 = arith.constant 0 : i32
    %c0_i32_2 = arith.constant 0 : i32
    return %c0_i32, %c0_i32_0, %c0_i32_1 : i32, i32, i32
  }
  func.func @transform_8(%arg0: i32) -> (i32, i32, i32) {
    %c0_i32 = arith.constant 0 : i32
    %c0_i32_0 = arith.constant 0 : i32
    %c0_i32_1 = arith.constant 0 : i32
    %c0_i32_2 = arith.constant 0 : i32
    return %c0_i32, %c0_i32_0, %c0_i32_1 : i32, i32, i32
  }
  func.func @transform_9(%arg0: i32) -> (i32, i32, i32) {
    %c0_i32 = arith.constant 0 : i32
    %c0_i32_0 = arith.constant 0 : i32
    %c0_i32_1 = arith.constant 0 : i32
    %c0_i32_2 = arith.constant 0 : i32
    return %c0_i32, %c0_i32_0, %c0_i32_1 : i32, i32, i32
  }
  func.func @transform_10(%arg0: i32) -> (i32, i32, i32) {
    %c0_i32 = arith.constant 0 : i32
    %c0_i32_0 = arith.constant 0 : i32
    %c0_i32_1 = arith.constant 0 : i32
    %c0_i32_2 = arith.constant 0 : i32
    return %c0_i32, %c0_i32_0, %c0_i32_1 : i32, i32, i32
  }
  func.func @transform_11(%arg0: i32) -> (i32, i32, i32) {
    %c0_i32 = arith.constant 0 : i32
    %c0_i32_0 = arith.constant 0 : i32
    %c0_i32_1 = arith.constant 0 : i32
    %c0_i32_2 = arith.constant 0 : i32
    return %c0_i32, %c0_i32_0, %c0_i32_1 : i32, i32, i32
  }
  func.func @transform_12(%arg0: i32) -> (i32, i32, i32) {
    %c0_i32 = arith.constant 0 : i32
    %c0_i32_0 = arith.constant 0 : i32
    %c0_i32_1 = arith.constant 0 : i32
    %c0_i32_2 = arith.constant 0 : i32
    return %c0_i32, %c0_i32_0, %c0_i32_1 : i32, i32, i32
  }
  func.func @transform_13(%arg0: i32) -> (i32, i32, i32) {
    %c0_i32 = arith.constant 0 : i32
    %c0_i32_0 = arith.constant 0 : i32
    %c0_i32_1 = arith.constant 0 : i32
    %c0_i32_2 = arith.constant 0 : i32
    return %c0_i32, %c0_i32_0, %c0_i32_1 : i32, i32, i32
  }
  func.func @transform_14(%arg0: i32) -> (i32, i32, i32) {
    %c0_i32 = arith.constant 0 : i32
    %c0_i32_0 = arith.constant 0 : i32
    %c0_i32_1 = arith.constant 0 : i32
    %c0_i32_2 = arith.constant 0 : i32
    return %c0_i32, %c0_i32_0, %c0_i32_1 : i32, i32, i32
  }
  func.func @transform_15(%arg0: i32) -> (i32, i32, i32) {
    %c0_i32 = arith.constant 0 : i32
    %c0_i32_0 = arith.constant 0 : i32
    %c0_i32_1 = arith.constant 0 : i32
    %c0_i32_2 = arith.constant 0 : i32
    return %c0_i32, %c0_i32_0, %c0_i32_1 : i32, i32, i32
  }
  func.func @transform_16(%arg0: i32) -> (i32, i32) {
    %c0_i32 = arith.constant 0 : i32
    %c0_i32_0 = arith.constant 0 : i32
    %c0_i32_1 = arith.constant 0 : i32
    return %c0_i32, %c0_i32_0 : i32, i32
  }
  func.func @transform_17(%arg0: i32) -> (i32, i32) {
    %c0_i32 = arith.constant 0 : i32
    %c0_i32_0 = arith.constant 0 : i32
    %c0_i32_1 = arith.constant 0 : i32
    return %c0_i32, %c0_i32_0 : i32, i32
  }
  func.func @transform_18(%arg0: i32) -> (i32, i32, i32) {
    %c0_i32 = arith.constant 0 : i32
    %c0_i32_0 = arith.constant 0 : i32
    %c0_i32_1 = arith.constant 0 : i32
    return %arg0, %c0_i32, %c0_i32_0 : i32, i32, i32
  }
  func.func @transform_19(%arg0: i32) -> (i32, i32, i32) {
    %c0_i32 = arith.constant 0 : i32
    %c0_i32_0 = arith.constant 0 : i32
    %c0_i32_1 = arith.constant 0 : i32
    return %arg0, %c0_i32, %c0_i32_0 : i32, i32, i32
  }
}

</mosaic_0001>

<bundles_post_ra>
// kernel: univl_forward.3
= control target key start
LH: loop header
LB: loop body
LE: loop exit
PB: predicated region body
PF: predicated region fallthrough
CT: control target
= control target key end

     0   :  { %v536_v1 = vmov 0   ;;  %vm142_vm0 = vcmask 523264   ;;  %s685_s0 = inlined_call_operand.vmem [shape: f32[16,192], index: 0, kind: input, shape index: {}]   ;;  %s686_s1 = inlined_call_operand.vmem [shape: f32[1,16], index: 1, kind: input, shape index: {}]   ;;  %s687_s2 = inlined_call_operand.vmem [shape: bf16[192,32], index: 2, kind: input, shape index: {}]   ;;  %s688_s3 = inlined_call_operand.vmem [shape: f32[1,32], index: 3, kind: input, shape index: {}]   ;;  %s689_s4 = inlined_call_operand.vmem [shape: bf16[32,32], index: 4, kind: input, shape index: {}]   ;;  %s690_s5 = inlined_call_operand.vmem [shape: f32[1,32], index: 5, kind: input, shape index: {}]   ;;  %s691_s6 = inlined_call_operand.vmem [shape: bf16[32,32], index: 6, kind: input, shape index: {}]   ;;  %s692_s7 = inlined_call_operand.vmem [shape: f32[1,32], index: 7, kind: input, shape index: {}]   ;;  %s693_s8 = inlined_call_operand.vmem [shape: f32[2,32], index: 8, kind: output, shape index: {0}]   ;;  %s694_s9 = inlined_call_operand.hbm [shape: f32[2,32], index: 9, kind: output, shape index: {1}]  }
   0x1   :  { %v490_v0 = vld [vmem:[%s687_s2] sm:$0xff]   ;;  %146 = vmatprep.subr.bf16.mxu0 %v536_v1  ;;  %v491_v2 = vld [vmem:[%s687_s2 + $0x8] sm:$0xff]   ;;  %v492_v3 = vld [vmem:[%s687_s2 + $0x10] sm:$0xff]  }
   0x2   :  { %147 = vmatpush1.bf16.msra.mxu0 %v490_v0  ;;  %v493_v4 = vld [vmem:[%s687_s2 + $0x18] sm:$0xff]   ;;  %v34_v5 = vld [vmem:[%s685_s0 + $0x8] sm:$0xff]  ;;  %v494_v7 = vld [vmem:[%s687_s2 + $0x20] sm:$0xff]  }
   0x3   :  { %148 = vmatprep.subr.bf16.mxu0 %v536_v1  ;;  %v36_v6 = vld [vmem:[%s685_s0 + $0x18] sm:$0xff] }
   0x4   :  { %v62_v8 = vpack.c.bf16 %v36_v6, %v34_v5 }
   0x6   :  { %149 = vmatpush1.bf16.msra.mxu0 %v491_v2  ;;  %444 = vmatprep.mubr.msk.bf16.mxu0 %vm142_vm0, %v62_v8 }
   0x7   :  { %150 = vmatprep.subr.bf16.mxu0 %v536_v1 }
   0xa   :  { %151 = vmatpush1.bf16.msra.mxu0 %v492_v3 }
   0xb   :  { %152 = vmatprep.subr.bf16.mxu0 %v536_v1 }
   0xe   :  { %153 = vmatpush1.bf16.msra.mxu0 %v493_v4 }
   0xf   :  { %154 = vmatprep.subr.bf16.mxu0 %v536_v1 }
  0x10   :  { %15 = vsyncpa [#allocation3], 0  ;;  %v495_v9 = vld [vmem:[%s687_s2 + $0x28] sm:$0xff]   ;;  %v496_v10 = vld [vmem:[%s687_s2 + $0x30] sm:$0xff]   ;;  %v187_v19 = vlaneseq  ;;  %v537_v25 = vmov 0.0   ;;  %vm538_vm4 = vmmov 0  }
  0x11   :  { %v497_v11 = vld [vmem:[%s687_s2 + $0x38] sm:$0xff]   ;;  %v498_v12 = vld [vmem:[%s687_s2 + $0x40] sm:$0xff]   ;;  %v499_v13 = vld [vmem:[%s687_s2 + $0x48] sm:$0xff]   ;;  %464 = vmatprep.subr.bf16.mxu1 %v537_v25  ;;  %466 = vmatprep.mubr.msk.bf16.mxu1 %vm538_vm4, %v537_v25  ;;  %vm207_vm5 = vcmask 123904   ;;  %vm214_vm6 = vcmask 130048   ;;  %vm260_vm7 = vcmask 254976  }
  0x12   :  { %155 = vmatpush1.bf16.msra.mxu0 %v494_v7  ;;  %v500_v14 = vld [vmem:[%s687_s2 + $0x50] sm:$0xff]   ;;  %v501_v15 = vld [vmem:[%s687_s2 + $0x58] sm:$0xff]   ;;  %v33_v16 = vld [vmem:[%s685_s0] sm:$0xff]  ;;  %v188_v20 = vshrl.u32 %v187_v19, 7  ;;  %v190_v22 = vand.u32 127, %v187_v19  ;;  %vm286_vm8 = vcmask 261120  }
  0x13   :  { %156 = vmatprep.subr.bf16.mxu0 %v536_v1  ;;  %v35_v17 = vld [vmem:[%s685_s0 + $0x10] sm:$0xff]  ;;  %v446_v27 = vld [vmem:[%s686_s1] ss:$0 sm:$0xff]  ;;  %v503_v40 = vld [vmem:[%s689_s4 + $0x8] sm:$0xff]  }
  0x14   :  { %v61_v18 = vpack.c.bf16 %v35_v17, %v33_v16  ;;  %v193_v21 = vadd.s32 1, %v188_v20  ;;  %v191_v23 = vmul.u32 8, %v188_v20  ;;  %v431_v30 = vld [vmem:[%s688_s3] ss:$0 sm:$0xff]  ;;  %v505_v51 = vld [vmem:[%s691_s6 + $0x8] sm:$0xff]  }
  0x15   :  { %v502_v39 = vld [vmem:[%s689_s4] sm:$0xff]  }
  0x16   :  { %157 = vmatpush1.bf16.msra.mxu0 %v495_v9  ;;  %v194_v24 = vmul.u32 8, %v193_v21  ;;  %vm192_vm1 = vcmp.ge.s32.totalorder %v190_v22, %v191_v23  ;;  %v504_v48 = vld [vmem:[%s691_s6] sm:$0xff]  }
  0x17   :  { %158 = vmatprep.subr.bf16.mxu0 %v536_v1  ;;  %v448_v52 = vld [vmem:[%s690_s5] ss:$0 sm:$0xff]  ;;  %s539_s5 = smov [#allocation2]  }
  0x18   :  { %vm195_vm2 = vcmp.lt.s32.totalorder %v190_v22, %v194_v24  ;;  %v452_v60 = vld [vmem:[%s692_s7] ss:$0 sm:$0xff]  ;;  %s421_s6 = sshll.u32 %s539_s5, 4  ;;  %s422_s6 = int_to_ptr.vmem [resolvable:$true] %s421_s6 }
  0x19   :  { %vm196_vm3 = vmand %vm192_vm1, %vm195_vm2  ;;  %s512_s7 = scalar_lea.vmem %s422_s6, 32  ;;  %p517_p1 = scmp.lt.s32.totalorder %s422_s6, %s422_s6 }
  0x1a   :  { %159 = vmatpush1.bf16.msra.mxu0 %v496_v10  ;;  %v445_v26 = vsel %vm196_vm3, 1.0, %v537_v25  ;;  %p513_p0 = scmp.ne.s32.totalorder %s422_s6, %s512_s7  ;;  %p518_p2 = scmp.lt.s32.totalorder %s512_s7, %s512_s7 }
  0x1b   :  { %160 = vmatprep.subr.bf16.mxu0 %v536_v1  ;;  %v206_v28 = vmul.f32 %v446_v27, %v445_v26 }
  0x1c   :  { %p519_p3 = por %p518_p2, %p517_p1 }
  0x1d   :  { %v208_v29 = vsel %vm207_vm5, %v206_v28, 0.0  ;;  %v212_v38 = vpack.c.bf16 %v206_v28, %v206_v28 }
  0x1e   :  { %161 = vmatpush1.bf16.msra.mxu0 %v497_v11  ;;  %209 = vadd.xlane.f32.xlu0 %v208_v29  ;;  %p520_p4 = pnand %p519_p3, %p513_p0 }
  0x1f   :  { %162 = vmatprep.subr.bf16.mxu0 %v536_v1 }
  0x22   :  { %163 = vmatpush1.bf16.msra.mxu0 %v498_v12 }
  0x23   :  { %164 = vmatprep.subr.bf16.mxu0 %v536_v1 }
  0x26   :  { %165 = vmatpush1.bf16.msra.mxu0 %v499_v13 }
  0x27   :  { %166 = vmatprep.subr.bf16.mxu0 %v536_v1 }
  0x2a   :  { %167 = vmatpush1.bf16.msra.mxu0 %v500_v14 }
  0x2b   :  { %168 = vmatprep.subr.bf16.mxu0 %v536_v1 }
  0x2e   :  { %169 = vmatpush1.bf16.msra.mxu0 %v501_v15 }
  0x31   :  { %179 = vmatmul.mubr.bf16.vlgmr.msra.gmra.mrb[0].mxu0 %v61_v18 }
  0xab   :  { %v210_v41 = vpop.xlane.xlu0 %209 }
  0xac   :  { %v211_v42 = vmax.f32 %v210_v41, 1.0 }
  0xae   :  { %506 = vrcp.f32 %v211_v42 }
  0xb8   :  { %v507_v43 = vpop.eup %506 }
 0x104   :  { %v180_v31 = vpop.f32.mrb[0].mxu0 }
 0x105   :  { %v182_v32 = vpop.f32.mrb[1].mxu0  ;;  %v181_v34 = vadd.f32 %v431_v30, %v180_v31 }
 0x106   :  { %v183_v33 = vpop.f32.mrb[2].mxu0 }
 0x107   :  { %v184_v35 = vadd.f32 %v431_v30, %v183_v33  ;;  %v185_v36 = vpop.f32.mrb[3].mxu0 }
 0x109   :  { %v213_v37 = vpack.c.bf16 %v184_v35, %v181_v34 }
 0x10b   :  { %465 = vmatpush3.bf16.msra.mxu1 %v213_v37 }
 0x10c   :  { %470 = vmatprep.subr.bf16.mxu1 %v537_v25 }
 0x10e   :  { %467 = vmatmul.mubr.msk.bf16.vlgmr.msra.gmra.mrb[0].mxu1 %vm214_vm6, %v212_v38 }
 0x10f   :  { %471 = vmatpush3.bf16.msra.mxu1 %v502_v39  ;;  %474 = vmatprep.mubr.msk.bf16.mxu1 %vm538_vm4, %v537_v25 }
 0x110   :  { %472 = vmatprep.subr.bf16.mxu1 %v537_v25 }
 0x113   :  { %473 = vmatpush3.bf16.msra.mxu1 %v503_v40 }
 0x114   :  { %478 = vmatprep.subr.bf16.mxu1 %v537_v25 }
 0x1e1   :  { %v252_v44 = vpop.f32.mrb[0].mxu1 }
 0x1e2   :  { %v259_v45 = vmul.f32 %v507_v43, %v252_v44  ;;  %v468_v46 = vpop.f32.mrb[1].mxu1 }
 0x1e3   :  { %v255_v47 = vpop.f32.mrb[2].mxu1 }
 0x1e4   :  { %261 = vst.msk [vmem:[%s693_s8] sm:$0x3] %vm260_vm7, %v259_v45  ;;  %v266_v49 = vpack.c.bf16 %v259_v45, %v259_v45  ;;  %v469_v50 = vpop.f32.mrb[3].mxu1 }
 0x1e6   :  { %475 = vmatmul.mubr.msk.bf16.vlgmr.msra.gmra.mrb[4].mxu1 %vm286_vm8, %v266_v49 }
 0x1e7   :  { %479 = vmatpush3.bf16.msra.mxu1 %v504_v48  ;;  %482 = vmatprep.mubr.msk.bf16.mxu1 %vm538_vm4, %v537_v25 }
 0x1e8   :  { %480 = vmatprep.subr.bf16.mxu1 %v537_v25 }
 0x1eb   :  { %481 = vmatpush3.bf16.msra.mxu1 %v505_v51 }
 0x2b9   :  { %v324_v53 = vpop.f32.mrb[4].mxu1 }
 0x2ba   :  { %v325_v54 = vadd.f32 %v448_v52, %v324_v53  ;;  %v476_v55 = vpop.f32.mrb[5].mxu1 }
 0x2bb   :  { %v327_v56 = vpop.f32.mrb[6].mxu1 }
 0x2bc   :  { %v330_v57 = vmax.f32 %v325_v54, 0.0  ;;  %v477_v58 = vpop.f32.mrb[7].mxu1 }
 0x2be   :  { %v335_v59 = vpack.c.bf16 %v330_v57, %v330_v57 }
 0x2c0   :  { %483 = vmatmul.mubr.msk.bf16.vlgmr.msra.gmra.mrb[8].mxu1 %vm286_vm8, %v335_v59 }
 0x393   :  { %v392_v61 = vpop.f32.mrb[8].mxu1 }
 0x394   :  { %v393_v62 = vadd.f32 %v452_v60, %v392_v61  ;;  %v484_v63 = vpop.f32.mrb[9].mxu1 }
 0x395   :  { %v395_v0 = vpop.f32.mrb[10].mxu1 }
 0x396   :  { %v485_v1 = vpop.f32.mrb[11].mxu1  ;;  %v398_v2 = vmul.f32 %v393_v62, %v393_v62 }
 0x398   :  { %v399_v3 = vsel %vm260_vm7, %v398_v2, 0.0 }
 0x399   :  { %400 = vadd.xlane.f32.xlu0 %v399_v3 }
 0x426   :  { %v401_v4 = vpop.xlane.xlu0 %400 }
 0x427   :  { %508 = vrsqrt.f32 %v401_v4  ;;  %vm404_vm9 = vcmp.eq.f32.partialorder %v401_v4, inf  ;;  %v407_v7 = vand.u32 2147483648, %v401_v4  ;;  %vm406_vm10 = vcmp.eq.f32.partialorder %v401_v4, 0.0 }
 0x431   :  { %v509_v5 = vpop.eup %508 }
 0x432   :  { %v403_v6 = vmul.f32 %v509_v5, %v401_v4 }
 0x434   :  { %v405_v8 = vsel %vm404_vm9, %v401_v4, %v403_v6 }
 0x435   :  { %v408_v9 = vsel %vm406_vm10, %v407_v7, %v405_v8 }
 0x436   :  { %v409_v10 = vmax.f32 %v408_v9, 1e-12 }
 0x438   :  { %510 = vrcp.f32 %v409_v10 }
 0x442   :  { %v511_v11 = vpop.eup %510 }
 0x443   :  { %v411_v12 = vmul.f32 %v511_v11, %v393_v62 }
 0x445   :  { %412 = vst.msk [vmem:[#allocation2] sm:$0x3] %vm260_vm7, %v411_v12 }
 0x446   :  { %523 = shalt.err (!%p520_p4)
}
 0x447   :  { %s524_s13 = scalar_lea.hbm %s694_s9, 32 }
 0x448   :  { %p525_p5 = scmp.ne.s32.totalorder %s694_s9, %s524_s13  ;;  %p528_p6 = scmp.lt.u32.totalorder %s524_s13, %s694_s9 }
 0x44a   :  { %p530_p7 = pnand %p528_p6, %p525_p5 }
 0x44c   :  { %533 = shalt.err (!%p530_p7)
}
 0x44d   :  { %424 = dma.vmem_to_hbm [thread:$0]  %s422_s6, 32, %s694_s9, [#allocation3]  }
 0x44e   :  { %534 = dma.done.wait [#allocation3], 32  }
 0x44f   :  { %535 = vsyncadd [#allocation3], 4294967264 }
 0x450   :  { %430 = vsyncpa [#allocation3], 1 }

// kernel: univl_forward.5
= control target key start
LH: loop header
LB: loop body
LE: loop exit
PB: predicated region body
PF: predicated region fallthrough
CT: control target
= control target key end

     0   :  { %s3952_s0 = inlined_call_operand.vmem [shape: bf16[2,16,32], index: 0, kind: input, shape index: {}]   ;;  %s3953_s1 = inlined_call_operand.vmem [shape: bf16[2,1,16], index: 1, kind: input, shape index: {}]   ;;  %s3954_s2 = inlined_call_operand.vmem [shape: f32[1,32], index: 2, kind: input, shape index: {}]   ;;  %s3955_s3 = inlined_call_operand.vmem [shape: f32[1,32], index: 3, kind: input, shape index: {}]   ;;  %s3956_s4 = inlined_call_operand.vmem [shape: bf16[2,32,96], index: 4, kind: input, shape index: {}]   ;;  %s3957_s5 = inlined_call_operand.vmem [shape: f32[2,1,96], index: 5, kind: input, shape index: {}]   ;;  %s3958_s6 = inlined_call_operand.vmem [shape: bf16[2,32,32], index: 6, kind: input, shape index: {}]   ;;  %s3959_s7 = inlined_call_operand.vmem [shape: f32[2,1,32], index: 7, kind: input, shape index: {}]   ;;  %s3960_s8 = inlined_call_operand.vmem [shape: f32[2,1,32], index: 8, kind: input, shape index: {}]   ;;  %s3961_s9 = inlined_call_operand.vmem [shape: f32[2,1,32], index: 9, kind: input, shape index: {}]   ;;  %s3962_s10 = inlined_call_operand.vmem [shape: bf16[2,32,64], index: 10, kind: input, shape index: {}]   ;;  %s3963_s11 = inlined_call_operand.vmem [shape: f32[2,1,64], index: 11, kind: input, shape index: {}]   ;;  %s3964_s12 = inlined_call_operand.vmem [shape: bf16[2,64,32], index: 12, kind: input, shape index: {}]   ;;  %s3965_s13 = inlined_call_operand.vmem [shape: f32[2,1,32], index: 13, kind: input, shape index: {}]   ;;  %s3966_s14 = inlined_call_operand.vmem [shape: f32[2,1,32], index: 14, kind: input, shape index: {}]   ;;  %s3967_s15 = inlined_call_operand.vmem [shape: f32[2,1,32], index: 15, kind: input, shape index: {}]   ;;  %s3968_s16 = inlined_call_operand.vmem [shape: bf16[32,32], index: 16, kind: input, shape index: {}]   ;;  %s3969_s17 = inlined_call_operand.vmem [shape: f32[1,32], index: 17, kind: input, shape index: {}]   ;;  %s3970_s18 = inlined_call_operand.vmem [shape: f32[2,16,32], index: 18, kind: output, shape index: {0}]   ;;  %s3971_s19 = inlined_call_operand.hbm [shape: f32[2,1,32], index: 19, kind: output, shape index: {1}]  }
   0x1   :  { %3987 = sst [smem:[#allocation7_spill]] %s3952_s0 }
   0x2   :  { %3988 = sst [smem:[#allocation8_spill]] %s3953_s1 }
   0x3   :  { %3989 = sst [smem:[#allocation9_spill]] %s3954_s2 }
   0x4   :  { %3990 = sst [smem:[#allocation10_spill]] %s3955_s3 }
   0x5   :  { %3991 = sst [smem:[#allocation11_spill]] %s3956_s4 }
   0x6   :  { %3992 = sst [smem:[#allocation12_spill]] %s3957_s5 }
   0x7   :  { %3993 = sst [smem:[#allocation13_spill]] %s3958_s6 }
   0x8   :  { %25 = vsyncpa [#allocation3], 0 }
   0x9   :  { %27 = vsyncpa [#allocation3 + $0x1], 0  ;;  %s3441_s0 = smov 0   ;;  %s3443_s30 = smov 0  }
   0xa   :  { %s3445_s20 = smov 0   ;;  %s3447_s21 = smov 0  }
   0xb LB: > { %3994 = sst [smem:[#allocation5_spill]] %s3318_s20  ;;  %s3462_s1 = sadd.s32 4294967295, %s3322_s21   ;;  %s3322_s21 = sphi %s3447_s21, %s4023_s21   ;;  %s3318_s20 = sphi %s3445_s20, %s4020_s20   ;;  %s3314_s30 = sphi %s3443_s30, %s4022_s30   ;;  %s3310_s0 = sphi %s3441_s0, %s4021_s0  }
   0xc   : > { %s2710_s22 = sadd.s32 4294967294, %s3322_s21   ;;  %s3466_s2 = sadd.s32 1, %s3322_s21  }
   0xd   : > { %s454_s23 = sadd.s32 1, %s3318_s20  ;;  %s451_s24 = ssub.s32 %s3322_s21, %s3466_s2 }
   0xe   : > { %p464_p0 = scmp.ne.s32.totalorder %s3318_s20, %s3314_s30  ;;  %p452_p1 = scmp.eq.s32.totalorder %s451_s24, 0 }
   0xf   : > { %p465_p2 = scmp.eq.s32.totalorder %s3462_s1, 1  ;;  %p470_p3 = scmp.ne.s32.totalorder %s3314_s30, %s3310_s0 }
  0x10   : > { %p471_p4 = scmp.eq.s32.totalorder %s2710_s22, 1  ;;  %p2713_p7 = scmp.ge.s32.totalorder %s3322_s21, 1 }
  0x11   : > { %s3477_s25 = scalar_select %p452_p1, %s3318_s20, %s454_s23  }
  0x12   : > { %p3479_p5 = por %p465_p2, %p464_p0  ;;  %p3483_p6 = por %p471_p4, %p470_p3 }
  0x13   : > { %3995 = sst [smem:[#allocation6_spill]] %s3477_s25  ;;  %p551_p8 = scmp.lt.s32.totalorder %s3322_s21, 3 }
  0x15   : > { %p552_p9 = pnand %p2713_p7, %p551_p8 }
  0x16   : > { %p614_p10 = scmp.lt.s32.totalorder (!%p552_p9), %s3462_s1, 1  ;;  %s3998_s23 = sld [smem:[#allocation7_spill]] (!%p552_p9)  ;;  %vm634_vm0 = vcmask (!%p552_p9), 261120   ;;  %v3324_v16 = vmov (!%p552_p9), 0.0   ;;  %vm3325_vm1 = vmmov (!%p552_p9), 0   ;;  %vm758_vm2 = vcmask (!%p552_p9), 64512  }
  0x17   : > { %555 = sbr.rel (%p552_p9) target bundleno = 5701 (0x1645), region = 92  ;;  %s3999_s4 = sld [smem:[#allocation11_spill]] (!%p552_p9)  ;;  %2883 = vmatprep.subr.bf16.mxu0 (!%p552_p9), %v3324_v16  ;;  %2891 = vmatprep.subr.bf16.mxu1 (!%p552_p9), %v3324_v16  ;;  %v682_v56 = vlaneseq (!%p552_p9)  ;;  %vm806_vm3 = vcmask (!%p552_p9), 130048   ;;  %vm1268_vm4 = vcmask (!%p552_p9), 195584   ;;  %vm1506_vm5 = vcmask (!%p552_p9), 523264  }
  0x18   : > { %2887 = vmatprep.mubr.msk.bf16.mxu0 (!%p552_p9), %vm3325_vm1, %v3324_v16  ;;  %2893 = vmatprep.mubr.msk.bf16.mxu1 (!%p552_p9), %vm3325_vm1, %v3324_v16  ;;  %s4000_s29 = sld [smem:[#allocation9_spill]] (!%p552_p9)  ;;  %s4001_s25 = sld [smem:[#allocation10_spill]] (!%p552_p9)  ;;  %vm2598_vm6 = vcmask (!%p552_p9), 253952  }
  0x19   : > { %s4002_s5 = sld [smem:[#allocation12_spill]] (!%p552_p9)  ;;  %s3981_s22 = smov (!%p552_p9), 120   ;;  %v683_v58 = vshrl.u32 (!%p552_p9), %v682_v56, 7 }
  0x1a   : > { %s4004_s6 = sld [smem:[#allocation13_spill]] (!%p552_p9)  ;;  %s4007_s20 = smov (!%p552_p9), 120  }
  0x1b   : > { %v684_v60 = vsub.s32 (!%p552_p9), 0, %v683_v58 }
  0x1d   : > { %v3144_v15 = vld [vmem:[%s3999_s4] sm:$0xff] (!%p552_p9)   ;;  %v3145_v17 = vld [vmem:[%s3999_s4 + $0x8] sm:$0xff] (!%p552_p9)  }
  0x1e   : > { %s3491_s27 = scalar_select %p614_p10, %s3462_s1, 1  ;;  %2884 = vmatpush3.bf16.msra.mxu0 %v3144_v15  ;;  %v2718_v26 = vld [vmem:[%s4000_s29] ss:$0 sm:$0xff] }
  0x1f   : > { %2885 = vmatprep.subr.bf16.mxu0 %v3324_v16  ;;  %v2719_v30 = vld [vmem:[%s4001_s25] ss:$0 sm:$0xff]  ;;  %s3972_s25 = smov 88   ;;  %s3985_s29 = smov 96  }
  0x20   : > { %s2814_s28 = sshll.u32 %s3491_s27, 3  ;;  %v2720_v35 = vld [vmem:[%s4002_s5] ss:$0 sm:$0xff] }
  0x21   : > { %s618_s24 = scalar_lea.vmem %s3998_s23, %s2814_s28  ;;  %s3976_s23 = smov 112  }
  0x22   : > { %v2817_v0 = vld [vmem:[%s618_s24] sm:$0xff]   ;;  %2886 = vmatpush3.bf16.msra.mxu0 %v3145_v17  ;;  %s3975_s24 = smov 80   ;;  %s3974_s28 = smov 104  }
  0x23   : > { %v2818_v1 = vunpack.c.l.bf16 %v2817_v0  ;;  %v2819_v2 = vunpack.c.h.bf16 %v2817_v0  ;;  %2897 = vmatprep.subr.bf16.mxu0 %v3324_v16 }
  0x25   : > { %v635_v3 = vsel %vm634_vm0, %v2818_v1, 0.0  ;;  %v638_v4 = vsel %vm634_vm0, %v2819_v2, 0.0 }
  0x26   : > { %636 = vadd.xlane.f32.xlu0 %v635_v3 }
  0x2a   : > { %639 = vadd.xlane.f32.xlu0 %v638_v4 }
  0xb3   : > { %v637_v5 = vpop.xlane.xlu0 %636 }
  0xb4   : > { %v642_v6 = vmul.f32 0.03125, %v637_v5 }
  0xb6   : > { %v644_v7 = vsub.f32 %v2818_v1, %v642_v6 }
  0xb7   : > { %v640_v8 = vpop.xlane.xlu0 %639 }
  0xb8   : > { %v643_v9 = vmul.f32 0.03125, %v640_v8  ;;  %v646_v10 = vmul.f32 %v644_v7, %v644_v7 }
  0xba   : > { %v645_v11 = vsub.f32 %v2819_v2, %v643_v9  ;;  %v648_v12 = vsel %vm634_vm0, %v646_v10, 0.0 }
  0xbb   : > { %649 = vadd.xlane.f32.xlu1 %v648_v12 }
  0xbc   : > { %v647_v13 = vmul.f32 %v645_v11, %v645_v11 }
  0xbe   : > { %v651_v14 = vsel %vm634_vm0, %v647_v13, 0.0 }
  0xbf   : > { %652 = vadd.xlane.f32.xlu1 %v651_v14 }
 0x148   : > { %v650_v18 = vpop.xlane.xlu1 %649 }
 0x149   : > { %v654_v19 = vmul.f32 0.03125, %v650_v18 }
 0x14b   : > { %v656_v20 = vadd.f32 1e-12, %v654_v19 }
 0x14c   : > { %v653_v21 = vpop.xlane.xlu1 %652 }
 0x14d   : > { %3166 = vrsqrt.f32 %v656_v20  ;;  %v655_v22 = vmul.f32 0.03125, %v653_v21 }
 0x14f   : > { %v657_v23 = vadd.f32 1e-12, %v655_v22 }
 0x151   : > { %3168 = vrsqrt.f32 %v657_v23 }
 0x157   : > { %v3167_v24 = vpop.eup %3166 }
 0x158   : > { %v660_v25 = vmul.f32 %v3167_v24, %v644_v7 }
 0x15a   : > { %v668_v29 = vmul.f32 %v2718_v26, %v660_v25 }
 0x15b   : > { %v3169_v27 = vpop.eup %3168 }
 0x15c   : > { %v661_v28 = vmul.f32 %v3169_v27, %v645_v11  ;;  %v3521_v32 = vadd.f32 %v2719_v30, %v668_v29 }
 0x15e   : > { %v669_v31 = vmul.f32 %v2718_v26, %v661_v28 }
 0x160   : > { %v3523_v33 = vadd.f32 %v2719_v30, %v669_v31 }
 0x162   : > { %v686_v34 = vpack.c.bf16 %v3523_v33, %v3521_v32 }
 0x164   : > { %2888 = vmatmul.mubr.msk.bf16.vlgmr.msra.gmra.mrb[0].mxu0 %vm634_vm0, %v686_v34 }
 0x165   : > { %2899 = vmatprep.mubr.msk.bf16.mxu0 %vm3325_vm1, %v3324_v16 }
 0x237   : > { %v747_v36 = vpop.f32.mrb[0].mxu0 }
 0x238   : > { %v2889_v37 = vpop.f32.mrb[1].mxu0  ;;  %v748_v39 = vadd.f32 %v2720_v35, %v747_v36 }
 0x239   : > { %v750_v38 = vpop.f32.mrb[2].mxu0 }
 0x23a   : > { %v751_v40 = vadd.f32 %v2720_v35, %v750_v38  ;;  %v2890_v41 = vpop.f32.mrb[3].mxu0 }
 0x23c   : > { %v3533_v42 = vpack.c.bf16 %v751_v40, %v748_v39 }
 0x23e   : > { %879 = vrot.lane.b32.xlu1 %v3533_v42, %s3972_s25  ;;  %756 = vrot.lane.b32.xlu0 %v3533_v42, %s3985_s29  ;;  %s3973_s25 = smov 72   ;;  %s4011_s29 = smov 72  }
 0x242   : > { %877 = vrot.lane.b32.xlu1 %v3533_v42, %s3981_s22  ;;  %998 = vrot.lane.b32.xlu0 %v3533_v42, %s3976_s23  ;;  %s4006_s22 = smov 96  }
 0x246   : > { %1000 = vrot.lane.b32.xlu1 %v3533_v42, %s3975_s24  ;;  %1119 = vrot.lane.b32.xlu0 %v3533_v42, %s3974_s28  ;;  %s4003_s24 = sld [smem:[#allocation8_spill]]  ;;  %s3977_s28 = smov 56  }
 0x24a   : > { %1121 = vrot.lane.b32.xlu1 %v3533_v42, %s3973_s25  ;;  %s3980_s25 = smov 64  }
 0x24c   : > { %s621_s23 = scalar_lea.vmem %s4003_s24, %s3491_s27  ;;  %s3978_s24 = smov 40  }
 0x24d   : > { %v678_v54 = vld [vmem:[%s621_s23] sm:$0x1]  ;;  %s3979_s23 = smov 48  }
 0x24e   : > { %v679_v55 = vunpack.c.l.bf16 %v678_v54 }
 0x250   : > { %v680_v57 = vsub.f32 1.0, %v679_v55 }
 0x252   : > { %v681_v59 = vmul.f32 -10000.0, %v680_v57 }
 0x254   : > { %v3574_v61 = vrot.slane %v681_v59, %v684_v60 }
 0x2b0   : > { %v757_v43 = vpop.permute.xlu0 %756  ;;  %v880_v45 = vpop.permute.xlu1 %879 }
 0x2b1   : > { %v763_v44 = vsel %vm758_vm2, %v757_v43, 0  ;;  %v885_v47 = vsel %vm758_vm2, %v880_v45, 0 }
 0x2b2   : > { %2892 = vmatpush3.bf16.xpose.msra.mxu1 %v763_v44 }
 0x2b3   : > { %2903 = vmatprep.subr.bf16.mxu1 %v3324_v16 }
 0x2b4   : > { %v878_v46 = vpop.permute.xlu1 %877  ;;  %v999_v51 = vpop.permute.xlu0 %998 }
 0x2b8   : > { %v1001_v48 = vpop.permute.xlu1 %1000  ;;  %v1120_v53 = vpop.permute.xlu0 %1119 }
 0x2b9   : > { %2894 = vmatmul.mubr.msk.bf16.vlgmr.msra.gmra.mrb[0].mxu1 %vm758_vm2, %v3533_v42  ;;  %v1006_v49 = vsel %vm758_vm2, %v1001_v48, 0 }
 0x2ba   : > { %2904 = vmatpush3.bf16.xpose.msra.mxu1 %v885_v47  ;;  %2905 = vmatprep.mubr.msk.bf16.mxu1 %vm3325_vm1, %v3324_v16 }
 0x2bb   : > { %2915 = vmatprep.subr.bf16.mxu1 %v3324_v16 }
 0x2bc   : > { %v1122_v50 = vpop.permute.xlu1 %1121 }
 0x2bd   : > { %v1127_v52 = vsel %vm758_vm2, %v1122_v50, 0 }
 0x2c1   : > { %2906 = vmatmul.mubr.msk.bf16.vlgmr.msra.gmra.mrb[4].mxu1 %vm758_vm2, %v878_v46 }
 0x2c2   : > { %2916 = vmatpush3.bf16.xpose.msra.mxu1 %v1006_v49  ;;  %2917 = vmatprep.mubr.msk.bf16.mxu1 %vm3325_vm1, %v3324_v16 }
 0x2c3   : > { %2927 = vmatprep.subr.bf16.mxu1 %v3324_v16 }
 0x2c9   : > { %2918 = vmatmul.mubr.msk.bf16.vlgmr.msra.gmra.mrb[8].mxu1 %vm758_vm2, %v999_v51 }
 0x2ca   : > { %2928 = vmatpush3.bf16.xpose.msra.mxu1 %v1127_v52  ;;  %2929 = vmatprep.mubr.msk.bf16.mxu1 %vm3325_vm1, %v3324_v16 }
 0x2cb   : > { %2939 = vmatprep.subr.bf16.mxu1 %v3324_v16 }
 0x2d1   : > { %2930 = vmatmul.mubr.msk.bf16.vlgmr.msra.gmra.mrb[12].mxu1 %vm758_vm2, %v1120_v53 }
 0x2d2   : > { %2943 = vmatprep.mubr.msk.bf16.mxu1 %vm3325_vm1, %v3324_v16 }
 0x38c   : > { %v799_v62 = vpop.f32.mrb[0].mxu1 }
 0x38d   : > { %v800_v63 = vadd.f32 %v799_v62, %v3574_v61  ;;  %v2895_v0 = vpop.f32.mrb[1].mxu1 }
 0x38e   : > { %v802_v1 = vpop.f32.mrb[2].mxu1 }
 0x38f   : > { %v803_v2 = vadd.f32 %v802_v1, %v3574_v61  ;;  %v2896_v3 = vpop.f32.mrb[3].mxu1  ;;  %v807_v4 = vsel %vm806_vm3, %v800_v63, -inf }
 0x390   : > { %808 = vmax.xlane.f32.xlu1 %v807_v4 }
 0x391   : > { %v810_v5 = vsel %vm806_vm3, %v803_v2, -inf }
 0x392   : > { %811 = vmax.xlane.f32.xlu0 %v810_v5 }
 0x394   : > { %v921_v6 = vpop.f32.mrb[4].mxu1 }
 0x395   : > { %v922_v7 = vadd.f32 %v921_v6, %v3574_v61  ;;  %v2907_v8 = vpop.f32.mrb[5].mxu1 }
 0x396   : > { %v924_v9 = vpop.f32.mrb[6].mxu1 }
 0x397   : > { %v925_v10 = vadd.f32 %v924_v9, %v3574_v61  ;;  %v2908_v11 = vpop.f32.mrb[7].mxu1  ;;  %v928_v12 = vsel %vm806_vm3, %v922_v7, -inf }
 0x398   : > { %929 = vmax.xlane.f32.xlu0 %v928_v12 }
 0x399   : > { %v931_v13 = vsel %vm806_vm3, %v925_v10, -inf }
 0x39c   : > { %932 = vmax.xlane.f32.xlu0 %v931_v13  ;;  %v1042_v14 = vpop.f32.mrb[8].mxu1 }
 0x39d   : > { %v1043_v15 = vadd.f32 %v1042_v14, %v3574_v61  ;;  %v2919_v17 = vpop.f32.mrb[9].mxu1 }
 0x39e   : > { %v1045_v18 = vpop.f32.mrb[10].mxu1 }
 0x39f   : > { %v1046_v19 = vadd.f32 %v1045_v18, %v3574_v61  ;;  %v2920_v20 = vpop.f32.mrb[11].mxu1  ;;  %v1049_v21 = vsel %vm806_vm3, %v1043_v15, -inf }
 0x3a0   : > { %1050 = vmax.xlane.f32.xlu1 %v1049_v21 }
 0x3a1   : > { %v1052_v22 = vsel %vm806_vm3, %v1046_v19, -inf }
 0x3a2   : > { %1053 = vmax.xlane.f32.xlu0 %v1052_v22 }
 0x3a4   : > { %v1163_v23 = vpop.f32.mrb[12].mxu1 }
 0x3a5   : > { %v1164_v24 = vadd.f32 %v1163_v23, %v3574_v61  ;;  %v2931_v25 = vpop.f32.mrb[13].mxu1 }
 0x3a6   : > { %v1166_v26 = vpop.f32.mrb[14].mxu1 }
 0x3a7   : > { %v1167_v27 = vadd.f32 %v1166_v26, %v3574_v61  ;;  %v2932_v28 = vpop.f32.mrb[15].mxu1  ;;  %v1170_v29 = vsel %vm806_vm3, %v1164_v24, -inf }
 0x3a8   : > { %1171 = vmax.xlane.f32.xlu1 %v1170_v29 }
 0x3a9   : > { %v1173_v30 = vsel %vm806_vm3, %v1167_v27, -inf }
 0x3aa   : > { %1174 = vmax.xlane.f32.xlu0 %v1173_v30 }
 0x3b9   : > { %830 = vrot.lane.b32.xlu1 %v3533_v42, %s3980_s25  ;;  %s4008_s25 = smov 112  }
 0x41d   : > { %v809_v31 = vpop.xlane.xlu1 %808 }
 0x41e   : > { %v813_v34 = vsub.f32 %v800_v63, %v809_v31 }
 0x41f   : > { %v812_v35 = vpop.xlane.xlu0 %811 }
 0x420   : > { %v815_v36 = vmul.f32 1.442695, %v813_v34  ;;  %v814_v37 = vsub.f32 %v803_v2, %v812_v35 }
 0x422   : > { %3170 = vpow2.f32 %v815_v36  ;;  %v817_v38 = vmul.f32 1.442695, %v814_v37 }
 0x424   : > { %3172 = vpow2.f32 %v817_v38 }
 0x425   : > { %v930_v39 = vpop.xlane.xlu0 %929 }
 0x426   : > { %v934_v40 = vsub.f32 %v922_v7, %v930_v39 }
 0x428   : > { %v936_v41 = vmul.f32 1.442695, %v934_v40 }
 0x429   : > { %v933_v43 = vpop.xlane.xlu0 %932 }
 0x42a   : > { %3174 = vpow2.f32 %v936_v41  ;;  %v935_v44 = vsub.f32 %v925_v10, %v933_v43 }
 0x42c   : > { %v3171_v45 = vpop.eup %3170  ;;  %v938_v46 = vmul.f32 1.442695, %v935_v44 }
 0x42d   : > { %v1051_v47 = vpop.xlane.xlu1 %1050  ;;  %v819_v48 = vsel %vm806_vm3, %v3171_v45, 0.0 }
 0x42e   : > { %v3173_v49 = vpop.eup %3172  ;;  %3176 = vpow2.f32 %v938_v46  ;;  %v1055_v50 = vsub.f32 %v1043_v15, %v1051_v47  ;;  %820 = vadd.xlane.f32.xlu1 %v819_v48 }
 0x42f   : > { %v1054_v51 = vpop.xlane.xlu0 %1053  ;;  %v822_v52 = vsel %vm806_vm3, %v3173_v49, 0.0 }
 0x430   : > { %v1057_v53 = vmul.f32 1.442695, %v1055_v50  ;;  %v1056_v54 = vsub.f32 %v1046_v19, %v1054_v51  ;;  %823 = vadd.xlane.f32.xlu0 %v822_v52 }
 0x432   : > { %3178 = vpow2.f32 %v1057_v53  ;;  %v1059_v55 = vmul.f32 1.442695, %v1056_v54  ;;  %v3146_v53 = vld [vmem:[%s4004_s6] sm:$0xff]  }
 0x433   : > { %2940 = vmatpush3.bf16.msra.mxu1 %v3146_v53 }
 0x434   : > { %v3175_v56 = vpop.eup %3174  ;;  %3180 = vpow2.f32 %v1059_v55  ;;  %2941 = vmatprep.subr.bf16.mxu1 %v3324_v16 }
 0x435   : > { %v1172_v57 = vpop.xlane.xlu1 %1171  ;;  %v940_v58 = vsel %vm806_vm3, %v3175_v56, 0.0 }
 0x436   : > { %v1176_v59 = vsub.f32 %v1164_v24, %v1172_v57  ;;  %941 = vadd.xlane.f32.xlu1 %v940_v58  ;;  %v3147_v58 = vld [vmem:[%s4004_s6 + $0x8] sm:$0xff]  }
 0x437   : > { %v1175_v60 = vpop.xlane.xlu0 %1174  ;;  %2942 = vmatpush3.bf16.msra.mxu1 %v3147_v58 }
 0x438   : > { %v3177_v62 = vpop.eup %3176  ;;  %v1178_v63 = vmul.f32 1.442695, %v1176_v59  ;;  %v1177_v0 = vsub.f32 %v1167_v27, %v1175_v60  ;;  %2955 = vmatprep.subr.bf16.mxu1 %v3324_v16 }
 0x439   : > { %v831_v1 = vpop.permute.xlu1 %830  ;;  %v943_v2 = vsel %vm806_vm3, %v3177_v62, 0.0 }
 0x43a   : > { %3182 = vpow2.f32 %v1178_v63  ;;  %v1180_v3 = vmul.f32 1.442695, %v1177_v0  ;;  %2898 = vmatpush3.bf16.msra.mxu0 %v831_v1  ;;  %944 = vadd.xlane.f32.xlu0 %v943_v2 }
 0x43b   : > { %2909 = vmatprep.subr.bf16.mxu0 %v3324_v16 }
 0x43c   : > { %v3179_v4 = vpop.eup %3178  ;;  %3184 = vpow2.f32 %v1180_v3 }
 0x43d   : > { %v1061_v5 = vsel %vm806_vm3, %v3179_v4, 0.0 }
 0x43e   : > { %v3181_v6 = vpop.eup %3180  ;;  %1062 = vadd.xlane.f32.xlu1 %v1061_v5 }
 0x43f   : > { %v1064_v7 = vsel %vm806_vm3, %v3181_v6, 0.0 }
 0x440   : > { %1065 = vadd.xlane.f32.xlu0 %v1064_v7 }
 0x444   : > { %v3183_v8 = vpop.eup %3182 }
 0x445   : > { %v1182_v9 = vsel %vm806_vm3, %v3183_v8, 0.0 }
 0x446   : > { %v3185_v10 = vpop.eup %3184  ;;  %1183 = vadd.xlane.f32.xlu1 %v1182_v9 }
 0x447   : > { %v1185_v11 = vsel %vm806_vm3, %v3185_v10, 0.0 }
 0x448   : > { %1186 = vadd.xlane.f32.xlu0 %v1185_v11 }
 0x457   : > { %1072 = vrot.lane.b32.xlu1 %v3533_v42, %s3979_s23  ;;  %s3984_s23 = smov 8  }
 0x45b   : > { %1193 = vrot.lane.b32.xlu1 %v3533_v42, %s3978_s24  ;;  %s3983_s24 = smov 16  }
 0x45e   : > { %951 = vrot.lane.b32.xlu0 %v3533_v42, %s3977_s28  ;;  %s3982_s28 = smov 24  }
 0x4bb   : > { %v821_v12 = vpop.xlane.xlu1 %820 }
 0x4bc   : > { %3186 = vrcp.f32 %v821_v12 }
 0x4bd   : > { %v824_v13 = vpop.xlane.xlu0 %823 }
 0x4be   : > { %3188 = vrcp.f32 %v824_v13 }
 0x4c3   : > { %v942_v20 = vpop.xlane.xlu1 %941 }
 0x4c6   : > { %v3187_v14 = vpop.eup %3186 }
 0x4c7   : > { %v945_v15 = vpop.xlane.xlu0 %944  ;;  %v826_v18 = vmul.f32 %v3187_v14, %v3171_v45 }
 0x4c8   : > { %v3189_v17 = vpop.eup %3188  ;;  %3190 = vrcp.f32 %v945_v15 }
 0x4c9   : > { %v828_v19 = vmul.f32 %v3189_v17, %v3173_v49  ;;  %3192 = vrcp.f32 %v942_v20 }
 0x4cb   : > { %v829_v21 = vpack.c.bf16 %v828_v19, %v826_v18  ;;  %v1063_v42 = vpop.xlane.xlu1 %1062 }
 0x4cd   : > { %2900 = vmatmul.mubr.msk.bf16.vlgmr.msra.gmra.mrb[4].mxu0 %vm806_vm3, %v829_v21  ;;  %v1066_v22 = vpop.xlane.xlu0 %1065  ;;  %v2735_v21 = vld [vmem:[%s3959_s7] ss:$0 sm:$0xff] }
 0x4ce   : > { %2911 = vmatprep.mubr.msk.bf16.mxu0 %vm3325_vm1, %v3324_v16  ;;  %3194 = vrcp.f32 %v1066_v22 }
 0x4cf   : > { %3196 = vrcp.f32 %v1063_v42 }
 0x4d2   : > { %v3191_v23 = vpop.eup %3190 }
 0x4d3   : > { %v3193_v25 = vpop.eup %3192  ;;  %v949_v26 = vmul.f32 %v3191_v23, %v3177_v62  ;;  %v1184_v27 = vpop.xlane.xlu1 %1183 }
 0x4d4   : > { %v947_v28 = vmul.f32 %v3193_v25, %v3175_v56 }
 0x4d5   : > { %v1187_v24 = vpop.xlane.xlu0 %1186 }
 0x4d6   : > { %3198 = vrcp.f32 %v1187_v24  ;;  %v950_v30 = vpack.c.bf16 %v949_v26, %v947_v28 }
 0x4d7   : > { %3200 = vrcp.f32 %v1184_v27  ;;  %v1073_v34 = vpop.permute.xlu1 %1072 }
 0x4d8   : > { %v3195_v31 = vpop.eup %3194 }
 0x4d9   : > { %v952_v29 = vpop.permute.xlu0 %951  ;;  %v3197_v35 = vpop.eup %3196  ;;  %v1070_v36 = vmul.f32 %v3195_v31, %v3181_v6 }
 0x4da   : > { %2910 = vmatpush3.bf16.msra.mxu0 %v952_v29  ;;  %v1068_v37 = vmul.f32 %v3197_v35, %v3179_v4 }
 0x4db   : > { %2921 = vmatprep.subr.bf16.mxu0 %v3324_v16  ;;  %v1194_v40 = vpop.permute.xlu1 %1193 }
 0x4dc   : > { %v1071_v38 = vpack.c.bf16 %v1070_v36, %v1068_v37 }
 0x4dd   : > { %2912 = vmatmul.mubr.msk.bf16.vlgmr.msra.gmra.mrb[8].mxu0 %vm806_vm3, %v950_v30 }
 0x4de   : > { %2922 = vmatpush3.bf16.msra.mxu0 %v1073_v34  ;;  %2923 = vmatprep.mubr.msk.bf16.mxu0 %vm3325_vm1, %v3324_v16 }
 0x4df   : > { %2933 = vmatprep.subr.bf16.mxu0 %v3324_v16 }
 0x4e0   : > { %v3199_v39 = vpop.eup %3198 }
 0x4e1   : > { %v3201_v41 = vpop.eup %3200  ;;  %v1191_v43 = vmul.f32 %v3199_v39, %v3185_v10 }
 0x4e2   : > { %v1189_v44 = vmul.f32 %v3201_v41, %v3183_v8 }
 0x4e4   : > { %v1192_v45 = vpack.c.bf16 %v1191_v43, %v1189_v44  ;;  %v3149_v43 = vld [vmem:[%s3962_s10 + $0x8] sm:$0xff]  }
 0x4e5   : > { %2924 = vmatmul.mubr.msk.bf16.vlgmr.msra.gmra.mrb[12].mxu0 %vm806_vm3, %v1071_v38 }
 0x4e6   : > { %2934 = vmatpush3.bf16.msra.mxu0 %v1194_v40  ;;  %2935 = vmatprep.mubr.msk.bf16.mxu0 %vm3325_vm1, %v3324_v16 }
 0x4e7   : > { %2947 = vmatprep.subr.bf16.mxu0 %v3324_v16 }
 0x4ed   : > { %2936 = vmatmul.mubr.msk.bf16.vlgmr.msra.gmra.mrb[16].mxu0 %vm806_vm3, %v1192_v45 }
 0x4ee   : > { %2951 = vmatprep.mubr.msk.bf16.mxu0 %vm3325_vm1, %v3324_v16 }
 0x5a0   : > { %v870_v46 = vpop.f32.mrb[4].mxu0 }
 0x5a1   : > { %v2901_v47 = vpop.f32.mrb[5].mxu0 }
 0x5a2   : > { %v873_v48 = vpop.f32.mrb[6].mxu0 }
 0x5a3   : > { %v2902_v49 = vpop.f32.mrb[7].mxu0 }
 0x5b0   : > { %v991_v50 = vpop.f32.mrb[8].mxu0 }
 0x5b1   : > { %v2913_v51 = vpop.f32.mrb[9].mxu0 }
 0x5b2   : > { %v994_v52 = vpop.f32.mrb[10].mxu0 }
 0x5b3   : > { %v3114_v54 = vpack.i.bf16 %v994_v52, %v991_v50  ;;  %v2914_v55 = vpop.f32.mrb[11].mxu0  ;;  %v2736_v52 = vld [vmem:[%s3960_s8] ss:$0 sm:$0xff] }
 0x5b5   : > { %3115 = vrot.lane.b32.xlu1 %v3114_v54, %s3984_s23  ;;  %s4005_s23 = smov 88  }
 0x5b8   : > { %v1112_v56 = vpop.f32.mrb[12].mxu0 }
 0x5b9   : > { %v2925_v57 = vpop.f32.mrb[13].mxu0 }
 0x5ba   : > { %v1115_v59 = vpop.f32.mrb[14].mxu0 }
 0x5bb   : > { %v3119_v60 = vpack.i.bf16 %v1115_v59, %v1112_v56  ;;  %v2926_v62 = vpop.f32.mrb[15].mxu0  ;;  %v2737_v56 = vld [vmem:[%s3961_s9] ss:$0 sm:$0xff] }
 0x5bc   : > { %v3150_v62 = vld [vmem:[%s3964_s12] sm:$0xff]  }
 0x5bd   : > { %3120 = vrot.lane.b32.xlu0 %v3119_v60, %s3983_s24  ;;  %s4009_s24 = smov 80  }
 0x5c0   : > { %v1233_v63 = vpop.f32.mrb[16].mxu0 }
 0x5c1   : > { %v2937_v0 = vpop.f32.mrb[17].mxu0 }
 0x5c2   : > { %v1236_v1 = vpop.f32.mrb[18].mxu0  ;;  %v3152_v0 = vld [vmem:[%s3964_s12 + $0x10] sm:$0xff]  }
 0x5c3   : > { %v3124_v2 = vpack.i.bf16 %v1236_v1, %v1233_v63  ;;  %v2938_v3 = vpop.f32.mrb[19].mxu0  ;;  %v3151_v63 = vld [vmem:[%s3964_s12 + $0x8] sm:$0xff]   ;;  %v3153_v1 = vld [vmem:[%s3964_s12 + $0x18] sm:$0xff]  }
 0x5c5   : > { %3125 = vrot.lane.b32.xlu1 %v3124_v2, %s3982_s28  ;;  %v2738_v2 = vld [vmem:[%s3963_s11] ss:$0 sm:$0xff]  ;;  %s4010_s28 = smov 104  }
 0x627   : > { %v3116_v4 = vpop.permute.xlu1 %3115 }
 0x628   : > { %v3118_v6 = vunpack.i.h.bf16 %v3116_v4  ;;  %v3117_v7 = vunpack.i.l.bf16 %v3116_v4 }
 0x62a   : > { %v1265_v11 = vsel %vm758_vm2, %v873_v48, %v3118_v6  ;;  %v1264_v12 = vsel %vm758_vm2, %v870_v46, %v3117_v7 }
 0x62f   : > { %v3121_v5 = vpop.permute.xlu0 %3120 }
 0x630   : > { %v3123_v8 = vunpack.i.h.bf16 %v3121_v5  ;;  %v3122_v9 = vunpack.i.l.bf16 %v3121_v5 }
 0x632   : > { %v1267_v15 = vsel %vm806_vm3, %v1265_v11, %v3123_v8  ;;  %v1266_v17 = vsel %vm806_vm3, %v1264_v12, %v3122_v9 }
 0x637   : > { %v3126_v10 = vpop.permute.xlu1 %3125 }
 0x638   : > { %v3128_v13 = vunpack.i.h.bf16 %v3126_v10  ;;  %v3127_v14 = vunpack.i.l.bf16 %v3126_v10 }
 0x63a   : > { %v1270_v18 = vsel %vm1268_vm4, %v1267_v15, %v3128_v13  ;;  %v1269_v19 = vsel %vm1268_vm4, %v1266_v17, %v3127_v14 }
 0x63b   : > { %v1271_v20 = vpack.c.bf16 %v1270_v18, %v1269_v19 }
 0x63d   : > { %2944 = vmatmul.mubr.msk.bf16.vlgmr.msra.gmra.mrb[16].mxu1 %vm634_vm0, %v1271_v20 }
 0x63e   : > { %2963 = vmatprep.mubr.msk.bf16.mxu1 %vm3325_vm1, %v3324_v16  ;;  %2956 = vmatpush3.bf16.msra.mxu1 %v3150_v62 }
 0x63f   : > { %2957 = vmatprep.subr.bf16.mxu1 %v3324_v16 }
 0x642   : > { %2958 = vmatpush3.bf16.msra.mxu1 %v3151_v63 }
 0x643   : > { %2959 = vmatprep.subr.bf16.mxu1 %v3324_v16 }
 0x646   : > { %2960 = vmatpush3.bf16.msra.mxu1 %v3152_v0 }
 0x647   : > { %2961 = vmatprep.subr.bf16.mxu1 %v3324_v16 }
 0x64a   : > { %2962 = vmatpush3.bf16.msra.mxu1 %v3153_v1  ;;  %v2749_v1 = vld [vmem:[%s3967_s15] ss:$0 sm:$0xff] }
 0x64b   : > { %2981 = vmatprep.subr.bf16.mxu1 %v3324_v16 }
 0x710   : > { %v1325_v22 = vpop.f32.mrb[16].mxu1 }
 0x711   : > { %v1339_v42 = vadd.f32 %v2735_v21, %v1325_v22  ;;  %v2945_v23 = vpop.f32.mrb[17].mxu1 }
 0x712   : > { %v1328_v24 = vpop.f32.mrb[18].mxu1 }
 0x713   : > { %v1340_v25 = vadd.f32 %v2735_v21, %v1328_v24  ;;  %v2946_v26 = vpop.f32.mrb[19].mxu1  ;;  %v1341_v27 = vadd.f32 %v1339_v42, %v3521_v32 }
 0x715   : > { %v1345_v28 = vsel %vm634_vm0, %v1341_v27, 0.0  ;;  %v1342_v29 = vadd.f32 %v1340_v25, %v3523_v33  ;;  %v3148_v33 = vld [vmem:[%s3962_s10] sm:$0xff]  }
 0x716   : > { %1346 = vadd.xlane.f32.xlu0 %v1345_v28  ;;  %2948 = vmatpush3.bf16.msra.mxu0 %v3148_v33  ;;  %v2747_v28 = vld [vmem:[%s3965_s13] ss:$0 sm:$0xff] }
 0x717   : > { %v1348_v30 = vsel %vm634_vm0, %v1342_v29, 0.0  ;;  %2949 = vmatprep.subr.bf16.mxu0 %v3324_v16 }
 0x718   : > { %1349 = vadd.xlane.f32.xlu1 %v1348_v30 }
 0x71a   : > { %2950 = vmatpush3.bf16.msra.mxu0 %v3149_v43 }
 0x71b   : > { %2967 = vmatprep.subr.bf16.mxu0 %v3324_v16 }
 0x7a3   : > { %v1347_v31 = vpop.xlane.xlu0 %1346 }
 0x7a4   : > { %v1351_v34 = vmul.f32 0.03125, %v1347_v31 }
 0x7a5   : > { %v1350_v35 = vpop.xlane.xlu1 %1349 }
 0x7a6   : > { %v1353_v36 = vsub.f32 %v1341_v27, %v1351_v34  ;;  %v1352_v37 = vmul.f32 0.03125, %v1350_v35 }
 0x7a8   : > { %v1354_v38 = vsub.f32 %v1342_v29, %v1352_v37  ;;  %v1355_v39 = vmul.f32 %v1353_v36, %v1353_v36 }
 0x7aa   : > { %v1357_v40 = vsel %vm634_vm0, %v1355_v39, 0.0  ;;  %v1356_v41 = vmul.f32 %v1354_v38, %v1354_v38 }
 0x7ab   : > { %1358 = vadd.xlane.f32.xlu0 %v1357_v40 }
 0x7ac   : > { %v1360_v32 = vsel %vm634_vm0, %v1356_v41, 0.0 }
 0x7af   : > { %1361 = vadd.xlane.f32.xlu0 %v1360_v32 }
 0x838   : > { %v1359_v44 = vpop.xlane.xlu0 %1358 }
 0x839   : > { %v1363_v45 = vmul.f32 0.03125, %v1359_v44 }
 0x83b   : > { %v1365_v46 = vadd.f32 1e-12, %v1363_v45 }
 0x83c   : > { %v1362_v47 = vpop.xlane.xlu0 %1361 }
 0x83d   : > { %3202 = vrsqrt.f32 %v1365_v46  ;;  %v1364_v48 = vmul.f32 0.03125, %v1362_v47 }
 0x83f   : > { %v1366_v49 = vadd.f32 1e-12, %v1364_v48 }
 0x841   : > { %3204 = vrsqrt.f32 %v1366_v49 }
 0x847   : > { %v3203_v50 = vpop.eup %3202 }
 0x848   : > { %v1369_v51 = vmul.f32 %v3203_v50, %v1353_v36  ;;  %v3154_v50 = vld [vmem:[%s3999_s4 + $0x10] sm:$0xff]  }
 0x84a   : > { %v1377_v54 = vmul.f32 %v2736_v52, %v1369_v51  ;;  %v3155_v51 = vld [vmem:[%s3999_s4 + $0x18] sm:$0xff]   ;;  %s2815_s4 = sshll.u32 %s3491_s27, 4 }
 0x84b   : > { %v3205_v53 = vpop.eup %3204 }
 0x84c   : > { %v1370_v55 = vmul.f32 %v3205_v53, %v1354_v38  ;;  %v1385_v58 = vadd.f32 %v2737_v56, %v1377_v54 }
 0x84e   : > { %v1378_v57 = vmul.f32 %v2736_v52, %v1370_v55 }
 0x850   : > { %v1386_v59 = vadd.f32 %v2737_v56, %v1378_v57 }
 0x852   : > { %v1387_v60 = vpack.c.bf16 %v1386_v59, %v1385_v58 }
 0x854   : > { %2952 = vmatmul.mubr.msk.bf16.vlgmr.msra.gmra.mrb[20].mxu0 %vm634_vm0, %v1387_v60 }
 0x855   : > { %2971 = vmatprep.mubr.msk.bf16.mxu0 %vm3325_vm1, %v3324_v16  ;;  %2968 = vmatpush3.bf16.msra.mxu0 %v3154_v50 }
 0x856   : > { %2969 = vmatprep.subr.bf16.mxu0 %v3324_v16 }
 0x859   : > { %2970 = vmatpush3.bf16.msra.mxu0 %v3155_v51 }
 0x85a   : > { %2975 = vmatprep.subr.bf16.mxu0 %v3324_v16 }
 0x927   : > { %v1448_v3 = vpop.f32.mrb[20].mxu0 }
 0x928   : > { %v1449_v4 = vadd.f32 %v2738_v2, %v1448_v3  ;;  %v2953_v5 = vpop.f32.mrb[21].mxu0 }
 0x929   : > { %v1451_v6 = vpop.f32.mrb[22].mxu0 }
 0x92a   : > { %v1455_v7 = vmul.f32 %v1449_v4, %v1449_v4  ;;  %v1452_v8 = vadd.f32 %v2738_v2, %v1451_v6  ;;  %v2954_v9 = vpop.f32.mrb[23].mxu0  ;;  %v2755_v6 = vld [vmem:[%s4002_s5 + $0x1] ss:$0 sm:$0xff] }
 0x92c   : > { %v1457_v10 = vmul.f32 %v1455_v7, %v1449_v4  ;;  %v1456_v11 = vmul.f32 %v1452_v8, %v1452_v8 }
 0x92e   : > { %v1459_v12 = vmul.f32 0.044715, %v1457_v10  ;;  %v1458_v13 = vmul.f32 %v1456_v11, %v1452_v8 }
 0x930   : > { %v1461_v14 = vadd.f32 %v1459_v12, %v1449_v4  ;;  %v1460_v15 = vmul.f32 0.044715, %v1458_v13 }
 0x932   : > { %v1463_v17 = vmul.f32 0.7978846, %v1461_v14  ;;  %v1462_v18 = vadd.f32 %v1460_v15, %v1452_v8 }
 0x934   : > { %3206 = vtanh.f32 %v1463_v17  ;;  %v1464_v19 = vmul.f32 0.7978846, %v1462_v18 }
 0x936   : > { %3208 = vtanh.f32 %v1464_v19 }
 0x93e   : > { %v3207_v20 = vpop.eup %3206 }
 0x93f   : > { %v1467_v21 = vadd.f32 1.0, %v3207_v20 }
 0x940   : > { %v3209_v22 = vpop.eup %3208 }
 0x941   : > { %v1469_v42 = vmul.f32 0.5, %v1467_v21  ;;  %v1468_v23 = vadd.f32 1.0, %v3209_v22 }
 0x943   : > { %v1470_v24 = vmul.f32 0.5, %v1468_v23  ;;  %v1471_v25 = vmul.f32 %v1469_v42, %v1449_v4 }
 0x945   : > { %v1472_v26 = vmul.f32 %v1470_v24, %v1452_v8 }
 0x947   : > { %v1473_v27 = vpack.c.bf16 %v1472_v26, %v1471_v25 }
 0x949   : > { %2964 = vmatmul.mubr.msk.bf16.vlgmr.msra.gmra.mrb[20].mxu1 %vm1506_vm5, %v1473_v27 }
 0x94a   : > { %2983 = vmatprep.mubr.msk.bf16.mxu1 %vm3325_vm1, %v3324_v16 }
 0xa1c   : > { %v1544_v29 = vpop.f32.mrb[20].mxu1 }
 0xa1d   : > { %v1558_v30 = vadd.f32 %v2747_v28, %v1544_v29  ;;  %v2965_v31 = vpop.f32.mrb[21].mxu1 }
 0xa1e   : > { %v1547_v34 = vpop.f32.mrb[22].mxu1 }
 0xa1f   : > { %v1559_v35 = vadd.f32 %v2747_v28, %v1547_v34  ;;  %v2966_v36 = vpop.f32.mrb[23].mxu1  ;;  %v1560_v37 = vadd.f32 %v1558_v30, %v1385_v58 }
 0xa21   : > { %v1564_v38 = vsel %vm634_vm0, %v1560_v37, 0.0  ;;  %v1561_v39 = vadd.f32 %v1559_v35, %v1386_v59  ;;  %v2748_v59 = vld [vmem:[%s3966_s14] ss:$0 sm:$0xff] }
 0xa22   : > { %1565 = vadd.xlane.f32.xlu0 %v1564_v38 }
 0xa23   : > { %v1567_v40 = vsel %vm634_vm0, %v1561_v39, 0.0 }
 0xa24   : > { %1568 = vadd.xlane.f32.xlu1 %v1567_v40 }
 0xaaf   : > { %v1566_v41 = vpop.xlane.xlu0 %1565 }
 0xab0   : > { %v1570_v32 = vmul.f32 0.03125, %v1566_v41 }
 0xab1   : > { %v1569_v33 = vpop.xlane.xlu1 %1568 }
 0xab2   : > { %v1572_v43 = vsub.f32 %v1560_v37, %v1570_v32  ;;  %v1571_v44 = vmul.f32 0.03125, %v1569_v33 }
 0xab4   : > { %v1573_v45 = vsub.f32 %v1561_v39, %v1571_v44  ;;  %v1574_v46 = vmul.f32 %v1572_v43, %v1572_v43 }
 0xab6   : > { %v1576_v47 = vsel %vm634_vm0, %v1574_v46, 0.0  ;;  %v1575_v48 = vmul.f32 %v1573_v45, %v1573_v45 }
 0xab7   : > { %1577 = vadd.xlane.f32.xlu0 %v1576_v47 }
 0xab8   : > { %v1579_v49 = vsel %vm634_vm0, %v1575_v48, 0.0 }
 0xab9   : > { %1580 = vadd.xlane.f32.xlu1 %v1579_v49 }
 0xb44   : > { %v1578_v52 = vpop.xlane.xlu0 %1577 }
 0xb45   : > { %v1582_v53 = vmul.f32 0.03125, %v1578_v52 }
 0xb46   : > { %v1581_v54 = vpop.xlane.xlu1 %1580 }
 0xb47   : > { %v1584_v55 = vadd.f32 1e-12, %v1582_v53  ;;  %v1583_v56 = vmul.f32 0.03125, %v1581_v54 }
 0xb49   : > { %3210 = vrsqrt.f32 %v1584_v55  ;;  %v1585_v57 = vadd.f32 1e-12, %v1583_v56 }
 0xb4b   : > { %3212 = vrsqrt.f32 %v1585_v57 }
 0xb53   : > { %v3211_v58 = vpop.eup %3210 }
 0xb54   : > { %v1588_v60 = vmul.f32 %v3211_v58, %v1572_v43 }
 0xb55   : > { %v3213_v62 = vpop.eup %3212 }
 0xb56   : > { %v1596_v63 = vmul.f32 %v2748_v59, %v1588_v60  ;;  %v1589_v0 = vmul.f32 %v3213_v62, %v1573_v45 }
 0xb58   : > { %v1597_v2 = vmul.f32 %v2748_v59, %v1589_v0  ;;  %v3713_v3 = vadd.f32 %v2749_v1, %v1596_v63 }
 0xb5a   : > { %v3715_v4 = vadd.f32 %v2749_v1, %v1597_v2 }
 0xb5c   : > { %v1606_v5 = vpack.c.bf16 %v3715_v4, %v3713_v3 }
 0xb5e   : > { %2972 = vmatmul.mubr.msk.bf16.vlgmr.msra.gmra.mrb[24].mxu0 %vm634_vm0, %v1606_v5 }
 0xb5f   : > { %2977 = vmatprep.mubr.msk.bf16.mxu0 %vm3325_vm1, %v3324_v16 }
 0xc31   : > { %v1669_v7 = vpop.f32.mrb[24].mxu0 }
 0xc32   : > { %v2973_v8 = vpop.f32.mrb[25].mxu0  ;;  %v1670_v10 = vadd.f32 %v2755_v6, %v1669_v7 }
 0xc33   : > { %v1672_v9 = vpop.f32.mrb[26].mxu0 }
 0xc34   : > { %v1673_v11 = vadd.f32 %v2755_v6, %v1672_v9  ;;  %v2974_v12 = vpop.f32.mrb[27].mxu0 }
 0xc36   : > { %v3725_v13 = vpack.c.bf16 %v1673_v11, %v1670_v10 }
 0xc38   : > { %1799 = vrot.lane.b32.xlu1 %v3725_v13, %s4005_s23  ;;  %1678 = vrot.lane.b32.xlu0 %v3725_v13, %s4006_s22  ;;  %s4012_s23 = smov 64   ;;  %s4013_s22 = smov 48  }
 0xc3c   : > { %1797 = vrot.lane.b32.xlu1 %v3725_v13, %s4007_s20  ;;  %1918 = vrot.lane.b32.xlu0 %v3725_v13, %s4008_s25  ;;  %s4014_s20 = smov 40   ;;  %s4015_s25 = smov 56  }
 0xc40   : > { %1920 = vrot.lane.b32.xlu1 %v3725_v13, %s4009_s24  ;;  %2039 = vrot.lane.b32.xlu0 %v3725_v13, %s4010_s28 }
 0xc44   : > { %2041 = vrot.lane.b32.xlu1 %v3725_v13, %s4011_s29  ;;  %s4016_s29 = smov 8  }
 0xcaa   : > { %v1679_v14 = vpop.permute.xlu0 %1678  ;;  %v1800_v17 = vpop.permute.xlu1 %1799 }
 0xcab   : > { %v1684_v15 = vsel %vm758_vm2, %v1679_v14, 0  ;;  %v1805_v19 = vsel %vm758_vm2, %v1800_v17, 0 }
 0xcac   : > { %2976 = vmatpush3.bf16.xpose.msra.mxu0 %v1684_v15 }
 0xcad   : > { %2987 = vmatprep.subr.bf16.mxu0 %v3324_v16 }
 0xcae   : > { %v1798_v18 = vpop.permute.xlu1 %1797  ;;  %v1919_v42 = vpop.permute.xlu0 %1918 }
 0xcb2   : > { %v1921_v20 = vpop.permute.xlu1 %1920  ;;  %v2040_v24 = vpop.permute.xlu0 %2039 }
 0xcb3   : > { %2978 = vmatmul.mubr.msk.bf16.vlgmr.msra.gmra.mrb[28].mxu0 %vm758_vm2, %v3725_v13  ;;  %v1926_v21 = vsel %vm758_vm2, %v1921_v20, 0 }
 0xcb4   : > { %2988 = vmatpush3.bf16.xpose.msra.mxu0 %v1805_v19  ;;  %2989 = vmatprep.mubr.msk.bf16.mxu0 %vm3325_vm1, %v3324_v16 }
 0xcb5   : > { %2999 = vmatprep.subr.bf16.mxu0 %v3324_v16 }
 0xcb6   : > { %v2042_v22 = vpop.permute.xlu1 %2041 }
 0xcb7   : > { %v2047_v23 = vsel %vm758_vm2, %v2042_v22, 0 }
 0xcbb   : > { %2990 = vmatmul.mubr.msk.bf16.vlgmr.msra.gmra.mrb[32].mxu0 %vm758_vm2, %v1798_v18 }
 0xcbc   : > { %3000 = vmatpush3.bf16.xpose.msra.mxu0 %v1926_v21  ;;  %3001 = vmatprep.mubr.msk.bf16.mxu0 %vm3325_vm1, %v3324_v16 }
 0xcbd   : > { %3011 = vmatprep.subr.bf16.mxu0 %v3324_v16 }
 0xcc3   : > { %3002 = vmatmul.mubr.msk.bf16.vlgmr.msra.gmra.mrb[36].mxu0 %vm758_vm2, %v1919_v42 }
 0xcc4   : > { %3012 = vmatpush3.bf16.xpose.msra.mxu0 %v2047_v23  ;;  %3013 = vmatprep.mubr.msk.bf16.mxu0 %vm3325_vm1, %v3324_v16 }
 0xcc5   : > { %3023 = vmatprep.subr.bf16.mxu0 %v3324_v16 }
 0xccb   : > { %3014 = vmatmul.mubr.msk.bf16.vlgmr.msra.gmra.mrb[40].mxu0 %vm758_vm2, %v2040_v24 }
 0xccc   : > { %3027 = vmatprep.mubr.msk.bf16.mxu0 %vm3325_vm1, %v3324_v16 }
 0xd86   : > { %v1720_v25 = vpop.f32.mrb[28].mxu0 }
 0xd87   : > { %v1721_v26 = vadd.f32 %v1720_v25, %v3574_v61  ;;  %v2979_v27 = vpop.f32.mrb[29].mxu0 }
 0xd88   : > { %v1723_v28 = vpop.f32.mrb[30].mxu0 }
 0xd89   : > { %v1724_v29 = vadd.f32 %v1723_v28, %v3574_v61  ;;  %v2980_v30 = vpop.f32.mrb[31].mxu0  ;;  %v1727_v31 = vsel %vm806_vm3, %v1721_v26, -inf }
 0xd8a   : > { %1728 = vmax.xlane.f32.xlu1 %v1727_v31 }
 0xd8b   : > { %v1730_v34 = vsel %vm806_vm3, %v1724_v29, -inf }
 0xd8c   : > { %1731 = vmax.xlane.f32.xlu0 %v1730_v34 }
 0xd8e   : > { %v1841_v35 = vpop.f32.mrb[32].mxu0 }
 0xd8f   : > { %v1842_v36 = vadd.f32 %v1841_v35, %v3574_v61  ;;  %v2991_v37 = vpop.f32.mrb[33].mxu0 }
 0xd90   : > { %v1844_v38 = vpop.f32.mrb[34].mxu0 }
 0xd91   : > { %v1845_v39 = vadd.f32 %v1844_v38, %v3574_v61  ;;  %v2992_v40 = vpop.f32.mrb[35].mxu0  ;;  %v1848_v41 = vsel %vm806_vm3, %v1842_v36, -inf }
 0xd92   : > { %1849 = vmax.xlane.f32.xlu0 %v1848_v41 }
 0xd93   : > { %v1851_v32 = vsel %vm806_vm3, %v1845_v39, -inf }
 0xd96   : > { %1852 = vmax.xlane.f32.xlu0 %v1851_v32  ;;  %v1962_v33 = vpop.f32.mrb[36].mxu0 }
 0xd97   : > { %v1963_v43 = vadd.f32 %v1962_v33, %v3574_v61  ;;  %v3003_v44 = vpop.f32.mrb[37].mxu0 }
 0xd98   : > { %v1965_v45 = vpop.f32.mrb[38].mxu0 }
 0xd99   : > { %v1966_v46 = vadd.f32 %v1965_v45, %v3574_v61  ;;  %v3004_v47 = vpop.f32.mrb[39].mxu0  ;;  %v1969_v48 = vsel %vm806_vm3, %v1963_v43, -inf }
 0xd9a   : > { %1970 = vmax.xlane.f32.xlu1 %v1969_v48 }
 0xd9b   : > { %v1972_v49 = vsel %vm806_vm3, %v1966_v46, -inf }
 0xd9c   : > { %1973 = vmax.xlane.f32.xlu0 %v1972_v49 }
 0xd9e   : > { %v2083_v50 = vpop.f32.mrb[40].mxu0 }
 0xd9f   : > { %v2084_v51 = vadd.f32 %v2083_v50, %v3574_v61  ;;  %v3015_v52 = vpop.f32.mrb[41].mxu0 }
 0xda0   : > { %v2086_v53 = vpop.f32.mrb[42].mxu0 }
 0xda1   : > { %v2087_v54 = vadd.f32 %v2086_v53, %v3574_v61  ;;  %v3016_v55 = vpop.f32.mrb[43].mxu0  ;;  %v2090_v56 = vsel %vm806_vm3, %v2084_v51, -inf }
 0xda2   : > { %2091 = vmax.xlane.f32.xlu1 %v2090_v56 }
 0xda3   : > { %v2093_v57 = vsel %vm806_vm3, %v2087_v54, -inf }
 0xda4   : > { %2094 = vmax.xlane.f32.xlu0 %v2093_v57 }
 0xdb3   : > { %1750 = vrot.lane.b32.xlu1 %v3725_v13, %s4012_s23 }
 0xe17   : > { %v1729_v58 = vpop.xlane.xlu1 %1728 }
 0xe18   : > { %v1733_v59 = vsub.f32 %v1721_v26, %v1729_v58 }
 0xe19   : > { %v1732_v60 = vpop.xlane.xlu0 %1731 }
 0xe1a   : > { %v1735_v62 = vmul.f32 1.442695, %v1733_v59  ;;  %v1734_v63 = vsub.f32 %v1724_v29, %v1732_v60 }
 0xe1c   : > { %3214 = vpow2.f32 %v1735_v62  ;;  %v1737_v0 = vmul.f32 1.442695, %v1734_v63 }
 0xe1e   : > { %3216 = vpow2.f32 %v1737_v0 }
 0xe1f   : > { %v1850_v1 = vpop.xlane.xlu0 %1849 }
 0xe20   : > { %v1854_v61 = vsub.f32 %v1842_v36, %v1850_v1 }
 0xe22   : > { %v1856_v2 = vmul.f32 1.442695, %v1854_v61 }
 0xe23   : > { %v1853_v5 = vpop.xlane.xlu0 %1852 }
 0xe24   : > { %3218 = vpow2.f32 %v1856_v2  ;;  %v1855_v6 = vsub.f32 %v1845_v39, %v1853_v5 }
 0xe26   : > { %v3215_v7 = vpop.eup %3214  ;;  %v1858_v8 = vmul.f32 1.442695, %v1855_v6 }
 0xe27   : > { %v1971_v9 = vpop.xlane.xlu1 %1970  ;;  %v1739_v10 = vsel %vm806_vm3, %v3215_v7, 0.0 }
 0xe28   : > { %v3217_v11 = vpop.eup %3216  ;;  %3220 = vpow2.f32 %v1858_v8  ;;  %v1975_v12 = vsub.f32 %v1963_v43, %v1971_v9  ;;  %1740 = vadd.xlane.f32.xlu1 %v1739_v10 }
 0xe29   : > { %v1974_v14 = vpop.xlane.xlu0 %1973  ;;  %v1742_v15 = vsel %vm806_vm3, %v3217_v11, 0.0 }
 0xe2a   : > { %v1977_v17 = vmul.f32 1.442695, %v1975_v12  ;;  %v1976_v18 = vsub.f32 %v1966_v46, %v1974_v14  ;;  %1743 = vadd.xlane.f32.xlu0 %v1742_v15  ;;  %v3156_v15 = vld [vmem:[%s4004_s6 + $0x10] sm:$0xff]  }
 0xe2b   : > { %3024 = vmatpush3.bf16.msra.mxu0 %v3156_v15 }
 0xe2c   : > { %3222 = vpow2.f32 %v1977_v17  ;;  %v1979_v19 = vmul.f32 1.442695, %v1976_v18  ;;  %3025 = vmatprep.subr.bf16.mxu0 %v3324_v16 }
 0xe2e   : > { %v3219_v20 = vpop.eup %3218  ;;  %3224 = vpow2.f32 %v1979_v19 }
 0xe2f   : > { %v2092_v21 = vpop.xlane.xlu1 %2091  ;;  %v1860_v22 = vsel %vm806_vm3, %v3219_v20, 0.0 }
 0xe30   : > { %v2096_v42 = vsub.f32 %v2084_v51, %v2092_v21  ;;  %1861 = vadd.xlane.f32.xlu1 %v1860_v22  ;;  %v3157_v21 = vld [vmem:[%s4004_s6 + $0x18] sm:$0xff]  }
 0xe31   : > { %v2095_v23 = vpop.xlane.xlu0 %2094  ;;  %3026 = vmatpush3.bf16.msra.mxu0 %v3157_v21 }
 0xe32   : > { %v3221_v24 = vpop.eup %3220  ;;  %v2098_v25 = vmul.f32 1.442695, %v2096_v42  ;;  %v2097_v26 = vsub.f32 %v2087_v54, %v2095_v23  ;;  %3039 = vmatprep.subr.bf16.mxu0 %v3324_v16 }
 0xe33   : > { %v1751_v27 = vpop.permute.xlu1 %1750  ;;  %v1863_v28 = vsel %vm806_vm3, %v3221_v24, 0.0 }
 0xe34   : > { %3226 = vpow2.f32 %v2098_v25  ;;  %v2100_v29 = vmul.f32 1.442695, %v2097_v26  ;;  %2982 = vmatpush3.bf16.msra.mxu1 %v1751_v27  ;;  %1864 = vadd.xlane.f32.xlu0 %v1863_v28 }
 0xe35   : > { %2993 = vmatprep.subr.bf16.mxu1 %v3324_v16 }
 0xe36   : > { %v3223_v30 = vpop.eup %3222  ;;  %3228 = vpow2.f32 %v2100_v29 }
 0xe37   : > { %v1981_v31 = vsel %vm806_vm3, %v3223_v30, 0.0 }
 0xe38   : > { %v3225_v34 = vpop.eup %3224  ;;  %1982 = vadd.xlane.f32.xlu1 %v1981_v31 }
 0xe39   : > { %v1984_v35 = vsel %vm806_vm3, %v3225_v34, 0.0 }
 0xe3a   : > { %1985 = vadd.xlane.f32.xlu0 %v1984_v35 }
 0xe3e   : > { %v3227_v36 = vpop.eup %3226 }
 0xe3f   : > { %v2102_v37 = vsel %vm806_vm3, %v3227_v36, 0.0 }
 0xe40   : > { %v3229_v38 = vpop.eup %3228  ;;  %2103 = vadd.xlane.f32.xlu1 %v2102_v37 }
 0xe41   : > { %v2105_v39 = vsel %vm806_vm3, %v3229_v38, 0.0 }
 0xe42   : > { %2106 = vadd.xlane.f32.xlu0 %v2105_v39 }
 0xe51   : > { %1992 = vrot.lane.b32.xlu1 %v3725_v13, %s4013_s22  ;;  %s612_s22 = sand.u32 1, %s3314_s30  }
 0xe52   : > { %s2606_s27 = scalar_lea.sflag [#allocation3], %s612_s22 }
 0xe55   : > { %2113 = vrot.lane.b32.xlu1 %v3725_v13, %s4014_s20  ;;  %s4017_s20 = smov 16  }
 0xe58   : > { %1871 = vrot.lane.b32.xlu0 %v3725_v13, %s4015_s25  ;;  %s4018_s25 = smov 24  }
 0xeb5   : > { %v1741_v40 = vpop.xlane.xlu1 %1740 }
 0xeb6   : > { %3230 = vrcp.f32 %v1741_v40 }
 0xeb7   : > { %v1744_v41 = vpop.xlane.xlu0 %1743 }
 0xeb8   : > { %3232 = vrcp.f32 %v1744_v41 }
 0xebd   : > { %v1862_v46 = vpop.xlane.xlu1 %1861 }
 0xec0   : > { %v3231_v32 = vpop.eup %3230 }
 0xec1   : > { %v1865_v33 = vpop.xlane.xlu0 %1864  ;;  %v1746_v44 = vmul.f32 %v3231_v32, %v3215_v7 }
 0xec2   : > { %v3233_v43 = vpop.eup %3232  ;;  %3234 = vrcp.f32 %v1865_v33 }
 0xec3   : > { %v1748_v45 = vmul.f32 %v3233_v43, %v3217_v11  ;;  %3236 = vrcp.f32 %v1862_v46  ;;  %v2775_v46 = vld [vmem:[%s3959_s7 + $0x1] ss:$0 sm:$0xff] }
 0xec5   : > { %v1749_v47 = vpack.c.bf16 %v1748_v45, %v1746_v44  ;;  %v1983_v13 = vpop.xlane.xlu1 %1982 }
 0xec7   : > { %2984 = vmatmul.mubr.msk.bf16.vlgmr.msra.gmra.mrb[24].mxu1 %vm806_vm3, %v1749_v47  ;;  %v1986_v48 = vpop.xlane.xlu0 %1985 }
 0xec8   : > { %2995 = vmatprep.mubr.msk.bf16.mxu1 %vm3325_vm1, %v3324_v16  ;;  %3238 = vrcp.f32 %v1986_v48 }
 0xec9   : > { %3240 = vrcp.f32 %v1983_v13 }
 0xecc   : > { %v3235_v49 = vpop.eup %3234 }
 0xecd   : > { %v3237_v51 = vpop.eup %3236  ;;  %v1869_v52 = vmul.f32 %v3235_v49, %v3221_v24  ;;  %v2104_v53 = vpop.xlane.xlu1 %2103 }
 0xece   : > { %v1867_v54 = vmul.f32 %v3237_v51, %v3219_v20 }
 0xecf   : > { %v2107_v50 = vpop.xlane.xlu0 %2106 }
 0xed0   : > { %3242 = vrcp.f32 %v2107_v50  ;;  %v1870_v56 = vpack.c.bf16 %v1869_v52, %v1867_v54 }
 0xed1   : > { %3244 = vrcp.f32 %v2104_v53  ;;  %v1993_v58 = vpop.permute.xlu1 %1992 }
 0xed2   : > { %v3239_v57 = vpop.eup %3238 }
 0xed3   : > { %v1872_v55 = vpop.permute.xlu0 %1871  ;;  %v3241_v59 = vpop.eup %3240  ;;  %v1990_v60 = vmul.f32 %v3239_v57, %v3225_v34 }
 0xed4   : > { %2994 = vmatpush3.bf16.msra.mxu1 %v1872_v55  ;;  %v1988_v62 = vmul.f32 %v3241_v59, %v3223_v30 }
 0xed5   : > { %3005 = vmatprep.subr.bf16.mxu1 %v3324_v16  ;;  %v2114_v1 = vpop.permute.xlu1 %2113 }
 0xed6   : > { %v1991_v63 = vpack.c.bf16 %v1990_v60, %v1988_v62 }
 0xed7   : > { %2996 = vmatmul.mubr.msk.bf16.vlgmr.msra.gmra.mrb[28].mxu1 %vm806_vm3, %v1870_v56 }
 0xed8   : > { %3006 = vmatpush3.bf16.msra.mxu1 %v1993_v58  ;;  %3007 = vmatprep.mubr.msk.bf16.mxu1 %vm3325_vm1, %v3324_v16 }
 0xed9   : > { %3017 = vmatprep.subr.bf16.mxu1 %v3324_v16 }
 0xeda   : > { %v3243_v0 = vpop.eup %3242 }
 0xedb   : > { %v3245_v61 = vpop.eup %3244  ;;  %v2111_v2 = vmul.f32 %v3243_v0, %v3229_v38 }
 0xedc   : > { %v2109_v5 = vmul.f32 %v3245_v61, %v3227_v36  ;;  %v3159_v61 = vld [vmem:[%s3962_s10 + $0x18] sm:$0xff]  }
 0xede   : > { %v2112_v6 = vpack.c.bf16 %v2111_v2, %v2109_v5 }
 0xedf   : > { %3008 = vmatmul.mubr.msk.bf16.vlgmr.msra.gmra.mrb[32].mxu1 %vm806_vm3, %v1991_v63 }
 0xee0   : > { %3018 = vmatpush3.bf16.msra.mxu1 %v2114_v1  ;;  %3019 = vmatprep.mubr.msk.bf16.mxu1 %vm3325_vm1, %v3324_v16 }
 0xee1   : > { %3031 = vmatprep.subr.bf16.mxu1 %v3324_v16 }
 0xee7   : > { %3020 = vmatmul.mubr.msk.bf16.vlgmr.msra.gmra.mrb[36].mxu1 %vm806_vm3, %v2112_v6 }
 0xee8   : > { %3035 = vmatprep.mubr.msk.bf16.mxu1 %vm3325_vm1, %v3324_v16 }
 0xf9a   : > { %v1790_v7 = vpop.f32.mrb[24].mxu1 }
 0xf9b   : > { %v2985_v8 = vpop.f32.mrb[25].mxu1 }
 0xf9c   : > { %v1793_v9 = vpop.f32.mrb[26].mxu1 }
 0xf9d   : > { %v2986_v10 = vpop.f32.mrb[27].mxu1 }
 0xfaa   : > { %v1911_v11 = vpop.f32.mrb[28].mxu1 }
 0xfab   : > { %v2997_v12 = vpop.f32.mrb[29].mxu1 }
 0xfac   : > { %v1914_v14 = vpop.f32.mrb[30].mxu1  ;;  %v2778_v12 = vld [vmem:[%s3960_s8 + $0x1] ss:$0 sm:$0xff] }
 0xfad   : > { %v3129_v17 = vpack.i.bf16 %v1914_v14, %v1911_v11  ;;  %v2998_v18 = vpop.f32.mrb[31].mxu1 }
 0xfae   : > { %v2779_v18 = vld [vmem:[%s3961_s9 + $0x1] ss:$0 sm:$0xff] }
 0xfaf   : > { %3130 = vrot.lane.b32.xlu1 %v3129_v17, %s4016_s29  ;;  %s626_s29 = scalar_lea.vmem %s3970_s18, %s2815_s4  ;;  %s2811_s4 = sshll.u32 %s3462_s1, 4 }
 0xfb0   : > { %s3340_s1 = smov [#allocation2]  }
 0xfb1   : > { %s3264_s5 = sshll.u32 %s3340_s1, 4  ;;  %s3265_s5 = int_to_ptr.vmem [resolvable:$false] %s3264_s5 }
 0xfb2   : > { %v2032_v19 = vpop.f32.mrb[32].mxu1  ;;  %s3266_s6 = scalar_lea.vmem %s3265_s5, 32 }
 0xfb3   : > { %v3009_v20 = vpop.f32.mrb[33].mxu1 }
 0xfb4   : > { %v2035_v22 = vpop.f32.mrb[34].mxu1 }
 0xfb5   : > { %v3134_v42 = vpack.i.bf16 %v2035_v22, %v2032_v19  ;;  %v3010_v23 = vpop.f32.mrb[35].mxu1 }
 0xfb6   : > { %v3161_v23 = vld [vmem:[%s3964_s12 + $0x28] sm:$0xff]  }
 0xfb7   : > { %3135 = vrot.lane.b32.xlu0 %v3134_v42, %s4017_s20  ;;  %v3160_v42 = vld [vmem:[%s3964_s12 + $0x20] sm:$0xff]   ;;  %s613_s20 = scalar_lea.vmem [#allocation2], %s612_s22 }
 0xfba   : > { %v2153_v24 = vpop.f32.mrb[36].mxu1 }
 0xfbb   : > { %v3021_v25 = vpop.f32.mrb[37].mxu1 }
 0xfbc   : > { %v2156_v26 = vpop.f32.mrb[38].mxu1  ;;  %v3163_v25 = vld [vmem:[%s3964_s12 + $0x38] sm:$0xff]  }
 0xfbd   : > { %v3139_v27 = vpack.i.bf16 %v2156_v26, %v2153_v24  ;;  %v3022_v28 = vpop.f32.mrb[39].mxu1  ;;  %v3162_v24 = vld [vmem:[%s3964_s12 + $0x30] sm:$0xff]   ;;  %v2785_v26 = vld [vmem:[%s3963_s11 + $0x1] ss:$0 sm:$0xff] }
 0xfbf   : > { %3140 = vrot.lane.b32.xlu1 %v3139_v27, %s4018_s25  ;;  %s2621_s25 = sshll.u32 %s613_s20, 4  ;;  %s3912_s25 = int_to_ptr.vmem [resolvable:$true] %s2621_s25 }
 0xfc0   : > { %s3260_s23 = scalar_lea.vmem %s3912_s25, 16  ;;  %p3267_p0 = scmp.lt.s32.totalorder %s3912_s25, %s3265_s5 }
 0xfc1   : > { %p3261_p11 = scmp.ne.s32.totalorder %s3912_s25, %s3260_s23  ;;  %p3268_p1 = scmp.lt.s32.totalorder %s3266_s6, %s3260_s23 }
 0xfc3   : > { %p3262_p12 = pnand %p3261_p11, %p3479_p5  ;;  %p3269_p2 = por %p3268_p1, %p3267_p0 }
 0xfc5   : > { %p3263_p13 = pneg %p3262_p12 }
 0xfc7   : > { %p3270_p3 = pnand %p3269_p2, %p3263_p13 }
0x1021   : > { %v3131_v29 = vpop.permute.xlu1 %3130 }
0x1022   : > { %v3133_v31 = vunpack.i.h.bf16 %v3131_v29  ;;  %v3132_v34 = vunpack.i.l.bf16 %v3131_v29 }
0x1024   : > { %v2185_v38 = vsel %vm758_vm2, %v1793_v9, %v3133_v31  ;;  %v2184_v39 = vsel %vm758_vm2, %v1790_v7, %v3132_v34 }
0x1029   : > { %v3136_v30 = vpop.permute.xlu0 %3135 }
0x102a   : > { %v3138_v35 = vunpack.i.h.bf16 %v3136_v30  ;;  %v3137_v36 = vunpack.i.l.bf16 %v3136_v30 }
0x102c   : > { %v2187_v32 = vsel %vm806_vm3, %v2185_v38, %v3138_v35  ;;  %v2186_v33 = vsel %vm806_vm3, %v2184_v39, %v3137_v36 }
0x1031   : > { %v3141_v37 = vpop.permute.xlu1 %3140 }
0x1032   : > { %v3143_v40 = vunpack.i.h.bf16 %v3141_v37  ;;  %v3142_v41 = vunpack.i.l.bf16 %v3141_v37 }
0x1034   : > { %v2189_v43 = vsel %vm1268_vm4, %v2187_v32, %v3143_v40  ;;  %v2188_v44 = vsel %vm1268_vm4, %v2186_v33, %v3142_v41 }
0x1035   : > { %v2190_v45 = vpack.c.bf16 %v2189_v43, %v2188_v44 }
0x1037   : > { %3028 = vmatmul.mubr.msk.bf16.vlgmr.msra.gmra.mrb[44].mxu0 %vm634_vm0, %v2190_v45 }
0x1038   : > { %3047 = vmatprep.mubr.msk.bf16.mxu0 %vm3325_vm1, %v3324_v16  ;;  %3040 = vmatpush3.bf16.msra.mxu0 %v3160_v42 }
0x1039   : > { %3041 = vmatprep.subr.bf16.mxu0 %v3324_v16 }
0x103c   : > { %3042 = vmatpush3.bf16.msra.mxu0 %v3161_v23 }
0x103d   : > { %3043 = vmatprep.subr.bf16.mxu0 %v3324_v16 }
0x1040   : > { %3044 = vmatpush3.bf16.msra.mxu0 %v3162_v24 }
0x1041   : > { %3045 = vmatprep.subr.bf16.mxu0 %v3324_v16 }
0x1044   : > { %3046 = vmatpush3.bf16.msra.mxu0 %v3163_v25 }
0x110a   : > { %v2245_v47 = vpop.f32.mrb[44].mxu0 }
0x110b   : > { %v2260_v48 = vadd.f32 %v2775_v46, %v2245_v47  ;;  %v3029_v13 = vpop.f32.mrb[45].mxu0 }
0x110c   : > { %v2248_v49 = vpop.f32.mrb[46].mxu0 }
0x110d   : > { %v2261_v50 = vadd.f32 %v2775_v46, %v2248_v49  ;;  %v3030_v51 = vpop.f32.mrb[47].mxu0  ;;  %v2262_v52 = vadd.f32 %v2260_v48, %v3713_v3 }
0x110f   : > { %v2268_v53 = vsel %vm634_vm0, %v2262_v52, 0.0  ;;  %v2263_v54 = vadd.f32 %v2261_v50, %v3715_v4  ;;  %v3158_v4 = vld [vmem:[%s3962_s10 + $0x10] sm:$0xff]  }
0x1110   : > { %2269 = vadd.xlane.f32.xlu0 %v2268_v53  ;;  %3032 = vmatpush3.bf16.msra.mxu1 %v3158_v4 }
0x1111   : > { %v2271_v55 = vsel %vm634_vm0, %v2263_v54, 0.0  ;;  %3033 = vmatprep.subr.bf16.mxu1 %v3324_v16 }
0x1112   : > { %2272 = vadd.xlane.f32.xlu1 %v2271_v55 }
0x1114   : > { %3034 = vmatpush3.bf16.msra.mxu1 %v3159_v61 }
0x1115   : > { %3051 = vmatprep.subr.bf16.mxu1 %v3324_v16 }
0x119d   : > { %v2270_v56 = vpop.xlane.xlu0 %2269 }
0x119e   : > { %v2274_v57 = vmul.f32 0.03125, %v2270_v56 }
0x119f   : > { %v2273_v58 = vpop.xlane.xlu1 %2272 }
0x11a0   : > { %v2276_v59 = vsub.f32 %v2262_v52, %v2274_v57  ;;  %v2275_v60 = vmul.f32 0.03125, %v2273_v58  ;;  %v2803_v52 = vld [vmem:[%s3965_s13 + $0x1] ss:$0 sm:$0xff] }
0x11a2   : > { %v2277_v62 = vsub.f32 %v2263_v54, %v2275_v60  ;;  %v2278_v63 = vmul.f32 %v2276_v59, %v2276_v59 }
0x11a4   : > { %v2280_v0 = vsel %vm634_vm0, %v2278_v63, 0.0  ;;  %v2279_v1 = vmul.f32 %v2277_v62, %v2277_v62 }
0x11a5   : > { %2281 = vadd.xlane.f32.xlu0 %v2280_v0 }
0x11a6   : > { %v2283_v3 = vsel %vm634_vm0, %v2279_v1, 0.0 }
0x11a9   : > { %2284 = vadd.xlane.f32.xlu0 %v2283_v3 }
0x1232   : > { %v2282_v2 = vpop.xlane.xlu0 %2281 }
0x1233   : > { %v2286_v5 = vmul.f32 0.03125, %v2282_v2 }
0x1235   : > { %v2288_v6 = vadd.f32 1e-12, %v2286_v5 }
0x1236   : > { %v2285_v7 = vpop.xlane.xlu0 %2284 }
0x1237   : > { %3246 = vrsqrt.f32 %v2288_v6  ;;  %v2287_v8 = vmul.f32 0.03125, %v2285_v7 }
0x1239   : > { %v2289_v9 = vadd.f32 1e-12, %v2287_v8 }
0x123b   : > { %3248 = vrsqrt.f32 %v2289_v9  ;;  %v3164_v9 = vld [vmem:[%s3968_s16] sm:$0xff]  }
0x1241   : > { %v3247_v10 = vpop.eup %3246 }
0x1242   : > { %v2292_v11 = vmul.f32 %v3247_v10, %v2276_v59  ;;  %v3165_v10 = vld [vmem:[%s3968_s16 + $0x8] sm:$0xff]  }
0x1244   : > { %v2300_v15 = vmul.f32 %v2778_v12, %v2292_v11 }
0x1245   : > { %v3249_v14 = vpop.eup %3248 }
0x1246   : > { %v2293_v17 = vmul.f32 %v3249_v14, %v2277_v62  ;;  %v2308_v20 = vadd.f32 %v2779_v18, %v2300_v15 }
0x1248   : > { %v2301_v19 = vmul.f32 %v2778_v12, %v2293_v17 }
0x124a   : > { %v2309_v21 = vadd.f32 %v2779_v18, %v2301_v19 }
0x124c   : > { %v2310_v22 = vpack.c.bf16 %v2309_v21, %v2308_v20 }
0x124e   : > { %3036 = vmatmul.mubr.msk.bf16.vlgmr.msra.gmra.mrb[40].mxu1 %vm634_vm0, %v2310_v22 }
0x124f   : > { %3055 = vmatprep.mubr.msk.bf16.mxu1 %vm3325_vm1, %v3324_v16  ;;  %3052 = vmatpush3.bf16.msra.mxu1 %v3164_v9 }
0x1250   : > { %3053 = vmatprep.subr.bf16.mxu1 %v3324_v16 }
0x1253   : > { %3054 = vmatpush3.bf16.msra.mxu1 %v3165_v10 }
0x1321   : > { %v2373_v27 = vpop.f32.mrb[40].mxu1 }
0x1322   : > { %v2374_v28 = vadd.f32 %v2785_v26, %v2373_v27  ;;  %v3037_v29 = vpop.f32.mrb[41].mxu1 }
0x1323   : > { %v2376_v30 = vpop.f32.mrb[42].mxu1 }
0x1324   : > { %v2380_v31 = vmul.f32 %v2374_v28, %v2374_v28  ;;  %v2377_v34 = vadd.f32 %v2785_v26, %v2376_v30  ;;  %v3038_v35 = vpop.f32.mrb[43].mxu1 }
0x1326   : > { %v2382_v36 = vmul.f32 %v2380_v31, %v2374_v28  ;;  %v2381_v37 = vmul.f32 %v2377_v34, %v2377_v34 }
0x1328   : > { %v2384_v38 = vmul.f32 0.044715, %v2382_v36  ;;  %v2383_v39 = vmul.f32 %v2381_v37, %v2377_v34 }
0x132a   : > { %v2386_v40 = vadd.f32 %v2384_v38, %v2374_v28  ;;  %v2385_v41 = vmul.f32 0.044715, %v2383_v39 }
0x132c   : > { %v2388_v32 = vmul.f32 0.7978846, %v2386_v40  ;;  %v2387_v33 = vadd.f32 %v2385_v41, %v2377_v34 }
0x132e   : > { %3250 = vtanh.f32 %v2388_v32  ;;  %v2389_v43 = vmul.f32 0.7978846, %v2387_v33 }
0x1330   : > { %3252 = vtanh.f32 %v2389_v43 }
0x1338   : > { %v3251_v44 = vpop.eup %3250 }
0x1339   : > { %v2392_v45 = vadd.f32 1.0, %v3251_v44 }
0x133a   : > { %v3253_v46 = vpop.eup %3252 }
0x133b   : > { %v2394_v47 = vmul.f32 0.5, %v2392_v45  ;;  %v2393_v48 = vadd.f32 1.0, %v3253_v46 }
0x133d   : > { %v2395_v13 = vmul.f32 0.5, %v2393_v48  ;;  %v2396_v49 = vmul.f32 %v2394_v47, %v2374_v28  ;;  %v2541_v28 = vld [vmem:[%s3969_s17] sm:$0x1] }
0x133f   : > { %v2397_v50 = vmul.f32 %v2395_v13, %v2377_v34 }
0x1341   : > { %v2398_v51 = vpack.c.bf16 %v2397_v50, %v2396_v49 }
0x1343   : > { %3048 = vmatmul.mubr.msk.bf16.vlgmr.msra.gmra.mrb[48].mxu0 %vm1506_vm5, %v2398_v51 }
0x1416   : > { %v2469_v53 = vpop.f32.mrb[48].mxu0 }
0x1417   : > { %v2484_v54 = vadd.f32 %v2803_v52, %v2469_v53  ;;  %v3049_v55 = vpop.f32.mrb[49].mxu0 }
0x1418   : > { %v2472_v56 = vpop.f32.mrb[50].mxu0 }
0x1419   : > { %v2485_v57 = vadd.f32 %v2803_v52, %v2472_v56  ;;  %v3050_v58 = vpop.f32.mrb[51].mxu0  ;;  %v2486_v59 = vadd.f32 %v2484_v54, %v2308_v20  ;;  %v2806_v20 = vld [vmem:[%s3966_s14 + $0x1] ss:$0 sm:$0xff] }
0x141b   : > { %v2492_v60 = vsel %vm634_vm0, %v2486_v59, 0.0  ;;  %v2487_v62 = vadd.f32 %v2485_v57, %v2309_v21  ;;  %v2807_v21 = vld [vmem:[%s3967_s15 + $0x1] ss:$0 sm:$0xff] }
0x141c   : > { %2493 = vadd.xlane.f32.xlu0 %v2492_v60 }
0x141d   : > { %v2495_v63 = vsel %vm634_vm0, %v2487_v62, 0.0 }
0x1420   : > { %2496 = vadd.xlane.f32.xlu0 %v2495_v63 }
0x14a9   : > { %v2494_v0 = vpop.xlane.xlu0 %2493 }
0x14aa   : > { %v2498_v1 = vmul.f32 0.03125, %v2494_v0 }
0x14ac   : > { %v2500_v3 = vsub.f32 %v2486_v59, %v2498_v1 }
0x14ad   : > { %v2497_v4 = vpop.xlane.xlu0 %2496 }
0x14ae   : > { %v2499_v61 = vmul.f32 0.03125, %v2497_v4  ;;  %v2502_v2 = vmul.f32 %v2500_v3, %v2500_v3 }
0x14b0   : > { %v2501_v5 = vsub.f32 %v2487_v62, %v2499_v61  ;;  %v2504_v6 = vsel %vm634_vm0, %v2502_v2, 0.0 }
0x14b1   : > { %2505 = vadd.xlane.f32.xlu1 %v2504_v6 }
0x14b2   : > { %v2503_v7 = vmul.f32 %v2501_v5, %v2501_v5 }
0x14b4   : > { %v2507_v8 = vsel %vm634_vm0, %v2503_v7, 0.0 }
0x14b5   : > { %2508 = vadd.xlane.f32.xlu1 %v2507_v8 }
0x153e   : > { %v2506_v11 = vpop.xlane.xlu1 %2505 }
0x153f   : > { %v2510_v12 = vmul.f32 0.03125, %v2506_v11 }
0x1541   : > { %v2512_v14 = vadd.f32 1e-12, %v2510_v12 }
0x1542   : > { %v2509_v15 = vpop.xlane.xlu1 %2508 }
0x1543   : > { %3254 = vrsqrt.f32 %v2512_v14  ;;  %v2511_v17 = vmul.f32 0.03125, %v2509_v15 }
0x1545   : > { %v2513_v18 = vadd.f32 1e-12, %v2511_v17 }
0x1547   : > { %3256 = vrsqrt.f32 %v2513_v18 }
0x154d   : > { %v3255_v19 = vpop.eup %3254 }
0x154e   : > { %v2516_v16 = vmul.f32 %v3255_v19, %v2500_v3 }
0x1550   : > { %v2524_v22 = vmul.f32 %v2806_v20, %v2516_v16 }
0x1551   : > { %v3257_v42 = vpop.eup %3256 }
0x1552   : > { %v2517_v23 = vmul.f32 %v3257_v42, %v2501_v5  ;;  %v2532_v24 = vadd.f32 %v2807_v21, %v2524_v22 }
0x1554   : > { %v2525_v25 = vmul.f32 %v2806_v20, %v2517_v23  ;;  %2534 = vst.msk [vmem:[%s626_s29] sm:$0xff] %vm634_vm0, %v2532_v24  ;;  %v2536_v26 = vpack.c.bf16 %v2532_v24, %v2532_v24 }
0x1556   : > { %v2533_v27 = vadd.f32 %v2807_v21, %v2525_v25  ;;  %3056 = vmatmul.mubr.msk.bf16.vlgmr.msra.gmra.mrb[44].mxu1 %vm634_vm0, %v2536_v26 }
0x1558   : > { %2535 = vst.msk [vmem:[%s626_s29 + $0x8] sm:$0xff] %vm634_vm0, %v2533_v27  ;;  %s3910_s29 = scalar_lea.hbm %s3971_s19, %s2811_s4 }
0x1629   : > { %v2591_v29 = vpop.f32.mrb[44].mxu1 }
0x162a   : > { %v2592_v30 = vadd.f32 %v2591_v29, %v2541_v28  ;;  %v3057_v31 = vpop.f32.mrb[45].mxu1 }
0x162b   : > { %v2594_v34 = vpop.f32.mrb[46].mxu1 }
0x162c   : > { %3258 = vtanh.f32 %v2592_v30  ;;  %v3058_v35 = vpop.f32.mrb[47].mxu1 }
0x1636   : > { %v3259_v36 = vpop.eup %3258 }
0x1637   : > { %2599 = vst.msk [vmem:[%s613_s20] sm:$0x1] %vm2598_vm6, %v3259_v36 }
0x1638   : > { %3273 = shalt.err (!%p3270_p3)
}
0x1639   : > { %s3274_s22 = scalar_lea.hbm %s3910_s29, 16  ;;  %s3278_s24 = scalar_lea.hbm %s3971_s19, 32 }
0x163a   : > { %p3275_p4 = scmp.ne.s32.totalorder %s3910_s29, %s3274_s22  ;;  %p3279_p9 = scmp.lt.u32.totalorder %s3910_s29, %s3971_s19 }
0x163b   : > { %p3280_p10 = scmp.lt.u32.totalorder %s3278_s24, %s3274_s22  ;;  %p3282_p12 = scmp.lt.u32.totalorder %s3274_s22, %s3910_s29 }
0x163c   : > { %p3276_p7 = pnand %p3275_p4, %p3479_p5 }
0x163d   : > { %p3281_p11 = por %p3280_p10, %p3279_p9 }
0x163e   : > { %p3277_p8 = pneg %p3276_p7 }
0x163f   : > { %p3283_p13 = por %p3282_p12, %p3281_p11 }
0x1641   : > { %p3284_p0 = pnand %p3283_p13, %p3277_p8 }
0x1643   : > { %3287 = shalt.err (!%p3284_p0)
}
0x1644   : > { %3059 = dma.vmem_to_hbm [thread:$0]  (%p3479_p5), %s3912_s25, 16, %s3910_s29, %s2606_s27  }
0x1645 PF: > { %p3065_p1 = scmp.ge.s32.totalorder %s3322_s21, 2  ;;  %s2641_s6 = sand.u32 1, %s3310_s0  }
0x1646   : > { %s2642_s23 = scalar_lea.sflag [#allocation3], %s2641_s6 }
0x1647   : > { %p3062_p2 = pnand %p3065_p1, %p3483_p6 }
0x1649   : > { %3305 = dma.done.wait (!%p3062_p2), %s2642_s23, 16  }
0x164a   : > { %3307 = vsyncadd (!%p3062_p2), %s2642_s23, 4294967280  ;;  %s4019_s1 = sld [smem:[#allocation5_spill]]  ;;  %s4020_s20 = sld [smem:[#allocation6_spill]] }
0x164b   : > { %p30_p3 = scmp.ge.s32.totalorder %s3466_s2, 4   ;;  %s4021_s0 = smov %s3314_s30 }
0x164c   : > { %s4023_s21 = smov %s3466_s2 }
0x164d   :  { %32 = sbr.rel (!%p30_p3) target bundleno = 11 (0xb), region = 154 }
0x1650   : > { %s4022_s30 = smov %s4019_s1 }
0x1654   :  { %2646 = vsyncpa [#allocation3], 1 }
0x1655   :  { %2648 = vsyncpa [#allocation3 + $0x1], 1 }

// kernel: univl_forward.4
= control target key start
LH: loop header
LB: loop body
LE: loop exit
PB: predicated region body
PF: predicated region fallthrough
CT: control target
= control target key end

     0   :  { %s3697_s0 = inlined_call_operand.vmem [shape: bf16[2,8,32], index: 0, kind: input, shape index: {}]   ;;  %s3698_s1 = inlined_call_operand.vmem [shape: bf16[2,1,8], index: 1, kind: input, shape index: {}]   ;;  %s3699_s2 = inlined_call_operand.vmem [shape: f32[1,32], index: 2, kind: input, shape index: {}]   ;;  %s3700_s3 = inlined_call_operand.vmem [shape: f32[1,32], index: 3, kind: input, shape index: {}]   ;;  %s3701_s4 = inlined_call_operand.vmem [shape: bf16[2,32,96], index: 4, kind: input, shape index: {}]   ;;  %s3702_s5 = inlined_call_operand.vmem [shape: f32[2,1,96], index: 5, kind: input, shape index: {}]   ;;  %s3703_s6 = inlined_call_operand.vmem [shape: bf16[2,32,32], index: 6, kind: input, shape index: {}]   ;;  %s3704_s7 = inlined_call_operand.vmem [shape: f32[2,1,32], index: 7, kind: input, shape index: {}]   ;;  %s3705_s8 = inlined_call_operand.vmem [shape: f32[2,1,32], index: 8, kind: input, shape index: {}]   ;;  %s3706_s9 = inlined_call_operand.vmem [shape: f32[2,1,32], index: 9, kind: input, shape index: {}]   ;;  %s3707_s10 = inlined_call_operand.vmem [shape: bf16[2,32,64], index: 10, kind: input, shape index: {}]   ;;  %s3708_s11 = inlined_call_operand.vmem [shape: f32[2,1,64], index: 11, kind: input, shape index: {}]   ;;  %s3709_s12 = inlined_call_operand.vmem [shape: bf16[2,64,32], index: 12, kind: input, shape index: {}]   ;;  %s3710_s13 = inlined_call_operand.vmem [shape: f32[2,1,32], index: 13, kind: input, shape index: {}]   ;;  %s3711_s14 = inlined_call_operand.vmem [shape: f32[2,1,32], index: 14, kind: input, shape index: {}]   ;;  %s3712_s15 = inlined_call_operand.vmem [shape: f32[2,1,32], index: 15, kind: input, shape index: {}]   ;;  %s3713_s16 = inlined_call_operand.vmem [shape: bf16[32,32], index: 16, kind: input, shape index: {}]   ;;  %s3714_s17 = inlined_call_operand.vmem [shape: f32[1,32], index: 17, kind: input, shape index: {}]   ;;  %s3715_s18 = inlined_call_operand.hbm [shape: f32[2,8,32], index: 18, kind: output, shape index: {0}]   ;;  %s3716_s19 = inlined_call_operand.hbm [shape: f32[2,1,32], index: 19, kind: output, shape index: {1}]  }
   0x1   :  { %3732 = sst [smem:[#allocation11_spill]] %s3697_s0 }
   0x2   :  { %3733 = sst [smem:[#allocation12_spill]] %s3698_s1 }
   0x3   :  { %3734 = sst [smem:[#allocation13_spill]] %s3699_s2 }
   0x4   :  { %3735 = sst [smem:[#allocation14_spill]] %s3700_s3 }
   0x5   :  { %3736 = sst [smem:[#allocation15_spill]] %s3701_s4 }
   0x6   :  { %3737 = sst [smem:[#allocation16_spill]] %s3702_s5 }
   0x7   :  { %3738 = sst [smem:[#allocation17_spill]] %s3703_s6 }
   0x8   :  { %25 = vsyncpa [#allocation3], 0 }
   0x9   :  { %27 = vsyncpa [#allocation3 + $0x1], 0 }
   0xa   :  { %28 = vsyncpa [#allocation5], 0 }
   0xb   :  { %30 = vsyncpa [#allocation5 + $0x1], 0  ;;  %s3198_s0 = smov 0   ;;  %s3200_s30 = smov 0  }
   0xc   :  { %s3202_s20 = smov 0   ;;  %s3204_s21 = smov 0  }
   0xd LB: > { %3739 = sst [smem:[#allocation8_spill]] %s3074_s20  ;;  %s3219_s1 = sadd.s32 4294967295, %s3078_s21   ;;  %s3078_s21 = sphi %s3204_s21, %s3763_s21   ;;  %s3074_s20 = sphi %s3202_s20, %s3765_s20   ;;  %s3070_s30 = sphi %s3200_s30, %s3767_s30   ;;  %s3066_s0 = sphi %s3198_s0, %s3766_s0  }
   0xe   : > { %s2507_s22 = sadd.s32 4294967294, %s3078_s21   ;;  %s3223_s2 = sadd.s32 1, %s3078_s21  }
   0xf   : > { %3740 = sst [smem:[#allocation9_spill]] %s3223_s2  ;;  %s431_s23 = sadd.s32 1, %s3074_s20 }
  0x10   : > { %s428_s24 = ssub.s32 %s3078_s21, %s3223_s2  ;;  %p441_p0 = scmp.ne.s32.totalorder %s3074_s20, %s3070_s30 }
  0x11   : > { %p429_p1 = scmp.eq.s32.totalorder %s428_s24, 0  ;;  %p442_p2 = scmp.eq.s32.totalorder %s3219_s1, 1 }
  0x12   : > { %p447_p3 = scmp.ne.s32.totalorder %s3070_s30, %s3066_s0  ;;  %p448_p4 = scmp.eq.s32.totalorder %s2507_s22, 1 }
  0x13   : > { %s3234_s25 = scalar_select %p429_p1, %s3074_s20, %s431_s23  }
  0x14   : > { %p3236_p5 = por %p442_p2, %p441_p0  ;;  %p3240_p6 = por %p448_p4, %p447_p3 }
  0x15   : > { %3741 = sst [smem:[#allocation10_spill]] %s3234_s25  ;;  %p2510_p7 = scmp.ge.s32.totalorder %s3078_s21, 1 }
  0x16   : > { %p553_p8 = scmp.lt.s32.totalorder %s3078_s21, 3 }
  0x18   : > { %p554_p9 = pnand %p2510_p7, %p553_p8 }
  0x19   : > { %p615_p10 = scmp.lt.s32.totalorder (!%p554_p9), %s3219_s1, 1  ;;  %s3744_s23 = sld [smem:[#allocation11_spill]] (!%p554_p9)  ;;  %vm627_vm0 = vcmask (!%p554_p9), 261120   ;;  %v3080_v9 = vmov (!%p554_p9), 0.0   ;;  %vm3081_vm1 = vmmov (!%p554_p9), 0   ;;  %vm735_vm2 = vcmask (!%p554_p9), 64512  }
  0x1a   : > { %557 = sbr.rel (%p554_p9) target bundleno = 5899 (0x170b), region = 92  ;;  %s3745_s4 = sld [smem:[#allocation15_spill]] (!%p554_p9)  ;;  %2674 = vmatprep.subr.bf16.mxu0 (!%p554_p9), %v3080_v9  ;;  %2682 = vmatprep.subr.bf16.mxu1 (!%p554_p9), %v3080_v9  ;;  %v660_v41 = vlaneseq (!%p554_p9)  ;;  %vm799_vm3 = vcmask (!%p554_p9), 1043456   ;;  %vm1186_vm4 = vcmask (!%p554_p9), 130048   ;;  %vm1188_vm5 = vcmask (!%p554_p9), 195584  }
  0x1b   : > { %2678 = vmatprep.mubr.msk.bf16.mxu0 (!%p554_p9), %vm3081_vm1, %v3080_v9  ;;  %2684 = vmatprep.mubr.msk.bf16.mxu1 (!%p554_p9), %vm3081_vm1, %v3080_v9  ;;  %s3746_s22 = sld [smem:[#allocation13_spill]] (!%p554_p9)  ;;  %s3748_s5 = sld [smem:[#allocation16_spill]] (!%p554_p9)  ;;  %vm1397_vm6 = vcmask (!%p554_p9), 523264   ;;  %vm2365_vm7 = vcmask (!%p554_p9), 253952  }
  0x1c   : > { %s3731_s20 = smov (!%p554_p9), 120   ;;  %s3083_s25 = smov (!%p554_p9), 96   ;;  %v661_v43 = vshrl.u32 (!%p554_p9), %v660_v41, 7 }
  0x1d   : > { %s3727_s2 = smov (!%p554_p9), 80   ;;  %s3730_s29 = smov (!%p554_p9), 8  }
  0x1e   : > { %v662_v45 = vsub.s32 (!%p554_p9), 0, %v661_v43  ;;  %s3750_s6 = sld [smem:[#allocation17_spill]] (!%p554_p9) }
  0x20   : > { %v2910_v8 = vld [vmem:[%s3745_s4] sm:$0xff] (!%p554_p9)   ;;  %v2911_v10 = vld [vmem:[%s3745_s4 + $0x8] sm:$0xff] (!%p554_p9)  }
  0x21   : > { %s3248_s27 = scalar_select %p615_p10, %s3219_s1, 1  ;;  %2675 = vmatpush3.bf16.msra.mxu0 %v2910_v8  ;;  %v2513_v15 = vld [vmem:[%s3746_s22] ss:$0 sm:$0xff] }
  0x22   : > { %2676 = vmatprep.subr.bf16.mxu0 %v3080_v9  ;;  %v2515_v21 = vld [vmem:[%s3748_s5] ss:$0 sm:$0xff]  ;;  %s3084_s22 = smov 88  }
  0x23   : > { %s2512_s28 = sshll.u32 %s3248_s27, 2 }
  0x24   : > { %s618_s24 = scalar_lea.vmem %s3744_s23, %s2512_s28  ;;  %s3747_s28 = sld [smem:[#allocation14_spill]] }
  0x25   : > { %v623_v0 = vld [vmem:[%s618_s24] sm:$0xf]  ;;  %2677 = vmatpush3.bf16.msra.mxu0 %v2911_v10  ;;  %s3722_s23 = smov 112   ;;  %s3721_s24 = smov 72  }
  0x26   : > { %v624_v1 = vunpack.c.l.bf16 %v623_v0  ;;  %2688 = vmatprep.subr.bf16.mxu0 %v3080_v9 }
  0x28   : > { %v628_v2 = vsel %vm627_vm0, %v624_v1, 0.0 }
  0x29   : > { %629 = vadd.xlane.f32.xlu0 %v628_v2 }
  0x2a   : > { %v2514_v17 = vld [vmem:[%s3747_s28] ss:$0 sm:$0xff]  ;;  %s3720_s28 = smov 104  }
  0xb6   : > { %v630_v3 = vpop.xlane.xlu0 %629 }
  0xb7   : > { %v632_v4 = vmul.f32 0.03125, %v630_v3 }
  0xb9   : > { %v633_v5 = vsub.f32 %v624_v1, %v632_v4 }
  0xbb   : > { %v634_v6 = vmul.f32 %v633_v5, %v633_v5 }
  0xbd   : > { %v635_v7 = vsel %vm627_vm0, %v634_v6, 0.0 }
  0xbe   : > { %636 = vadd.xlane.f32.xlu0 %v635_v7 }
 0x14b   : > { %v637_v11 = vpop.xlane.xlu0 %636 }
 0x14c   : > { %v638_v12 = vmul.f32 0.03125, %v637_v11 }
 0x14e   : > { %v639_v13 = vadd.f32 1e-12, %v638_v12 }
 0x150   : > { %2932 = vrsqrt.f32 %v639_v13 }
 0x15a   : > { %v2933_v14 = vpop.eup %2932 }
 0x15b   : > { %v641_v16 = vmul.f32 %v2933_v14, %v633_v5 }
 0x15d   : > { %v648_v18 = vmul.f32 %v2513_v15, %v641_v16 }
 0x15f   : > { %v3276_v19 = vadd.f32 %v2514_v17, %v648_v18 }
 0x161   : > { %v664_v20 = vpack.c.bf16 %v3276_v19, %v3276_v19 }
 0x163   : > { %2679 = vmatmul.mubr.msk.bf16.vlgmr.msra.gmra.mrb[0].mxu0 %vm627_vm0, %v664_v20 }
 0x164   : > { %2690 = vmatprep.mubr.msk.bf16.mxu0 %vm3081_vm1, %v3080_v9 }
 0x236   : > { %v725_v22 = vpop.f32.mrb[0].mxu0 }
 0x237   : > { %v726_v23 = vadd.f32 %v2515_v21, %v725_v22  ;;  %v2680_v24 = vpop.f32.mrb[1].mxu0 }
 0x238   : > { %v728_v25 = vpop.f32.mrb[2].mxu0 }
 0x239   : > { %v3286_v26 = vpack.c.bf16 %v726_v23, %v726_v23  ;;  %v2681_v27 = vpop.f32.mrb[3].mxu0 }
 0x23b   : > { %843 = vrot.lane.b32.xlu0 %v3286_v26, %s3731_s20  ;;  %733 = vrot.lane.b32.xlu1 %v3286_v26, %s3083_s25  ;;  %s3753_s20 = smov 112  }
 0x23f   : > { %845 = vrot.lane.b32.xlu1 %v3286_v26, %s3084_s22 }
 0x243   : > { %955 = vrot.lane.b32.xlu1 %v3286_v26, %s3727_s2  ;;  %s3729_s2 = smov 16  }
 0x247   : > { %953 = vrot.lane.b32.xlu1 %v3286_v26, %s3722_s23 }
 0x24b   : > { %1065 = vrot.lane.b32.xlu1 %v3286_v26, %s3721_s24  ;;  %s3749_s24 = sld [smem:[#allocation12_spill]] }
 0x24f   : > { %1063 = vrot.lane.b32.xlu1 %v3286_v26, %s3720_s28  ;;  %s3723_s28 = smov 40  }
 0x251   : > { %s621_s23 = scalar_lea.vmem %s3749_s24, %s3248_s27  ;;  %s3726_s27 = smov 64  }
 0x252   : > { %v656_v39 = vld [vmem:[%s621_s23] sm:$0x1]  ;;  %s3725_s23 = smov 56   ;;  %s3724_s24 = smov 48  }
 0x253   : > { %v657_v40 = vunpack.c.l.bf16 %v656_v39 }
 0x255   : > { %v658_v42 = vsub.f32 1.0, %v657_v40 }
 0x257   : > { %v659_v44 = vmul.f32 -10000.0, %v658_v42 }
 0x259   : > { %v3327_v46 = vrot.slane %v659_v44, %v662_v45 }
 0x2ad   : > { %v734_v28 = vpop.permute.xlu1 %733  ;;  %v844_v33 = vpop.permute.xlu0 %843 }
 0x2ae   : > { %v740_v29 = vsel %vm735_vm2, %v734_v28, 0 }
 0x2af   : > { %2683 = vmatpush3.bf16.xpose.msra.mxu1 %v740_v29 }
 0x2b0   : > { %2694 = vmatprep.subr.bf16.mxu1 %v3080_v9 }
 0x2b1   : > { %v846_v30 = vpop.permute.xlu1 %845 }
 0x2b2   : > { %v851_v31 = vsel %vm735_vm2, %v846_v30, 0 }
 0x2b5   : > { %v956_v32 = vpop.permute.xlu1 %955 }
 0x2b6   : > { %2685 = vmatmul.mubr.msk.bf16.vlgmr.msra.gmra.mrb[0].mxu1 %vm735_vm2, %v3286_v26  ;;  %v961_v35 = vsel %vm735_vm2, %v956_v32, 0 }
 0x2b7   : > { %2695 = vmatpush3.bf16.xpose.msra.mxu1 %v851_v31  ;;  %2696 = vmatprep.mubr.msk.bf16.mxu1 %vm3081_vm1, %v3080_v9 }
 0x2b8   : > { %2706 = vmatprep.subr.bf16.mxu1 %v3080_v9 }
 0x2b9   : > { %v954_v34 = vpop.permute.xlu1 %953 }
 0x2bd   : > { %v1066_v36 = vpop.permute.xlu1 %1065 }
 0x2be   : > { %2697 = vmatmul.mubr.msk.bf16.vlgmr.msra.gmra.mrb[4].mxu1 %vm735_vm2, %v844_v33  ;;  %v1071_v37 = vsel %vm735_vm2, %v1066_v36, 0 }
 0x2bf   : > { %2707 = vmatpush3.bf16.xpose.msra.mxu1 %v961_v35  ;;  %2708 = vmatprep.mubr.msk.bf16.mxu1 %vm3081_vm1, %v3080_v9 }
 0x2c0   : > { %2718 = vmatprep.subr.bf16.mxu1 %v3080_v9 }
 0x2c1   : > { %v1064_v38 = vpop.permute.xlu1 %1063 }
 0x2c6   : > { %2709 = vmatmul.mubr.msk.bf16.vlgmr.msra.gmra.mrb[8].mxu1 %vm735_vm2, %v954_v34 }
 0x2c7   : > { %2719 = vmatpush3.bf16.xpose.msra.mxu1 %v1071_v37  ;;  %2720 = vmatprep.mubr.msk.bf16.mxu1 %vm3081_vm1, %v3080_v9 }
 0x2c8   : > { %2730 = vmatprep.subr.bf16.mxu1 %v3080_v9 }
 0x2ce   : > { %2721 = vmatmul.mubr.msk.bf16.vlgmr.msra.gmra.mrb[12].mxu1 %vm735_vm2, %v1064_v38 }
 0x2cf   : > { %2734 = vmatprep.mubr.msk.bf16.mxu1 %vm3081_vm1, %v3080_v9 }
 0x389   : > { %v776_v47 = vpop.f32.mrb[0].mxu1 }
 0x38a   : > { %v777_v48 = vadd.f32 %v776_v47, %v3327_v46  ;;  %v2686_v49 = vpop.f32.mrb[1].mxu1 }
 0x38b   : > { %v779_v50 = vpop.f32.mrb[2].mxu1 }
 0x38c   : > { %v2687_v51 = vpop.f32.mrb[3].mxu1  ;;  %v782_v52 = vsel %vm735_vm2, %v777_v48, -inf }
 0x38d   : > { %783 = vmax.xlane.f32.xlu1 %v782_v52 }
 0x391   : > { %v887_v53 = vpop.f32.mrb[4].mxu1 }
 0x392   : > { %v888_v54 = vadd.f32 %v887_v53, %v3327_v46  ;;  %v2698_v55 = vpop.f32.mrb[5].mxu1 }
 0x393   : > { %v890_v56 = vpop.f32.mrb[6].mxu1 }
 0x394   : > { %v2699_v57 = vpop.f32.mrb[7].mxu1  ;;  %v893_v58 = vsel %vm735_vm2, %v888_v54, -inf }
 0x395   : > { %894 = vmax.xlane.f32.xlu0 %v893_v58 }
 0x399   : > { %v997_v59 = vpop.f32.mrb[8].mxu1 }
 0x39a   : > { %v998_v60 = vadd.f32 %v997_v59, %v3327_v46  ;;  %v2710_v61 = vpop.f32.mrb[9].mxu1 }
 0x39b   : > { %v1000_v62 = vpop.f32.mrb[10].mxu1 }
 0x39c   : > { %v2711_v63 = vpop.f32.mrb[11].mxu1  ;;  %v1003_v0 = vsel %vm735_vm2, %v998_v60, -inf  ;;  %v2912_v62 = vld [vmem:[%s3750_s6] sm:$0xff]  }
 0x39d   : > { %1004 = vmax.xlane.f32.xlu1 %v1003_v0  ;;  %2731 = vmatpush3.bf16.msra.mxu1 %v2912_v62  ;;  %v2913_v63 = vld [vmem:[%s3750_s6 + $0x8] sm:$0xff]   ;;  %v2542_v62 = vld [vmem:[%s3710_s13] ss:$0 sm:$0xff] }
 0x39e   : > { %2732 = vmatprep.subr.bf16.mxu1 %v3080_v9 }
 0x3a1   : > { %v1107_v1 = vpop.f32.mrb[12].mxu1  ;;  %2733 = vmatpush3.bf16.msra.mxu1 %v2913_v63 }
 0x3a2   : > { %v1108_v2 = vadd.f32 %v1107_v1, %v3327_v46  ;;  %v2722_v3 = vpop.f32.mrb[13].mxu1  ;;  %2746 = vmatprep.subr.bf16.mxu1 %v3080_v9 }
 0x3a3   : > { %v1110_v4 = vpop.f32.mrb[14].mxu1 }
 0x3a4   : > { %v2723_v5 = vpop.f32.mrb[15].mxu1  ;;  %v1113_v6 = vsel %vm735_vm2, %v1108_v2, -inf }
 0x3a5   : > { %1114 = vmax.xlane.f32.xlu0 %v1113_v6 }
 0x41a   : > { %v784_v7 = vpop.xlane.xlu1 %783 }
 0x41b   : > { %v785_v8 = vsub.f32 %v777_v48, %v784_v7 }
 0x41d   : > { %v786_v10 = vmul.f32 1.442695, %v785_v8 }
 0x41f   : > { %2934 = vpow2.f32 %v786_v10 }
 0x422   : > { %v895_v11 = vpop.xlane.xlu0 %894 }
 0x423   : > { %v896_v12 = vsub.f32 %v888_v54, %v895_v11 }
 0x425   : > { %v897_v13 = vmul.f32 1.442695, %v896_v12 }
 0x427   : > { %2936 = vpow2.f32 %v897_v13 }
 0x429   : > { %v2935_v14 = vpop.eup %2934 }
 0x42a   : > { %v788_v15 = vsel %vm735_vm2, %v2935_v14, 0.0  ;;  %v1005_v24 = vpop.xlane.xlu1 %1004 }
 0x42b   : > { %789 = vadd.xlane.f32.xlu1 %v788_v15  ;;  %v1006_v25 = vsub.f32 %v998_v60, %v1005_v24 }
 0x42d   : > { %v1007_v27 = vmul.f32 1.442695, %v1006_v25 }
 0x431   : > { %v2937_v16 = vpop.eup %2936 }
 0x432   : > { %v1115_v17 = vpop.xlane.xlu0 %1114  ;;  %v899_v18 = vsel %vm735_vm2, %v2937_v16, 0.0 }
 0x433   : > { %v1116_v20 = vsub.f32 %v1108_v2, %v1115_v17  ;;  %900 = vadd.xlane.f32.xlu0 %v899_v18 }
 0x435   : > { %v1117_v21 = vmul.f32 1.442695, %v1116_v20 }
 0x437   : > { %2938 = vpow2.f32 %v1117_v21 }
 0x438   : > { %2940 = vpow2.f32 %v1007_v27 }
 0x43c   : > { %794 = vrot.lane.b32.xlu1 %v3286_v26, %s3726_s27  ;;  %s3758_s27 = smov 48  }
 0x441   : > { %v2939_v22 = vpop.eup %2938 }
 0x442   : > { %v1119_v23 = vsel %vm735_vm2, %v2939_v22, 0.0  ;;  %v2941_v28 = vpop.eup %2940 }
 0x443   : > { %1120 = vadd.xlane.f32.xlu0 %v1119_v23  ;;  %v1009_v29 = vsel %vm735_vm2, %v2941_v28, 0.0 }
 0x459   : > { %905 = vrot.lane.b32.xlu0 %v3286_v26, %s3725_s23  ;;  %s3751_s23 = smov 120  }
 0x460   : > { %1010 = vadd.xlane.f32.xlu1 %v1009_v29 }
 0x471   : > { %1015 = vrot.lane.b32.xlu1 %v3286_v26, %s3724_s24  ;;  %s3728_s24 = smov 24  }
 0x475   : > { %1125 = vrot.lane.b32.xlu1 %v3286_v26, %s3723_s28  ;;  %s3755_s28 = smov 104  }
 0x4b8   : > { %v790_v30 = vpop.xlane.xlu1 %789 }
 0x4b9   : > { %2942 = vrcp.f32 %v790_v30 }
 0x4bc   : > { %v795_v31 = vpop.permute.xlu1 %794 }
 0x4bd   : > { %v801_v32 = vsel %vm799_vm3, %v795_v31, 0  ;;  %v2914_v31 = vld [vmem:[%s3707_s10] sm:$0xff]  }
 0x4be   : > { %2689 = vmatpush3.bf16.msra.mxu0 %v801_v32  ;;  %v2915_v32 = vld [vmem:[%s3707_s10 + $0x8] sm:$0xff]  }
 0x4bf   : > { %2700 = vmatprep.subr.bf16.mxu0 %v3080_v9 }
 0x4c0   : > { %v901_v34 = vpop.xlane.xlu0 %900 }
 0x4c1   : > { %2944 = vrcp.f32 %v901_v34 }
 0x4c3   : > { %v2943_v33 = vpop.eup %2942 }
 0x4c4   : > { %v792_v35 = vmul.f32 %v2943_v33, %v2935_v14 }
 0x4c6   : > { %v793_v36 = vpack.c.bf16 %v792_v35, %v792_v35 }
 0x4c8   : > { %2691 = vmatmul.mubr.msk.bf16.vlgmr.msra.gmra.mrb[4].mxu0 %vm735_vm2, %v793_v36  ;;  %v2531_v36 = vld [vmem:[%s3705_s8] ss:$0 sm:$0xff] }
 0x4c9   : > { %2702 = vmatprep.mubr.msk.bf16.mxu0 %vm3081_vm1, %v3080_v9 }
 0x4cb   : > { %v2945_v26 = vpop.eup %2944 }
 0x4cc   : > { %v903_v38 = vmul.f32 %v2945_v26, %v2937_v16  ;;  %v2530_v16 = vld [vmem:[%s3704_s7] ss:$0 sm:$0xff] }
 0x4ce   : > { %v904_v41 = vpack.c.bf16 %v903_v38, %v903_v38 }
 0x4d0   : > { %v1121_v37 = vpop.xlane.xlu0 %1120 }
 0x4d4   : > { %v906_v39 = vpop.permute.xlu0 %905 }
 0x4d5   : > { %v911_v40 = vsel %vm799_vm3, %v906_v39, 0 }
 0x4d6   : > { %2701 = vmatpush3.bf16.msra.mxu0 %v911_v40 }
 0x4d7   : > { %2712 = vmatprep.subr.bf16.mxu0 %v3080_v9 }
 0x4d9   : > { %2703 = vmatmul.mubr.msk.bf16.vlgmr.msra.gmra.mrb[8].mxu0 %vm735_vm2, %v904_v41  ;;  %v2916_v41 = vld [vmem:[%s3709_s12] sm:$0xff]  }
 0x4da   : > { %2714 = vmatprep.mubr.msk.bf16.mxu0 %vm3081_vm1, %v3080_v9 }
 0x4ed   : > { %v1011_v42 = vpop.xlane.xlu1 %1010 }
 0x4ee   : > { %2946 = vrcp.f32 %v1011_v42  ;;  %v2917_v42 = vld [vmem:[%s3709_s12 + $0x8] sm:$0xff]  }
 0x4ef   : > { %2948 = vrcp.f32 %v1121_v37  ;;  %v2532_v37 = vld [vmem:[%s3706_s9] ss:$0 sm:$0xff] }
 0x4f1   : > { %v1016_v43 = vpop.permute.xlu1 %1015 }
 0x4f2   : > { %v1021_v44 = vsel %vm799_vm3, %v1016_v43, 0  ;;  %v2918_v43 = vld [vmem:[%s3709_s12 + $0x10] sm:$0xff]  }
 0x4f3   : > { %2713 = vmatpush3.bf16.msra.mxu0 %v1021_v44  ;;  %v2919_v44 = vld [vmem:[%s3709_s12 + $0x18] sm:$0xff]  }
 0x4f4   : > { %2724 = vmatprep.subr.bf16.mxu0 %v3080_v9 }
 0x4f5   : > { %v1126_v48 = vpop.permute.xlu1 %1125 }
 0x4f6   : > { %v1131_v51 = vsel %vm799_vm3, %v1126_v48, 0 }
 0x4f8   : > { %v2947_v45 = vpop.eup %2946 }
 0x4f9   : > { %v1013_v47 = vmul.f32 %v2947_v45, %v2941_v28  ;;  %v2949_v50 = vpop.eup %2948  ;;  %v2533_v45 = vld [vmem:[%s3708_s11] ss:$0 sm:$0xff] }
 0x4fa   : > { %v1123_v52 = vmul.f32 %v2949_v50, %v2939_v22 }
 0x4fb   : > { %v1014_v49 = vpack.c.bf16 %v1013_v47, %v1013_v47 }
 0x4fc   : > { %v1124_v53 = vpack.c.bf16 %v1123_v52, %v1123_v52 }
 0x4fd   : > { %2715 = vmatmul.mubr.msk.bf16.vlgmr.msra.gmra.mrb[12].mxu0 %vm735_vm2, %v1014_v49 }
 0x4fe   : > { %2725 = vmatpush3.bf16.msra.mxu0 %v1131_v51  ;;  %2726 = vmatprep.mubr.msk.bf16.mxu0 %vm3081_vm1, %v3080_v9 }
 0x4ff   : > { %2738 = vmatprep.subr.bf16.mxu0 %v3080_v9 }
 0x505   : > { %2727 = vmatmul.mubr.msk.bf16.vlgmr.msra.gmra.mrb[16].mxu0 %vm735_vm2, %v1124_v53 }
 0x506   : > { %2742 = vmatprep.mubr.msk.bf16.mxu0 %vm3081_vm1, %v3080_v9  ;;  %2739 = vmatpush3.bf16.msra.mxu0 %v2914_v31 }
 0x507   : > { %2740 = vmatprep.subr.bf16.mxu0 %v3080_v9 }
 0x50a   : > { %2741 = vmatpush3.bf16.msra.mxu0 %v2915_v32 }
 0x50b   : > { %2758 = vmatprep.subr.bf16.mxu0 %v3080_v9 }
 0x59b   : > { %v837_v54 = vpop.f32.mrb[4].mxu0 }
 0x59c   : > { %v2692_v55 = vpop.f32.mrb[5].mxu0 }
 0x59d   : > { %v840_v56 = vpop.f32.mrb[6].mxu0 }
 0x59e   : > { %v2693_v57 = vpop.f32.mrb[7].mxu0 }
 0x5ac   : > { %v947_v58 = vpop.f32.mrb[8].mxu0 }
 0x5ad   : > { %1174 = vrot.lane.b32.xlu0 %v947_v58, %s3730_s29  ;;  %v2704_v59 = vpop.f32.mrb[9].mxu0  ;;  %s3754_s29 = smov 72  }
 0x5ae   : > { %v950_v60 = vpop.f32.mrb[10].mxu0 }
 0x5af   : > { %v2705_v61 = vpop.f32.mrb[11].mxu0 }
 0x5d0   : > { %v1057_v0 = vpop.f32.mrb[12].mxu0 }
 0x5d1   : > { %1178 = vrot.lane.b32.xlu1 %v1057_v0, %s3729_s2  ;;  %v2716_v1 = vpop.f32.mrb[13].mxu0  ;;  %s3752_s2 = smov 80  }
 0x5d2   : > { %v1060_v2 = vpop.f32.mrb[14].mxu0 }
 0x5d3   : > { %v2717_v3 = vpop.f32.mrb[15].mxu0 }
 0x5d8   : > { %v1167_v4 = vpop.f32.mrb[16].mxu0 }
 0x5d9   : > { %1182 = vrot.lane.b32.xlu0 %v1167_v4, %s3728_s24  ;;  %v2728_v5 = vpop.f32.mrb[17].mxu0  ;;  %s3759_s24 = smov 40  }
 0x5da   : > { %v1170_v6 = vpop.f32.mrb[18].mxu0 }
 0x5db   : > { %v2729_v7 = vpop.f32.mrb[19].mxu0 }
 0x61f   : > { %v1175_v8 = vpop.permute.xlu0 %1174 }
 0x620   : > { %v1185_v11 = vsel %vm735_vm2, %v837_v54, %v1175_v8 }
 0x643   : > { %v1179_v10 = vpop.permute.xlu1 %1178 }
 0x644   : > { %v1187_v12 = vsel %vm1186_vm4, %v1185_v11, %v1179_v10 }
 0x64b   : > { %v1183_v13 = vpop.permute.xlu0 %1182 }
 0x64c   : > { %v1189_v14 = vsel %vm1188_vm5, %v1187_v12, %v1183_v13  ;;  %v2920_v12 = vld [vmem:[%s3745_s4 + $0x10] sm:$0xff]   ;;  %v2921_v13 = vld [vmem:[%s3745_s4 + $0x18] sm:$0xff]   ;;  %s3096_s4 = smov [#allocation2]  }
 0x64d   : > { %v1190_v15 = vpack.c.bf16 %v1189_v14, %v1189_v14 }
 0x64f   : > { %2735 = vmatmul.mubr.msk.bf16.vlgmr.msra.gmra.mrb[16].mxu1 %vm627_vm0, %v1190_v15 }
 0x650   : > { %2754 = vmatprep.mubr.msk.bf16.mxu1 %vm3081_vm1, %v3080_v9  ;;  %2747 = vmatpush3.bf16.msra.mxu1 %v2916_v41 }
 0x651   : > { %2748 = vmatprep.subr.bf16.mxu1 %v3080_v9 }
 0x654   : > { %2749 = vmatpush3.bf16.msra.mxu1 %v2917_v42 }
 0x655   : > { %2750 = vmatprep.subr.bf16.mxu1 %v3080_v9 }
 0x658   : > { %2751 = vmatpush3.bf16.msra.mxu1 %v2918_v43 }
 0x659   : > { %2752 = vmatprep.subr.bf16.mxu1 %v3080_v9 }
 0x65c   : > { %2753 = vmatpush3.bf16.msra.mxu1 %v2919_v44 }
 0x65d   : > { %2772 = vmatprep.subr.bf16.mxu1 %v3080_v9 }
 0x722   : > { %v1244_v17 = vpop.f32.mrb[16].mxu1 }
 0x723   : > { %v1257_v18 = vadd.f32 %v2530_v16, %v1244_v17  ;;  %v2736_v20 = vpop.f32.mrb[17].mxu1 }
 0x724   : > { %v1247_v21 = vpop.f32.mrb[18].mxu1 }
 0x725   : > { %v2737_v22 = vpop.f32.mrb[19].mxu1  ;;  %v1258_v23 = vadd.f32 %v1257_v18, %v3276_v19  ;;  %v2543_v18 = vld [vmem:[%s3711_s14] ss:$0 sm:$0xff] }
 0x726   : > { %v2544_v21 = vld [vmem:[%s3712_s15] ss:$0 sm:$0xff] }
 0x727   : > { %v1261_v24 = vsel %vm627_vm0, %v1258_v23, 0.0 }
 0x728   : > { %1262 = vadd.xlane.f32.xlu1 %v1261_v24 }
 0x7b5   : > { %v1263_v25 = vpop.xlane.xlu1 %1262 }
 0x7b6   : > { %v1264_v27 = vmul.f32 0.03125, %v1263_v25  ;;  %v2550_v25 = vld [vmem:[%s3748_s5 + $0x1] ss:$0 sm:$0xff]  ;;  %s2988_s5 = sshll.u32 %s3096_s4, 4  ;;  %s2989_s5 = int_to_ptr.vmem [resolvable:$false] %s2988_s5 }
 0x7b8   : > { %v1265_v28 = vsub.f32 %v1258_v23, %v1264_v27 }
 0x7ba   : > { %v1266_v29 = vmul.f32 %v1265_v28, %v1265_v28 }
 0x7bc   : > { %v1267_v30 = vsel %vm627_vm0, %v1266_v29, 0.0 }
 0x7bd   : > { %1268 = vadd.xlane.f32.xlu0 %v1267_v30 }
 0x84a   : > { %v1269_v19 = vpop.xlane.xlu0 %1268 }
 0x84b   : > { %v1270_v33 = vmul.f32 0.03125, %v1269_v19 }
 0x84d   : > { %v1271_v34 = vadd.f32 1e-12, %v1270_v33 }
 0x84f   : > { %2950 = vrsqrt.f32 %v1271_v34 }
 0x859   : > { %v2951_v35 = vpop.eup %2950 }
 0x85a   : > { %v1273_v26 = vmul.f32 %v2951_v35, %v1265_v28 }
 0x85c   : > { %v1280_v38 = vmul.f32 %v2531_v36, %v1273_v26 }
 0x85e   : > { %v1287_v39 = vadd.f32 %v2532_v37, %v1280_v38 }
 0x860   : > { %v1288_v40 = vpack.c.bf16 %v1287_v39, %v1287_v39 }
 0x862   : > { %2743 = vmatmul.mubr.msk.bf16.vlgmr.msra.gmra.mrb[20].mxu0 %vm627_vm0, %v1288_v40 }
 0x863   : > { %2762 = vmatprep.mubr.msk.bf16.mxu0 %vm3081_vm1, %v3080_v9  ;;  %2759 = vmatpush3.bf16.msra.mxu0 %v2920_v12 }
 0x864   : > { %2760 = vmatprep.subr.bf16.mxu0 %v3080_v9 }
 0x867   : > { %2761 = vmatpush3.bf16.msra.mxu0 %v2921_v13 }
 0x868   : > { %2766 = vmatprep.subr.bf16.mxu0 %v3080_v9 }
 0x935   : > { %v1349_v47 = vpop.f32.mrb[20].mxu0 }
 0x936   : > { %v1350_v48 = vadd.f32 %v2533_v45, %v1349_v47  ;;  %v2744_v49 = vpop.f32.mrb[21].mxu0 }
 0x937   : > { %v1352_v50 = vpop.f32.mrb[22].mxu0 }
 0x938   : > { %v1355_v51 = vmul.f32 %v1350_v48, %v1350_v48  ;;  %v2745_v52 = vpop.f32.mrb[23].mxu0 }
 0x93a   : > { %v1356_v53 = vmul.f32 %v1355_v51, %v1350_v48 }
 0x93c   : > { %v1357_v54 = vmul.f32 0.044715, %v1356_v53 }
 0x93e   : > { %v1358_v55 = vadd.f32 %v1357_v54, %v1350_v48 }
 0x940   : > { %v1359_v56 = vmul.f32 0.7978846, %v1358_v55 }
 0x942   : > { %2952 = vtanh.f32 %v1359_v56 }
 0x94c   : > { %v2953_v57 = vpop.eup %2952 }
 0x94d   : > { %v1361_v58 = vadd.f32 1.0, %v2953_v57 }
 0x94f   : > { %v1362_v59 = vmul.f32 0.5, %v1361_v58 }
 0x951   : > { %v1363_v60 = vmul.f32 %v1362_v59, %v1350_v48 }
 0x953   : > { %v1364_v61 = vpack.c.bf16 %v1363_v60, %v1363_v60 }
 0x955   : > { %2755 = vmatmul.mubr.msk.bf16.vlgmr.msra.gmra.mrb[20].mxu1 %vm1397_vm6, %v1364_v61 }
 0x956   : > { %2774 = vmatprep.mubr.msk.bf16.mxu1 %vm3081_vm1, %v3080_v9 }
 0xa28   : > { %v1435_v63 = vpop.f32.mrb[20].mxu1 }
 0xa29   : > { %v1448_v0 = vadd.f32 %v2542_v62, %v1435_v63  ;;  %v2756_v1 = vpop.f32.mrb[21].mxu1 }
 0xa2a   : > { %v1438_v2 = vpop.f32.mrb[22].mxu1 }
 0xa2b   : > { %v2757_v3 = vpop.f32.mrb[23].mxu1  ;;  %v1449_v4 = vadd.f32 %v1448_v0, %v1287_v39 }
 0xa2d   : > { %v1452_v5 = vsel %vm627_vm0, %v1449_v4, 0.0 }
 0xa2e   : > { %1453 = vadd.xlane.f32.xlu0 %v1452_v5 }
 0xabb   : > { %v1454_v6 = vpop.xlane.xlu0 %1453 }
 0xabc   : > { %v1455_v7 = vmul.f32 0.03125, %v1454_v6 }
 0xabe   : > { %v1456_v8 = vsub.f32 %v1449_v4, %v1455_v7 }
 0xac0   : > { %v1457_v10 = vmul.f32 %v1456_v8, %v1456_v8 }
 0xac2   : > { %v1458_v11 = vsel %vm627_vm0, %v1457_v10, 0.0 }
 0xac3   : > { %1459 = vadd.xlane.f32.xlu1 %v1458_v11 }
 0xb50   : > { %v1460_v14 = vpop.xlane.xlu1 %1459 }
 0xb51   : > { %v1461_v15 = vmul.f32 0.03125, %v1460_v14 }
 0xb53   : > { %v1462_v16 = vadd.f32 1e-12, %v1461_v15 }
 0xb55   : > { %2954 = vrsqrt.f32 %v1462_v16 }
 0xb5f   : > { %v2955_v17 = vpop.eup %2954 }
 0xb60   : > { %v1464_v20 = vmul.f32 %v2955_v17, %v1456_v8 }
 0xb62   : > { %v1471_v22 = vmul.f32 %v2543_v18, %v1464_v20 }
 0xb64   : > { %v3450_v23 = vadd.f32 %v2544_v21, %v1471_v22 }
 0xb66   : > { %v1479_v24 = vpack.c.bf16 %v3450_v23, %v3450_v23 }
 0xb68   : > { %2763 = vmatmul.mubr.msk.bf16.vlgmr.msra.gmra.mrb[24].mxu0 %vm627_vm0, %v1479_v24 }
 0xb69   : > { %2768 = vmatprep.mubr.msk.bf16.mxu0 %vm3081_vm1, %v3080_v9 }
 0xc3b   : > { %v1542_v27 = vpop.f32.mrb[24].mxu0 }
 0xc3c   : > { %v1543_v28 = vadd.f32 %v2550_v25, %v1542_v27  ;;  %v2764_v29 = vpop.f32.mrb[25].mxu0 }
 0xc3d   : > { %v1545_v30 = vpop.f32.mrb[26].mxu0 }
 0xc3e   : > { %v3460_v31 = vpack.c.bf16 %v1543_v28, %v1543_v28  ;;  %v2765_v32 = vpop.f32.mrb[27].mxu0 }
 0xc40   : > { %1660 = vrot.lane.b32.xlu1 %v3460_v31, %s3084_s22  ;;  %1550 = vrot.lane.b32.xlu0 %v3460_v31, %s3083_s25  ;;  %s3756_s25 = smov 64   ;;  %s3757_s22 = smov 56  }
 0xc44   : > { %1658 = vrot.lane.b32.xlu1 %v3460_v31, %s3751_s23  ;;  %1770 = vrot.lane.b32.xlu0 %v3460_v31, %s3752_s2  ;;  %s3760_s23 = smov 8  }
 0xc48   : > { %1768 = vrot.lane.b32.xlu1 %v3460_v31, %s3753_s20  ;;  %1880 = vrot.lane.b32.xlu0 %v3460_v31, %s3754_s29 }
 0xc4c   : > { %1878 = vrot.lane.b32.xlu1 %v3460_v31, %s3755_s28 }
 0xcb2   : > { %v1551_v19 = vpop.permute.xlu0 %1550  ;;  %v1661_v34 = vpop.permute.xlu1 %1660 }
 0xcb3   : > { %v1556_v33 = vsel %vm735_vm2, %v1551_v19, 0  ;;  %v1666_v35 = vsel %vm735_vm2, %v1661_v34, 0 }
 0xcb4   : > { %2767 = vmatpush3.bf16.xpose.msra.mxu0 %v1556_v33 }
 0xcb5   : > { %2778 = vmatprep.subr.bf16.mxu0 %v3080_v9 }
 0xcb6   : > { %v1771_v36 = vpop.permute.xlu0 %1770  ;;  %v1659_v26 = vpop.permute.xlu1 %1658 }
 0xcb7   : > { %v1776_v37 = vsel %vm735_vm2, %v1771_v36, 0 }
 0xcba   : > { %v1881_v38 = vpop.permute.xlu0 %1880  ;;  %v1769_v39 = vpop.permute.xlu1 %1768 }
 0xcbb   : > { %2769 = vmatmul.mubr.msk.bf16.vlgmr.msra.gmra.mrb[28].mxu0 %vm735_vm2, %v3460_v31  ;;  %v1886_v40 = vsel %vm735_vm2, %v1881_v38, 0 }
 0xcbc   : > { %2779 = vmatpush3.bf16.xpose.msra.mxu0 %v1666_v35  ;;  %2780 = vmatprep.mubr.msk.bf16.mxu0 %vm3081_vm1, %v3080_v9 }
 0xcbd   : > { %2790 = vmatprep.subr.bf16.mxu0 %v3080_v9 }
 0xcbe   : > { %v1879_v41 = vpop.permute.xlu1 %1878 }
 0xcc3   : > { %2781 = vmatmul.mubr.msk.bf16.vlgmr.msra.gmra.mrb[32].mxu0 %vm735_vm2, %v1659_v26 }
 0xcc4   : > { %2791 = vmatpush3.bf16.xpose.msra.mxu0 %v1776_v37  ;;  %2792 = vmatprep.mubr.msk.bf16.mxu0 %vm3081_vm1, %v3080_v9 }
 0xcc5   : > { %2802 = vmatprep.subr.bf16.mxu0 %v3080_v9 }
 0xccb   : > { %2793 = vmatmul.mubr.msk.bf16.vlgmr.msra.gmra.mrb[36].mxu0 %vm735_vm2, %v1769_v39 }
 0xccc   : > { %2803 = vmatpush3.bf16.xpose.msra.mxu0 %v1886_v40  ;;  %2804 = vmatprep.mubr.msk.bf16.mxu0 %vm3081_vm1, %v3080_v9 }
 0xccd   : > { %2814 = vmatprep.subr.bf16.mxu0 %v3080_v9 }
 0xcd3   : > { %2805 = vmatmul.mubr.msk.bf16.vlgmr.msra.gmra.mrb[40].mxu0 %vm735_vm2, %v1879_v41 }
 0xcd4   : > { %2818 = vmatprep.mubr.msk.bf16.mxu0 %vm3081_vm1, %v3080_v9 }
 0xd8e   : > { %v1592_v42 = vpop.f32.mrb[28].mxu0 }
 0xd8f   : > { %v1593_v43 = vadd.f32 %v1592_v42, %v3327_v46  ;;  %v2770_v44 = vpop.f32.mrb[29].mxu0 }
 0xd90   : > { %v1595_v45 = vpop.f32.mrb[30].mxu0 }
 0xd91   : > { %v2771_v47 = vpop.f32.mrb[31].mxu0  ;;  %v1598_v48 = vsel %vm735_vm2, %v1593_v43, -inf }
 0xd92   : > { %1599 = vmax.xlane.f32.xlu0 %v1598_v48 }
 0xd96   : > { %v1702_v49 = vpop.f32.mrb[32].mxu0 }
 0xd97   : > { %v1703_v50 = vadd.f32 %v1702_v49, %v3327_v46  ;;  %v2782_v51 = vpop.f32.mrb[33].mxu0 }
 0xd98   : > { %v1705_v52 = vpop.f32.mrb[34].mxu0 }
 0xd99   : > { %v2783_v53 = vpop.f32.mrb[35].mxu0  ;;  %v1708_v54 = vsel %vm735_vm2, %v1703_v50, -inf }
 0xd9a   : > { %1709 = vmax.xlane.f32.xlu1 %v1708_v54 }
 0xd9e   : > { %v1812_v55 = vpop.f32.mrb[36].mxu0 }
 0xd9f   : > { %v1813_v56 = vadd.f32 %v1812_v55, %v3327_v46  ;;  %v2794_v57 = vpop.f32.mrb[37].mxu0 }
 0xda0   : > { %v1815_v58 = vpop.f32.mrb[38].mxu0  ;;  %v2922_v57 = vld [vmem:[%s3750_s6 + $0x10] sm:$0xff]  }
 0xda1   : > { %v2795_v59 = vpop.f32.mrb[39].mxu0  ;;  %v1818_v60 = vsel %vm735_vm2, %v1813_v56, -inf  ;;  %2815 = vmatpush3.bf16.msra.mxu0 %v2922_v57  ;;  %v2923_v58 = vld [vmem:[%s3750_s6 + $0x18] sm:$0xff]   ;;  %s2990_s6 = scalar_lea.vmem %s2989_s5, 256 }
 0xda2   : > { %1819 = vmax.xlane.f32.xlu0 %v1818_v60  ;;  %2816 = vmatprep.subr.bf16.mxu0 %v3080_v9 }
 0xda5   : > { %2817 = vmatpush3.bf16.msra.mxu0 %v2923_v58 }
 0xda6   : > { %v1922_v61 = vpop.f32.mrb[40].mxu0  ;;  %2830 = vmatprep.subr.bf16.mxu0 %v3080_v9 }
 0xda7   : > { %v1923_v62 = vadd.f32 %v1922_v61, %v3327_v46  ;;  %v2806_v63 = vpop.f32.mrb[41].mxu0 }
 0xda8   : > { %v1925_v0 = vpop.f32.mrb[42].mxu0 }
 0xda9   : > { %v2807_v1 = vpop.f32.mrb[43].mxu0  ;;  %v1928_v2 = vsel %vm735_vm2, %v1923_v62, -inf }
 0xdaa   : > { %1929 = vmax.xlane.f32.xlu0 %v1928_v2 }
 0xe1f   : > { %v1600_v3 = vpop.xlane.xlu0 %1599 }
 0xe20   : > { %v1601_v4 = vsub.f32 %v1593_v43, %v1600_v3 }
 0xe22   : > { %v1602_v5 = vmul.f32 1.442695, %v1601_v4 }
 0xe24   : > { %2956 = vpow2.f32 %v1602_v5 }
 0xe27   : > { %v1710_v6 = vpop.xlane.xlu1 %1709 }
 0xe28   : > { %v1711_v7 = vsub.f32 %v1703_v50, %v1710_v6 }
 0xe2a   : > { %v1712_v8 = vmul.f32 1.442695, %v1711_v7 }
 0xe2c   : > { %2958 = vpow2.f32 %v1712_v8 }
 0xe2e   : > { %v2957_v10 = vpop.eup %2956 }
 0xe2f   : > { %v1604_v11 = vsel %vm735_vm2, %v2957_v10, 0.0  ;;  %v1820_v12 = vpop.xlane.xlu0 %1819 }
 0xe30   : > { %1605 = vadd.xlane.f32.xlu1 %v1604_v11  ;;  %v1821_v20 = vsub.f32 %v1813_v56, %v1820_v12  ;;  %v2570_v11 = vld [vmem:[%s3704_s7 + $0x1] ss:$0 sm:$0xff] }
 0xe32   : > { %v1822_v21 = vmul.f32 1.442695, %v1821_v20 }
 0xe36   : > { %v2959_v46 = vpop.eup %2958 }
 0xe37   : > { %v1930_v13 = vpop.xlane.xlu0 %1929  ;;  %v1714_v14 = vsel %vm735_vm2, %v2959_v46, 0.0 }
 0xe38   : > { %v1931_v15 = vsub.f32 %v1923_v62, %v1930_v13  ;;  %1715 = vadd.xlane.f32.xlu0 %v1714_v14 }
 0xe3a   : > { %v1932_v16 = vmul.f32 1.442695, %v1931_v15 }
 0xe3c   : > { %2960 = vpow2.f32 %v1932_v16 }
 0xe3d   : > { %2962 = vpow2.f32 %v1822_v21 }
 0xe41   : > { %1610 = vrot.lane.b32.xlu1 %v3460_v31, %s3756_s25  ;;  %s3761_s25 = smov 16  }
 0xe46   : > { %v2961_v17 = vpop.eup %2960 }
 0xe47   : > { %v1934_v18 = vsel %vm735_vm2, %v2961_v17, 0.0  ;;  %v2963_v22 = vpop.eup %2962 }
 0xe48   : > { %1935 = vadd.xlane.f32.xlu0 %v1934_v18  ;;  %v1824_v24 = vsel %vm735_vm2, %v2963_v22, 0.0 }
 0xe5e   : > { %1720 = vrot.lane.b32.xlu0 %v3460_v31, %s3757_s22  ;;  %s3762_s22 = smov 24  }
 0xe65   : > { %1825 = vadd.xlane.f32.xlu1 %v1824_v24 }
 0xe76   : > { %1830 = vrot.lane.b32.xlu1 %v3460_v31, %s3758_s27  ;;  %s2607_s27 = sshll.u32 %s3219_s1, 7 }
 0xe77   : > { %s3628_s2 = scalar_lea.hbm %s3715_s18, %s2607_s27 }
 0xe7a   : > { %1940 = vrot.lane.b32.xlu1 %v3460_v31, %s3759_s24 }
 0xebd   : > { %v1606_v25 = vpop.xlane.xlu1 %1605 }
 0xebe   : > { %2964 = vrcp.f32 %v1606_v25  ;;  %v2924_v25 = vld [vmem:[%s3707_s10 + $0x10] sm:$0xff]  }
 0xec1   : > { %v1611_v27 = vpop.permute.xlu1 %1610 }
 0xec2   : > { %v1616_v28 = vsel %vm799_vm3, %v1611_v27, 0  ;;  %v2925_v27 = vld [vmem:[%s3707_s10 + $0x18] sm:$0xff]  }
 0xec3   : > { %2773 = vmatpush3.bf16.msra.mxu1 %v1616_v28 }
 0xec4   : > { %2784 = vmatprep.subr.bf16.mxu1 %v3080_v9 }
 0xec5   : > { %v1716_v30 = vpop.xlane.xlu0 %1715 }
 0xec6   : > { %2966 = vrcp.f32 %v1716_v30 }
 0xec8   : > { %v2965_v29 = vpop.eup %2964 }
 0xec9   : > { %v1608_v32 = vmul.f32 %v2965_v29, %v2957_v10 }
 0xecb   : > { %v1609_v19 = vpack.c.bf16 %v1608_v32, %v1608_v32  ;;  %v2573_v32 = vld [vmem:[%s3705_s8 + $0x1] ss:$0 sm:$0xff] }
 0xecd   : > { %2775 = vmatmul.mubr.msk.bf16.vlgmr.msra.gmra.mrb[24].mxu1 %vm735_vm2, %v1609_v19 }
 0xece   : > { %2786 = vmatprep.mubr.msk.bf16.mxu1 %vm3081_vm1, %v3080_v9 }
 0xed0   : > { %v2967_v33 = vpop.eup %2966 }
 0xed1   : > { %v1718_v34 = vmul.f32 %v2967_v33, %v2959_v46  ;;  %v2574_v33 = vld [vmem:[%s3706_s9 + $0x1] ss:$0 sm:$0xff] }
 0xed3   : > { %v1719_v26 = vpack.c.bf16 %v1718_v34, %v1718_v34 }
 0xed5   : > { %v1936_v31 = vpop.xlane.xlu0 %1935 }
 0xed9   : > { %v1721_v35 = vpop.permute.xlu0 %1720 }
 0xeda   : > { %v1726_v36 = vsel %vm799_vm3, %v1721_v35, 0 }
 0xedb   : > { %2785 = vmatpush3.bf16.msra.mxu1 %v1726_v36  ;;  %v2926_v36 = vld [vmem:[%s3709_s12 + $0x20] sm:$0xff]  }
 0xedc   : > { %2796 = vmatprep.subr.bf16.mxu1 %v3080_v9 }
 0xede   : > { %2787 = vmatmul.mubr.msk.bf16.vlgmr.msra.gmra.mrb[28].mxu1 %vm735_vm2, %v1719_v26  ;;  %v2927_v26 = vld [vmem:[%s3709_s12 + $0x28] sm:$0xff]  }
 0xedf   : > { %2798 = vmatprep.mubr.msk.bf16.mxu1 %vm3081_vm1, %v3080_v9 }
 0xef2   : > { %v1826_v37 = vpop.xlane.xlu1 %1825 }
 0xef3   : > { %2968 = vrcp.f32 %v1826_v37  ;;  %v2928_v37 = vld [vmem:[%s3709_s12 + $0x30] sm:$0xff]  }
 0xef4   : > { %2970 = vrcp.f32 %v1936_v31 }
 0xef6   : > { %v1831_v38 = vpop.permute.xlu1 %1830 }
 0xef7   : > { %v1836_v39 = vsel %vm799_vm3, %v1831_v38, 0  ;;  %v2929_v38 = vld [vmem:[%s3709_s12 + $0x38] sm:$0xff]  }
 0xef8   : > { %2797 = vmatpush3.bf16.msra.mxu1 %v1836_v39  ;;  %v2580_v39 = vld [vmem:[%s3708_s11 + $0x1] ss:$0 sm:$0xff] }
 0xef9   : > { %2808 = vmatprep.subr.bf16.mxu1 %v3080_v9 }
 0xefa   : > { %v1941_v42 = vpop.permute.xlu1 %1940 }
 0xefb   : > { %v1946_v45 = vsel %vm799_vm3, %v1941_v42, 0 }
 0xefd   : > { %v2969_v40 = vpop.eup %2968 }
 0xefe   : > { %v1828_v41 = vmul.f32 %v2969_v40, %v2963_v22  ;;  %v2971_v44 = vpop.eup %2970 }
 0xeff   : > { %v1938_v47 = vmul.f32 %v2971_v44, %v2961_v17 }
 0xf00   : > { %v1829_v43 = vpack.c.bf16 %v1828_v41, %v1828_v41 }
 0xf01   : > { %v1939_v48 = vpack.c.bf16 %v1938_v47, %v1938_v47 }
 0xf02   : > { %2799 = vmatmul.mubr.msk.bf16.vlgmr.msra.gmra.mrb[32].mxu1 %vm735_vm2, %v1829_v43 }
 0xf03   : > { %2809 = vmatpush3.bf16.msra.mxu1 %v1946_v45  ;;  %2810 = vmatprep.mubr.msk.bf16.mxu1 %vm3081_vm1, %v3080_v9 }
 0xf04   : > { %2822 = vmatprep.subr.bf16.mxu1 %v3080_v9 }
 0xf0a   : > { %2811 = vmatmul.mubr.msk.bf16.vlgmr.msra.gmra.mrb[36].mxu1 %vm735_vm2, %v1939_v48 }
 0xf0b   : > { %2826 = vmatprep.mubr.msk.bf16.mxu1 %vm3081_vm1, %v3080_v9  ;;  %2823 = vmatpush3.bf16.msra.mxu1 %v2924_v25 }
 0xf0c   : > { %2824 = vmatprep.subr.bf16.mxu1 %v3080_v9 }
 0xf0f   : > { %2825 = vmatpush3.bf16.msra.mxu1 %v2925_v27 }
 0xf10   : > { %2842 = vmatprep.subr.bf16.mxu1 %v3080_v9 }
 0xfa0   : > { %v1652_v49 = vpop.f32.mrb[24].mxu1 }
 0xfa1   : > { %v2776_v50 = vpop.f32.mrb[25].mxu1 }
 0xfa2   : > { %v1655_v51 = vpop.f32.mrb[26].mxu1 }
 0xfa3   : > { %v2777_v52 = vpop.f32.mrb[27].mxu1 }
 0xfb1   : > { %v1762_v53 = vpop.f32.mrb[28].mxu1 }
 0xfb2   : > { %1989 = vrot.lane.b32.xlu0 %v1762_v53, %s3760_s23  ;;  %v2788_v54 = vpop.f32.mrb[29].mxu1 }
 0xfb3   : > { %v1765_v55 = vpop.f32.mrb[30].mxu1 }
 0xfb4   : > { %v2789_v56 = vpop.f32.mrb[31].mxu1 }
 0xfb5   : > { %v2598_v56 = vld [vmem:[%s3710_s13 + $0x1] ss:$0 sm:$0xff] }
 0xfd5   : > { %v1872_v59 = vpop.f32.mrb[32].mxu1 }
 0xfd6   : > { %1993 = vrot.lane.b32.xlu1 %v1872_v59, %s3761_s25  ;;  %v2800_v60 = vpop.f32.mrb[33].mxu1 }
 0xfd7   : > { %v1875_v61 = vpop.f32.mrb[34].mxu1 }
 0xfd8   : > { %v2801_v62 = vpop.f32.mrb[35].mxu1 }
 0xfdd   : > { %v1982_v63 = vpop.f32.mrb[36].mxu1 }
 0xfde   : > { %1997 = vrot.lane.b32.xlu0 %v1982_v63, %s3762_s22  ;;  %v2812_v0 = vpop.f32.mrb[37].mxu1  ;;  %s3609_s22 = sand.u32 1, %s3070_s30  }
 0xfdf   : > { %v1985_v1 = vpop.f32.mrb[38].mxu1  ;;  %s2511_s23 = sshll.u32 %s3609_s22, 3  ;;  %s2381_s28 = scalar_lea.sflag [#allocation3], %s3609_s22 }
 0xfe0   : > { %v2813_v2 = vpop.f32.mrb[39].mxu1  ;;  %s608_s29 = scalar_lea.vmem [#allocation2], %s2511_s23 }
 0xfe1   : > { %s2398_s20 = sshll.u32 %s608_s29, 4  ;;  %s2399_s20 = int_to_ptr.vmem [resolvable:$true] %s2398_s20 }
 0xfe2   : > { %s2984_s25 = scalar_lea.vmem %s2399_s20, 128  ;;  %p2991_p0 = scmp.lt.s32.totalorder %s2399_s20, %s2989_s5 }
 0xfe3   : > { %p2985_p11 = scmp.ne.s32.totalorder %s2399_s20, %s2984_s25  ;;  %p2992_p1 = scmp.lt.s32.totalorder %s2990_s6, %s2984_s25 }
 0xfe5   : > { %p2986_p12 = pnand %p2985_p11, %p3236_p5  ;;  %p2993_p2 = por %p2992_p1, %p2991_p0 }
 0xfe7   : > { %p2987_p13 = pneg %p2986_p12 }
 0xfe9   : > { %p2994_p3 = pnand %p2993_p2, %p2987_p13 }
0x1024   : > { %v1990_v3 = vpop.permute.xlu0 %1989 }
0x1025   : > { %v2000_v5 = vsel %vm735_vm2, %v1652_v49, %v1990_v3 }
0x1048   : > { %v1994_v4 = vpop.permute.xlu1 %1993 }
0x1049   : > { %v2001_v6 = vsel %vm1186_vm4, %v2000_v5, %v1994_v4  ;;  %v2930_v5 = vld [vmem:[%s3713_s16] sm:$0xff]  }
0x1050   : > { %v1998_v7 = vpop.permute.xlu0 %1997 }
0x1051   : > { %v2002_v8 = vsel %vm1188_vm5, %v2001_v6, %v1998_v7  ;;  %v2931_v6 = vld [vmem:[%s3713_s16 + $0x8] sm:$0xff]  }
0x1052   : > { %v2003_v10 = vpack.c.bf16 %v2002_v8, %v2002_v8 }
0x1054   : > { %2819 = vmatmul.mubr.msk.bf16.vlgmr.msra.gmra.mrb[44].mxu0 %vm627_vm0, %v2003_v10 }
0x1055   : > { %2838 = vmatprep.mubr.msk.bf16.mxu0 %vm3081_vm1, %v3080_v9  ;;  %2831 = vmatpush3.bf16.msra.mxu0 %v2926_v36 }
0x1056   : > { %2832 = vmatprep.subr.bf16.mxu0 %v3080_v9 }
0x1059   : > { %2833 = vmatpush3.bf16.msra.mxu0 %v2927_v26 }
0x105a   : > { %2834 = vmatprep.subr.bf16.mxu0 %v3080_v9 }
0x105d   : > { %2835 = vmatpush3.bf16.msra.mxu0 %v2928_v37 }
0x105e   : > { %2836 = vmatprep.subr.bf16.mxu0 %v3080_v9 }
0x1061   : > { %2837 = vmatpush3.bf16.msra.mxu0 %v2929_v38 }
0x1127   : > { %v2058_v12 = vpop.f32.mrb[44].mxu0 }
0x1128   : > { %v2072_v46 = vadd.f32 %v2570_v11, %v2058_v12  ;;  %v2820_v13 = vpop.f32.mrb[45].mxu0  ;;  %v2601_v12 = vld [vmem:[%s3711_s14 + $0x1] ss:$0 sm:$0xff] }
0x1129   : > { %v2061_v14 = vpop.f32.mrb[46].mxu0  ;;  %v2602_v13 = vld [vmem:[%s3712_s15 + $0x1] ss:$0 sm:$0xff] }
0x112a   : > { %v2821_v15 = vpop.f32.mrb[47].mxu0  ;;  %v2073_v16 = vadd.f32 %v2072_v46, %v3450_v23 }
0x112c   : > { %v2078_v17 = vsel %vm627_vm0, %v2073_v16, 0.0 }
0x112d   : > { %2079 = vadd.xlane.f32.xlu1 %v2078_v17 }
0x11ba   : > { %v2080_v18 = vpop.xlane.xlu1 %2079 }
0x11bb   : > { %v2081_v20 = vmul.f32 0.03125, %v2080_v18 }
0x11bd   : > { %v2082_v21 = vsub.f32 %v2073_v16, %v2081_v20  ;;  %v2307_v16 = vld [vmem:[%s3714_s17] sm:$0x1] }
0x11bf   : > { %v2083_v22 = vmul.f32 %v2082_v21, %v2082_v21 }
0x11c1   : > { %v2084_v24 = vsel %vm627_vm0, %v2083_v22, 0.0 }
0x11c2   : > { %2085 = vadd.xlane.f32.xlu0 %v2084_v24 }
0x124f   : > { %v2086_v23 = vpop.xlane.xlu0 %2085 }
0x1250   : > { %v2087_v28 = vmul.f32 0.03125, %v2086_v23 }
0x1252   : > { %v2088_v29 = vadd.f32 1e-12, %v2087_v28 }
0x1254   : > { %2972 = vrsqrt.f32 %v2088_v29 }
0x125e   : > { %v2973_v30 = vpop.eup %2972 }
0x125f   : > { %v2090_v19 = vmul.f32 %v2973_v30, %v2082_v21 }
0x1261   : > { %v2097_v31 = vmul.f32 %v2573_v32, %v2090_v19 }
0x1263   : > { %v2104_v34 = vadd.f32 %v2574_v33, %v2097_v31 }
0x1265   : > { %v2105_v35 = vpack.c.bf16 %v2104_v34, %v2104_v34 }
0x1267   : > { %2827 = vmatmul.mubr.msk.bf16.vlgmr.msra.gmra.mrb[40].mxu1 %vm627_vm0, %v2105_v35 }
0x1268   : > { %2846 = vmatprep.mubr.msk.bf16.mxu1 %vm3081_vm1, %v3080_v9  ;;  %2843 = vmatpush3.bf16.msra.mxu1 %v2930_v5 }
0x1269   : > { %2844 = vmatprep.subr.bf16.mxu1 %v3080_v9 }
0x126c   : > { %2845 = vmatpush3.bf16.msra.mxu1 %v2931_v6 }
0x133a   : > { %v2168_v40 = vpop.f32.mrb[40].mxu1 }
0x133b   : > { %v2169_v41 = vadd.f32 %v2580_v39, %v2168_v40  ;;  %v2828_v42 = vpop.f32.mrb[41].mxu1 }
0x133c   : > { %v2171_v43 = vpop.f32.mrb[42].mxu1 }
0x133d   : > { %v2174_v44 = vmul.f32 %v2169_v41, %v2169_v41  ;;  %v2829_v45 = vpop.f32.mrb[43].mxu1 }
0x133f   : > { %v2175_v47 = vmul.f32 %v2174_v44, %v2169_v41 }
0x1341   : > { %v2176_v48 = vmul.f32 0.044715, %v2175_v47 }
0x1343   : > { %v2177_v49 = vadd.f32 %v2176_v48, %v2169_v41 }
0x1345   : > { %v2178_v50 = vmul.f32 0.7978846, %v2177_v49 }
0x1347   : > { %2974 = vtanh.f32 %v2178_v50 }
0x1351   : > { %v2975_v51 = vpop.eup %2974 }
0x1352   : > { %v2180_v52 = vadd.f32 1.0, %v2975_v51 }
0x1354   : > { %v2181_v53 = vmul.f32 0.5, %v2180_v52 }
0x1356   : > { %v2182_v54 = vmul.f32 %v2181_v53, %v2169_v41 }
0x1358   : > { %v2183_v55 = vpack.c.bf16 %v2182_v54, %v2182_v54 }
0x135a   : > { %2839 = vmatmul.mubr.msk.bf16.vlgmr.msra.gmra.mrb[48].mxu0 %vm1397_vm6, %v2183_v55 }
0x142d   : > { %v2254_v57 = vpop.f32.mrb[48].mxu0 }
0x142e   : > { %v2268_v58 = vadd.f32 %v2598_v56, %v2254_v57  ;;  %v2840_v59 = vpop.f32.mrb[49].mxu0 }
0x142f   : > { %v2257_v60 = vpop.f32.mrb[50].mxu0 }
0x1430   : > { %v2841_v61 = vpop.f32.mrb[51].mxu0  ;;  %v2269_v62 = vadd.f32 %v2268_v58, %v2104_v34 }
0x1432   : > { %v2274_v63 = vsel %vm627_vm0, %v2269_v62, 0.0 }
0x1433   : > { %2275 = vadd.xlane.f32.xlu0 %v2274_v63 }
0x14c0   : > { %v2276_v0 = vpop.xlane.xlu0 %2275 }
0x14c1   : > { %v2277_v1 = vmul.f32 0.03125, %v2276_v0 }
0x14c3   : > { %v2278_v2 = vsub.f32 %v2269_v62, %v2277_v1 }
0x14c5   : > { %v2279_v3 = vmul.f32 %v2278_v2, %v2278_v2 }
0x14c7   : > { %v2280_v4 = vsel %vm627_vm0, %v2279_v3, 0.0 }
0x14c8   : > { %2281 = vadd.xlane.f32.xlu1 %v2280_v4 }
0x1555   : > { %v2282_v7 = vpop.xlane.xlu1 %2281 }
0x1556   : > { %v2283_v8 = vmul.f32 0.03125, %v2282_v7 }
0x1558   : > { %v2284_v10 = vadd.f32 1e-12, %v2283_v8 }
0x155a   : > { %2976 = vrsqrt.f32 %v2284_v10 }
0x1564   : > { %v2977_v11 = vpop.eup %2976 }
0x1565   : > { %v2286_v46 = vmul.f32 %v2977_v11, %v2278_v2 }
0x1567   : > { %v2293_v9 = vmul.f32 %v2601_v12, %v2286_v46 }
0x1569   : > { %v2300_v14 = vadd.f32 %v2602_v13, %v2293_v9 }
0x156b   : > { %v2302_v15 = vpack.c.bf16 %v2300_v14, %v2300_v14  ;;  %2301 = vst.msk [vmem:[%s608_s29] sm:$0xff] %vm627_vm0, %v2300_v14 }
0x156d   : > { %2847 = vmatmul.mubr.msk.bf16.vlgmr.msra.gmra.mrb[44].mxu1 %vm627_vm0, %v2302_v15 }
0x1640   : > { %v2357_v17 = vpop.f32.mrb[44].mxu1 }
0x1641   : > { %v2358_v18 = vadd.f32 %v2357_v17, %v2307_v16  ;;  %v2848_v20 = vpop.f32.mrb[45].mxu1 }
0x1642   : > { %v2360_v21 = vpop.f32.mrb[46].mxu1 }
0x1643   : > { %2978 = vtanh.f32 %v2358_v18  ;;  %v2849_v22 = vpop.f32.mrb[47].mxu1 }
0x164d   : > { %v2979_v24 = vpop.eup %2978 }
0x164e   : > { %v2364_v25 = vmul.f32 %v2979_v24, %v2979_v24 }
0x1650   : > { %v2366_v27 = vsel %vm2365_vm7, %v2364_v25, 0.0 }
0x1651   : > { %2367 = vadd.xlane.f32.xlu0 %v2366_v27 }
0x1652   : > { %2997 = shalt.err (!%p2994_p3)
}
0x1653   : > { %s2998_s29 = scalar_lea.hbm %s3628_s2, 128  ;;  %s3002_s4 = scalar_lea.hbm %s3715_s18, 256 }
0x1654   : > { %p2999_p4 = scmp.ne.s32.totalorder %s3628_s2, %s2998_s29  ;;  %p3003_p9 = scmp.lt.u32.totalorder %s3628_s2, %s3715_s18 }
0x1655   : > { %p3004_p10 = scmp.lt.u32.totalorder %s3002_s4, %s2998_s29  ;;  %p3006_p12 = scmp.lt.u32.totalorder %s2998_s29, %s3628_s2 }
0x1656   : > { %p3000_p7 = pnand %p2999_p4, %p3236_p5 }
0x1657   : > { %p3005_p11 = por %p3004_p10, %p3003_p9 }
0x1658   : > { %p3001_p8 = pneg %p3000_p7 }
0x1659   : > { %p3007_p13 = por %p3006_p12, %p3005_p11 }
0x165b   : > { %p3008_p0 = pnand %p3007_p13, %p3001_p8 }
0x165d   : > { %3011 = shalt.err (!%p3008_p0)
}
0x165e   : > { %2850 = dma.vmem_to_hbm [thread:$0]  (%p3236_p5), %s2399_s20, 128, %s3628_s2, %s2381_s28  }
0x165f   : > { %s2608_s6 = sshll.u32 %s3219_s1, 4  ;;  %s614_s25 = scalar_lea.vmem [#allocation4], %s3609_s22 }
0x1660   : > { %s2411_s29 = sshll.u32 %s614_s25, 4  ;;  %s3653_s20 = scalar_lea.hbm %s3716_s19, %s2608_s6  ;;  %s3655_s29 = int_to_ptr.vmem [resolvable:$true] %s2411_s29 }
0x1661   : > { %s2386_s28 = scalar_lea.sflag [#allocation5], %s3609_s22  ;;  %s3012_s24 = scalar_lea.vmem %s3655_s29, 16 }
0x1662   : > { %p3013_p1 = scmp.ne.s32.totalorder %s3655_s29, %s3012_s24  ;;  %s3097_s1 = smov [#allocation4]  }
0x1663   : > { %s3016_s4 = sshll.u32 %s3097_s1, 4  ;;  %s3017_s4 = int_to_ptr.vmem [resolvable:$false] %s3016_s4 }
0x1664   : > { %p3014_p2 = pnand %p3013_p1, %p3236_p5  ;;  %s3018_s23 = scalar_lea.vmem %s3017_s4, 32 }
0x1665   : > { %p3019_p4 = scmp.lt.s32.totalorder %s3655_s29, %s3017_s4  ;;  %p3020_p7 = scmp.lt.s32.totalorder %s3018_s23, %s3012_s24 }
0x1666   : > { %p3015_p3 = pneg %p3014_p2 }
0x1667   : > { %p3021_p8 = por %p3020_p7, %p3019_p4 }
0x1669   : > { %p3022_p9 = pnand %p3021_p8, %p3015_p3 }
0x16de   : > { %v2368_v23 = vpop.xlane.xlu0 %2367 }
0x16df   : > { %2980 = vrsqrt.f32 %v2368_v23  ;;  %vm2371_vm8 = vcmp.eq.f32.partialorder %v2368_v23, inf  ;;  %v2374_v30 = vand.u32 2147483648, %v2368_v23  ;;  %vm2373_vm9 = vcmp.eq.f32.partialorder %v2368_v23, 0.0 }
0x16e9   : > { %v2981_v28 = vpop.eup %2980 }
0x16ea   : > { %v2370_v29 = vmul.f32 %v2981_v28, %v2368_v23 }
0x16ec   : > { %v2372_v32 = vsel %vm2371_vm8, %v2368_v23, %v2370_v29 }
0x16ed   : > { %v2375_v19 = vsel %vm2373_vm9, %v2374_v30, %v2372_v32 }
0x16ee   : > { %v2376_v33 = vmax.f32 %v2375_v19, 1e-12 }
0x16f0   : > { %2982 = vrcp.f32 %v2376_v33 }
0x16fa   : > { %v2983_v31 = vpop.eup %2982 }
0x16fb   : > { %v2378_v34 = vmul.f32 %v2983_v31, %v2979_v24 }
0x16fd   : > { %2379 = vst.msk [vmem:[%s614_s25] sm:$0x1] %vm2365_vm7, %v2378_v34 }
0x16fe   : > { %3025 = shalt.err (!%p3022_p9)
}
0x16ff   : > { %s3026_s22 = scalar_lea.hbm %s3653_s20, 16  ;;  %s3030_s25 = scalar_lea.hbm %s3716_s19, 32 }
0x1700   : > { %p3027_p10 = scmp.ne.s32.totalorder %s3653_s20, %s3026_s22  ;;  %p3031_p13 = scmp.lt.u32.totalorder %s3653_s20, %s3716_s19 }
0x1701   : > { %p3032_p0 = scmp.lt.u32.totalorder %s3030_s25, %s3026_s22  ;;  %p3034_p2 = scmp.lt.u32.totalorder %s3026_s22, %s3653_s20 }
0x1702   : > { %p3028_p11 = pnand %p3027_p10, %p3236_p5 }
0x1703   : > { %p3033_p1 = por %p3032_p0, %p3031_p13 }
0x1704   : > { %p3029_p12 = pneg %p3028_p11 }
0x1705   : > { %p3035_p3 = por %p3034_p2, %p3033_p1 }
0x1707   : > { %p3036_p4 = pnand %p3035_p3, %p3029_p12 }
0x1709   : > { %3039 = shalt.err (!%p3036_p4)
}
0x170a   : > { %2851 = dma.vmem_to_hbm [thread:$0]  (%p3236_p5), %s3655_s29, 16, %s3653_s20, %s2386_s28  }
0x170b PF: > { %p2861_p7 = scmp.ge.s32.totalorder %s3078_s21, 2  ;;  %s2423_s24 = sand.u32 1, %s3066_s0  }
0x170c   : > { %s2424_s1 = scalar_lea.sflag [#allocation3], %s2423_s24 }
0x170d   : > { %p2855_p8 = pnand %p2861_p7, %p3240_p6 }
0x170f   : > { %3057 = dma.done.wait (!%p2855_p8), %s2424_s1, 128  }
0x1710   : > { %3059 = vsyncadd (!%p2855_p8), %s2424_s1, 4294967168  ;;  %s2433_s4 = scalar_lea.sflag [#allocation5], %s2423_s24 }
0x1711   : > { %3061 = dma.done.wait (!%p2855_p8), %s2433_s4, 16  }
0x1712   : > { %3063 = vsyncadd (!%p2855_p8), %s2433_s4, 4294967280  ;;  %s3763_s21 = sld [smem:[#allocation9_spill]]  ;;  %s3764_s3 = sld [smem:[#allocation8_spill]] }
0x1713   : > { %s3765_s20 = sld [smem:[#allocation10_spill]]  ;;  %s3766_s0 = smov %s3070_s30 }
0x1718   : > { %p33_p5 = scmp.ge.s32.totalorder %s3763_s21, 4   ;;  %s3767_s30 = smov %s3764_s3 }
0x171a   :  { %35 = sbr.rel (!%p33_p5) target bundleno = 13 (0xd), region = 159 }
0x1721   :  { %2437 = vsyncpa [#allocation3], 1 }
0x1722   :  { %2439 = vsyncpa [#allocation3 + $0x1], 1 }
0x1723   :  { %2440 = vsyncpa [#allocation5], 1 }
0x1724   :  { %2442 = vsyncpa [#allocation5 + $0x1], 1 }

</bundles_post_ra>
